<compile_context>
chip_gen: v7x
topology: tpu7x:2x2x1
jax: 0.10.0
libtpu: 0.0.40
codegen_flags: <defaults>
</compile_context>

<pallas_src>
import functools

import jax
import jax.numpy as jnp
from jax.experimental import pallas as pl
from jax.experimental.pallas import tpu as pltpu


def _l1_partial_kernel(est_ref, gt_ref, out_ref, *, bm: int, num_rows: int,
                       needs_row_mask: bool):
    """Per-block partial sums of |est - gt|, folded to an (8, L) output tile."""
    e = est_ref[...].astype(jnp.float32)
    g = gt_ref[...].astype(jnp.float32)
    d = jnp.abs(e - g)                                   # (bm, L) f32

    def fold8(x):
        # (bm, L) -> (bm//8, 8, L): leading-dim split (layout preserving), then
        # reduce over the leading axis -> pure VPU adds, unmasked (8, L) store.
        return x.reshape(bm // 8, 8, x.shape[-1]).sum(axis=0)

    if not needs_row_mask:
        out_ref[...] = fold8(d)
    else:
        i = pl.program_id(0)
        last = pl.num_programs(0) - 1

        @pl.when(i != last)
        def _():
            out_ref[...] = fold8(d)

        @pl.when(i == last)
        def _():
            # Zero the padded rows of the tail block that lie past num_rows.
            # (bm, 1) column iota broadcast against lanes keeps this cheap, and
            # only the final grid step pays for it.
            row_ids = jax.lax.broadcasted_iota(jnp.int32, (bm, 1), 0)
            valid = (i * bm + row_ids) < num_rows
            out_ref[...] = fold8(jnp.where(valid, d, 0.0))


def _vmem_budget_bytes() -> int:
    """~Half of physical VMEM, capped at 64 MiB (v5e/v6e: 128 MiB, v7x: 64 MiB)."""
    cap = 128 * 1024 * 1024
    try:
        cap = int(getattr(pltpu.get_tpu_info(), "vmem_capacity_bytes", cap))
    except Exception:
        pass
    return min(cap // 2, 64 * 1024 * 1024)


def _pick_lane_width(n_elems: int):
    """Lane-dense factorization of the contiguous flat buffer (last dim % 128 == 0)."""
    for lane in (2048, 1024, 512, 256, 128):
        if n_elems % lane == 0 and (n_elems // lane) >= 8:
            return lane
    return None


def my_l1_loss(est: jax.Array, gt: jax.Array, *,
               min_pallas_elems: int = 64 * 1024) -> jax.Array:
    """Pallas implementation of nn.L1Loss() (mean reduction) for (B, C, T) inputs."""
    assert est.shape == gt.shape, "est/gt must have identical shapes"
    n_elems = est.size

    def _fallback():
        # Tiny / degenerate shapes: fused XLA elementwise+reduce beats a kernel launch.
        return jnp.mean(jnp.abs(est.astype(jnp.float32) - gt.astype(jnp.float32)))

    if n_elems < min_pallas_elems:
        return _fallback()

    itemsize = jnp.dtype(est.dtype).itemsize
    sub = {4: 8, 2: 16, 1: 32}.get(itemsize, 8)          # dtype-aware sublane multiple

    lane = _pick_lane_width(n_elems)
    if lane is not None:
        rows = n_elems // lane
    else:
        # Truly ragged element count: keep the natural (B*C, T) factorization.
        # The lane dim stays full-extent in the BlockSpec, so no 128-divisibility
        # requirement (Mosaic pads lanes internally).
        if est.ndim < 2:
            return _fallback()
        lane = est.shape[-1]
        rows = n_elems // lane
        if rows < 8:
            return _fallback()
    est2 = est.reshape(rows, lane)
    gt2 = gt.reshape(rows, lane)

    # Generation-aware block sizing: target ~6-8 MiB per input block (double
    # buffered: 2 inputs x 2 buffers), sized against this chip's VMEM.
    vmem_budget = _vmem_budget_bytes()
    target_block_bytes = min(8 * 1024 * 1024, vmem_budget // 5)
    row_bytes = lane * itemsize
    bm = max(sub, target_block_bytes // row_bytes)
    bm = min(bm, rows)
    bm = max(8, (bm // sub) * sub)                       # always a multiple of 8

    grid_m = pl.cdiv(rows, bm)
    needs_row_mask = (rows % bm) != 0

    block_bytes = bm * lane * itemsize
    out_block_bytes = 8 * lane * 4
    vmem_limit = int(min(
        vmem_budget,
        max(16 * 1024 * 1024, 4 * block_bytes + 2 * out_block_bytes + (4 << 20))))

    kernel = functools.partial(
        _l1_partial_kernel, bm=bm, num_rows=rows, needs_row_mask=needs_row_mask)

    cost = pl.CostEstimate(
        flops=3 * n_elems,                               # sub + abs + add per element
        transcendentals=0,
        bytes_accessed=2 * n_elems * itemsize + grid_m * 8 * lane * 4,
    )

    # TODO(synk): on v7x, verify with xprof that the "parallel" axis is sharded
    # across both TensorCores; if not, switch to pltpu.CORE_PARALLEL.
    partials = pl.pallas_call(
        kernel,
        out_shape=jax.ShapeDtypeStruct((grid_m * 8, lane), jnp.float32),
        grid_spec=pltpu.PrefetchScalarGridSpec(
            num_scalar_prefetch=0,
            grid=(grid_m,),
            in_specs=[
                pl.BlockSpec((bm, lane), lambda i: (i, 0)),
                pl.BlockSpec((bm, lane), lambda i: (i, 0)),
            ],
            out_specs=pl.BlockSpec((8, lane), lambda i: (i, 0)),
        ),
        compiler_params=pltpu.CompilerParams(
            dimension_semantics=("parallel",),           # independent per-block partials
            vmem_limit_bytes=vmem_limit,
        ),
        cost_estimate=cost,
    )(est2, gt2)

    # Tiny final reduction of the (grid_m*8, lane) partials in plain JAX.
    return jnp.sum(partials) / jnp.float32(n_elems)


if __name__ == "__main__":
    key = jax.random.PRNGKey(0)
    ks = jax.random.split(key, 8)

    def ref_loss(a, b):
        return jnp.mean(jnp.abs(a.astype(jnp.float32) - b.astype(jnp.float32)))

    # Case 1: lane-dense Pallas path (N % 128 == 0), f32.
    B, C, T = 2, 4, 32768
    est = jax.random.normal(ks[0], (B, C, T), dtype=jnp.float32)
    gt = jax.random.normal(ks[1], (B, C, T), dtype=jnp.float32)
    loss = jax.block_until_ready(my_l1_loss(est, gt))
    ref = ref_loss(est, gt)
    assert jnp.allclose(loss, ref, rtol=1e-4, atol=1e-6), (loss, ref)

    # Case 2: ragged shape (T and N not multiples of 128) -> masked tail row block.
    B2, C2, T2 = 3, 5, 10000
    est2 = jax.random.normal(ks[2], (B2, C2, T2), dtype=jnp.float32)
    gt2 = jax.random.normal(ks[3], (B2, C2, T2), dtype=jnp.float32)
    loss2 = jax.block_until_ready(my_l1_loss(est2, gt2))
    ref2 = ref_loss(est2, gt2)
    assert jnp.allclose(loss2, ref2, rtol=1e-4, atol=1e-6), (loss2, ref2)

    # Case 3: bf16 inputs (16-sublane rounding, in-kernel f32 widening).
    est3 = jax.random.normal(ks[4], (B, C, T), dtype=jnp.bfloat16)
    gt3 = jax.random.normal(ks[5], (B, C, T), dtype=jnp.bfloat16)
    loss3 = jax.block_until_ready(my_l1_loss(est3, gt3))
    ref3 = ref_loss(est3, gt3)
    assert jnp.allclose(loss3, ref3, rtol=1e-3, atol=1e-5), (loss3, ref3)

    # Case 4: tiny input -> plain-JAX fallback path.
    B4, C4, T4 = 2, 4, 128
    est4 = jax.random.normal(ks[6], (B4, C4, T4), dtype=jnp.float32)
    gt4 = jax.random.normal(ks[7], (B4, C4, T4), dtype=jnp.float32)
    loss4 = jax.block_until_ready(my_l1_loss(est4, gt4))
    ref4 = ref_loss(est4, gt4)
    assert jnp.allclose(loss4, ref4, rtol=1e-5, atol=1e-6), (loss4, ref4)

    print("KERNEL_OK")
</pallas_src>

<mosaic_0001>
module attributes {stable_mosaic.version = 11 : i64} {
  func.func @_l1_partial_kernel(%arg0: i32, %arg1: memref<128x2048xf32, #tpu.memory_space<vmem>>, %arg2: memref<128x2048xf32, #tpu.memory_space<vmem>>, %arg3: memref<8x2048xf32, #tpu.memory_space<vmem>>) attributes {dimension_semantics = [#tpu.dimension_semantics<parallel>], iteration_bounds = array<i64: 1>, scalar_prefetch = 0 : i64, scratch_operands = 0 : i64, tpu.core_type = #tpu.core_type<tc>, window_params = [{transform_indices = @transform_0, window_bounds = array<i64: 128, 2048>}, {transform_indices = @transform_1, window_bounds = array<i64: 128, 2048>}, {transform_indices = @transform_2, window_bounds = array<i64: 8, 2048>}]} {
    %c0 = arith.constant 0 : index
    %c0_0 = arith.constant 0 : index
    %0 = vector.load %arg1[%c0, %c0_0] : memref<128x2048xf32, #tpu.memory_space<vmem>>, vector<128x2048xf32>
    %c0_1 = arith.constant 0 : index
    %c0_2 = arith.constant 0 : index
    %1 = vector.load %arg2[%c0_1, %c0_2] : memref<128x2048xf32, #tpu.memory_space<vmem>>, vector<128x2048xf32>
    %2 = arith.subf %0, %1 : vector<128x2048xf32>
    %3 = math.absf %2 : vector<128x2048xf32>
    %4 = vector.shape_cast %3 : vector<128x2048xf32> to vector<16x8x2048xf32>
    %cst = arith.constant dense<0.000000e+00> : vector<8x2048xf32>
    %5 = vector.multi_reduction <add>, %4, %cst [0] : vector<16x8x2048xf32> to vector<8x2048xf32>
    %c0_3 = arith.constant 0 : index
    %c0_4 = arith.constant 0 : index
    %6 = vector.load %arg3[%c0_3, %c0_4] : memref<8x2048xf32, #tpu.memory_space<vmem>>, vector<8x2048xf32>
    tpu.vector_store %arg3[%c0_3, %c0_4], %5 {strides = array<i32>} : memref<8x2048xf32, #tpu.memory_space<vmem>>, vector<8x2048xf32>,
    return
  }
  func.func @transform_0(%arg0: i32) -> (i32, i32) {
    %c0_i32 = arith.constant 0 : i32
    %c0_i32_0 = arith.constant 0 : i32
    return %arg0, %c0_i32 : i32, i32
  }
  func.func @transform_1(%arg0: i32) -> (i32, i32) {
    %c0_i32 = arith.constant 0 : i32
    %c0_i32_0 = arith.constant 0 : i32
    return %arg0, %c0_i32 : i32, i32
  }
  func.func @transform_2(%arg0: i32) -> (i32, i32) {
    %c0_i32 = arith.constant 0 : i32
    %c0_i32_0 = arith.constant 0 : i32
    return %arg0, %c0_i32 : i32, i32
  }
}

</mosaic_0001>

<bundles_post_ra>
// kernel: tpu_custom_call.1
= control target key start
LH: loop header
LB: loop body
LE: loop exit
PB: predicated region body
PF: predicated region fallthrough
CT: control target
= control target key end

     0   :  { %7 = vsyncpa [#allocation3], 0  ;;  %s4259_s0 = inlined_call_operand.hbm [shape: f32[128,2048], index: 0, kind: input, shape index: {}]   ;;  %s4260_s1 = inlined_call_operand.hbm [shape: f32[128,2048], index: 1, kind: input, shape index: {}]   ;;  %s4261_s2 = inlined_call_operand.hbm [shape: f32[8,2048], index: 2, kind: output, shape index: {}]  }
   0x1   :  { %8 = vsyncpa [#allocation6], 0 }
   0x2   :  { %9 = vsyncpa [#allocation4], 0  ;;  %s1413_s9 = smov [#allocation2]   ;;  %s1341_s13 = scalar_lea.hbm %s4259_s0, 32768 }
   0x3   :  { %s15_s10 = sshll.u32 %s1413_s9, 4  ;;  %p1342_p0 = scmp.ne.s32.totalorder %s4259_s0, %s1341_s13  ;;  %s16_s10 = int_to_ptr.vmem [resolvable:$true] %s15_s10 }
   0x4   :  { %p1345_p1 = scmp.lt.u32.totalorder %s1341_s13, %s4259_s0 }
   0x6   :  { %p1347_p2 = pnand %p1345_p1, %p1342_p0 }
   0x8   :  { %1350 = shalt.err (!%p1347_p2)
}
   0x9   :  { %s1351_s18 = scalar_lea.vmem %s16_s10, 32768  ;;  %p1356_p4 = scmp.lt.s32.totalorder %s16_s10, %s16_s10 }
   0xa   :  { %p1352_p3 = scmp.ne.s32.totalorder %s16_s10, %s1351_s18  ;;  %p1357_p5 = scmp.lt.s32.totalorder %s1351_s18, %s1351_s18 }
   0xc   :  { %p1358_p6 = por %p1357_p5, %p1356_p4 }
   0xe   :  { %p1359_p7 = pnand %p1358_p6, %p1352_p3 }
  0x10   :  { %1362 = shalt.err (!%p1359_p7)
}
  0x11   :  { %s1414_s19 = smov 2048   ;;  %s1415_s20 = smov 128  }
  0x12   :  { %21 = dma.hbm_to_vmem [thread:$0]  %s4259_s0, 32768, %s16_s10, [#allocation3], %s1414_s19, %s1414_s19, %s1415_s20  }
  0x13   :  { %s1416_s23 = smov [#allocation5]   ;;  %s1363_s27 = scalar_lea.hbm %s4260_s1, 32768 }
  0x14   :  { %s27_s24 = sshll.u32 %s1416_s23, 4  ;;  %p1364_p8 = scmp.ne.s32.totalorder %s4260_s1, %s1363_s27  ;;  %s28_s24 = int_to_ptr.vmem [resolvable:$true] %s27_s24 }
  0x15   :  { %p1367_p9 = scmp.lt.u32.totalorder %s1363_s27, %s4260_s1 }
  0x17   :  { %p1369_p10 = pnand %p1367_p9, %p1364_p8 }
  0x19   :  { %1372 = shalt.err (!%p1369_p10)
}
  0x1a   :  { %s1373_s4 = scalar_lea.vmem %s28_s24, 32768  ;;  %p1378_p12 = scmp.lt.s32.totalorder %s28_s24, %s28_s24 }
  0x1b   :  { %p1374_p11 = scmp.ne.s32.totalorder %s28_s24, %s1373_s4  ;;  %p1379_p13 = scmp.lt.s32.totalorder %s1373_s4, %s1373_s4 }
  0x1d   :  { %p1380_p0 = por %p1379_p13, %p1378_p12 }
  0x1f   :  { %p1381_p1 = pnand %p1380_p0, %p1374_p11 }
  0x21   :  { %1384 = shalt.err (!%p1381_p1)
}
  0x22   :  { %33 = dma.hbm_to_vmem [thread:$0]  %s4260_s1, 32768, %s28_s24, [#allocation6], %s1414_s19, %s1414_s19, %s1415_s20  }
  0x23   :  { %1407 = dma.done.wait [#allocation3], 32768  }
  0x24   :  { %1408 = vsyncadd [#allocation3], 4294934528 }
  0x25   :  { %1409 = dma.done.wait [#allocation6], 32768  }
  0x26   :  { %1410 = vsyncadd [#allocation6], 4294934528  ;;  %v40_v0 = vld [vmem:[#allocation2] sm:$0xff]  ;;  %v1457_v1 = vld [vmem:[#allocation2 + $0x8] sm:$0xff]  ;;  %s1417_s1 = smov [#allocation7]  }
  0x27   :  { %v1459_v2 = vld [vmem:[#allocation2 + $0x10] sm:$0xff]  ;;  %v296_v3 = vld [vmem:[#allocation5] sm:$0xff]  ;;  %v1461_v4 = vld [vmem:[#allocation2 + $0x18] sm:$0xff]  ;;  %s1326_s6 = sshll.u32 %s1417_s1, 4  ;;  %s1327_s6 = int_to_ptr.vmem [resolvable:$true] %s1326_s6 }
  0x28   :  { %v1463_v5 = vld [vmem:[#allocation2 + $0x20] sm:$0xff]  ;;  %v1465_v6 = vld [vmem:[#allocation2 + $0x28] sm:$0xff]  ;;  %v1467_v7 = vld [vmem:[#allocation2 + $0x30] sm:$0xff]  ;;  %v552_v20 = vsub.f32 %v40_v0, %v296_v3  ;;  %s1385_s7 = scalar_lea.vmem %s1327_s6, 2048  ;;  %p1390_p3 = scmp.lt.s32.totalorder %s1327_s6, %s1327_s6 }
  0x29   :  { %v297_v8 = vld [vmem:[#allocation5 + $0x8] sm:$0xff]  ;;  %v1469_v9 = vld [vmem:[#allocation2 + $0x38] sm:$0xff]  ;;  %v1471_v10 = vld [vmem:[#allocation2 + $0x40] sm:$0xff]  ;;  %p1386_p2 = scmp.ne.s32.totalorder %s1327_s6, %s1385_s7  ;;  %p1391_p4 = scmp.lt.s32.totalorder %s1385_s7, %s1385_s7 }
  0x2a   :  { %v1473_v11 = vld [vmem:[#allocation2 + $0x48] sm:$0xff]  ;;  %v298_v12 = vld [vmem:[#allocation5 + $0x10] sm:$0xff]  ;;  %v1475_v13 = vld [vmem:[#allocation5 + $0x18] sm:$0xff]  ;;  %v553_v27 = vsub.f32 %v1457_v1, %v297_v8  ;;  %v1553_v54 = vand.u32 2147483647, %v552_v20 }
  0x2b   :  { %v1477_v14 = vld [vmem:[#allocation2 + $0x50] sm:$0xff]  ;;  %v1479_v15 = vld [vmem:[#allocation2 + $0x58] sm:$0xff]  ;;  %v1481_v16 = vld [vmem:[#allocation2 + $0x60] sm:$0xff]  ;;  %v554_v34 = vsub.f32 %v1459_v2, %v298_v12  ;;  %v555_v41 = vsub.f32 %v1461_v4, %v1475_v13  ;;  %p1392_p5 = por %p1391_p4, %p1390_p3 }
  0x2c   :  { %v1483_v17 = vld [vmem:[#allocation5 + $0x20] sm:$0xff]  ;;  %v1485_v18 = vld [vmem:[#allocation5 + $0x28] sm:$0xff]  ;;  %v1487_v19 = vld [vmem:[#allocation5 + $0x30] sm:$0xff]  ;;  %4670 = vst [vmem:[#allocation19_spill] sm:$0xff] %v1553_v54  ;;  %v1573_v0 = vand.u32 2147483647, %v553_v27 }
  0x2d   :  { %v1489_v21 = vld [vmem:[#allocation2 + $0x68] sm:$0xff]  ;;  %v1491_v22 = vld [vmem:[#allocation2 + $0x70] sm:$0xff]  ;;  %v1493_v23 = vld [vmem:[#allocation2 + $0x78] sm:$0xff]  ;;  %v556_v42 = vsub.f32 %v1463_v5, %v1483_v17  ;;  %v557_v43 = vsub.f32 %v1465_v6, %v1485_v18  ;;  %v1593_v17 = vand.u32 2147483647, %v554_v34  ;;  %v4699_v34 = vsub.f32 %v1467_v7, %v1487_v19  ;;  %p1393_p6 = pnand %p1392_p5, %p1386_p2 }
  0x2e   :  { %v1495_v24 = vld [vmem:[#allocation5 + $0x38] sm:$0xff]  ;;  %v1497_v25 = vld [vmem:[#allocation5 + $0x40] sm:$0xff]  ;;  %v1499_v26 = vld [vmem:[#allocation5 + $0x48] sm:$0xff]  ;;  %4675 = vst [vmem:[#allocation24_spill] sm:$0xff] %v1573_v0  ;;  %v1613_v8 = vand.u32 2147483647, %v555_v41 }
  0x2f   :  { %v1502_v28 = vld [vmem:[#allocation2 + $0x80] sm:$0xff]  ;;  %v1504_v29 = vld [vmem:[#allocation2 + $0x88] sm:$0xff]  ;;  %v1506_v30 = vld [vmem:[#allocation2 + $0x90] sm:$0xff]  ;;  %4679 = vst [vmem:[#allocation28_spill] sm:$0xff] %v1593_v17  ;;  %v1633_v12 = vand.u32 2147483647, %v556_v42 }
  0x30   :  { %4662 = vst [vmem:[#allocation11_spill] sm:$0xff] %v1504_v29  ;;  %4663 = vst [vmem:[#allocation12_spill] sm:$0xff] %v1506_v30  ;;  %v1508_v31 = vld [vmem:[#allocation5 + $0x50] sm:$0xff]  ;;  %v1510_v32 = vld [vmem:[#allocation5 + $0x58] sm:$0xff]  ;;  %v1653_v13 = vand.u32 2147483647, %v557_v43 }
  0x31   :  { %v1512_v33 = vld [vmem:[#allocation5 + $0x60] sm:$0xff]  ;;  %v1515_v35 = vld [vmem:[#allocation2 + $0x98] sm:$0xff]  ;;  %v1519_v37 = vld [vmem:[#allocation2 + $0xa8] sm:$0xff]  ;;  %4684 = vst [vmem:[#allocation33_spill] sm:$0xff] %v1613_v8 }
  0x32   :  { %v1517_v36 = vld [vmem:[#allocation2 + $0xa0] sm:$0xff]  ;;  %4665 = vst [vmem:[#allocation14_spill] sm:$0xff] %v1519_v37  ;;  %v1521_v38 = vld [vmem:[#allocation5 + $0x68] sm:$0xff]  ;;  %v1523_v39 = vld [vmem:[#allocation5 + $0x70] sm:$0xff] }
  0x33   :  { %4664 = vst [vmem:[#allocation13_spill] sm:$0xff] %v1517_v36  ;;  %v1525_v40 = vld [vmem:[#allocation5 + $0x78] sm:$0xff]  ;;  %v1535_v45 = vld [vmem:[#allocation2 + $0xb0] sm:$0xff]  ;;  %v1539_v47 = vld [vmem:[#allocation2 + $0xc0] sm:$0xff] }
  0x34   :  { %v1537_v46 = vld [vmem:[#allocation2 + $0xb8] sm:$0xff]  ;;  %4667 = vst [vmem:[#allocation16_spill] sm:$0xff] %v1539_v47  ;;  %v1541_v48 = vld [vmem:[#allocation5 + $0x80] sm:$0xff]  ;;  %v1543_v49 = vld [vmem:[#allocation5 + $0x88] sm:$0xff] }
  0x35   :  { %4666 = vst [vmem:[#allocation15_spill] sm:$0xff] %v1537_v46  ;;  %4668 = vst [vmem:[#allocation17_spill] sm:$0xff] %v1543_v49  ;;  %v1545_v50 = vld [vmem:[#allocation5 + $0x90] sm:$0xff]  ;;  %v1555_v55 = vld [vmem:[#allocation2 + $0xc8] sm:$0xff] }
  0x36   :  { %4669 = vst [vmem:[#allocation18_spill] sm:$0xff] %v1545_v50  ;;  %v1557_v56 = vld [vmem:[#allocation2 + $0xd0] sm:$0xff]  ;;  %v1559_v57 = vld [vmem:[#allocation2 + $0xd8] sm:$0xff]  ;;  %v1563_v59 = vld [vmem:[#allocation5 + $0xa0] sm:$0xff] }
  0x37   :  { %4671 = vst [vmem:[#allocation20_spill] sm:$0xff] %v1559_v57  ;;  %v1561_v58 = vld [vmem:[#allocation5 + $0x98] sm:$0xff]  ;;  %4673 = vst [vmem:[#allocation22_spill] sm:$0xff] %v1563_v59  ;;  %v1565_v60 = vld [vmem:[#allocation5 + $0xa8] sm:$0xff] }
  0x38   :  { %4672 = vst [vmem:[#allocation21_spill] sm:$0xff] %v1561_v58  ;;  %4674 = vst [vmem:[#allocation23_spill] sm:$0xff] %v1565_v60  ;;  %v1575_v1 = vld [vmem:[#allocation2 + $0xe0] sm:$0xff]  ;;  %v1577_v2 = vld [vmem:[#allocation2 + $0xe8] sm:$0xff] }
  0x39   :  { %v1579_v3 = vld [vmem:[#allocation2 + $0xf0] sm:$0xff]  ;;  %v1583_v5 = vld [vmem:[#allocation5 + $0xb8] sm:$0xff]  ;;  %v1585_v6 = vld [vmem:[#allocation5 + $0xc0] sm:$0xff]  ;;  %4689 = vst [vmem:[#allocation38_spill] sm:$0xff] %v1633_v12 }
  0x3a   :  { %4676 = vst [vmem:[#allocation25_spill] sm:$0xff] %v1579_v3  ;;  %v1581_v4 = vld [vmem:[#allocation5 + $0xb0] sm:$0xff]  ;;  %4677 = vst [vmem:[#allocation26_spill] sm:$0xff] %v1583_v5  ;;  %v1595_v18 = vld [vmem:[#allocation2 + $0xf8] sm:$0xff] }
  0x3b   :  { %4678 = vst [vmem:[#allocation27_spill] sm:$0xff] %v1585_v6  ;;  %v1597_v20 = vld [vmem:[#allocation2 + $0x100] sm:$0xff]  ;;  %v1599_v27 = vld [vmem:[#allocation2 + $0x108] sm:$0xff]  ;;  %v1603_v62 = vld [vmem:[#allocation5 + $0xd0] sm:$0xff] }
  0x3c   :  { %4680 = vst [vmem:[#allocation29_spill] sm:$0xff] %v1599_v27  ;;  %v1601_v63 = vld [vmem:[#allocation5 + $0xc8] sm:$0xff]  ;;  %4682 = vst [vmem:[#allocation31_spill] sm:$0xff] %v1603_v62  ;;  %v1605_v61 = vld [vmem:[#allocation5 + $0xd8] sm:$0xff] }
  0x3d   :  { %4681 = vst [vmem:[#allocation30_spill] sm:$0xff] %v1601_v63  ;;  %4683 = vst [vmem:[#allocation32_spill] sm:$0xff] %v1605_v61  ;;  %v1615_v53 = vld [vmem:[#allocation2 + $0x110] sm:$0xff]  ;;  %v1617_v52 = vld [vmem:[#allocation2 + $0x118] sm:$0xff] }
  0x3e   :  { %v1619_v51 = vld [vmem:[#allocation2 + $0x120] sm:$0xff]  ;;  %v1623_v17 = vld [vmem:[#allocation5 + $0xe8] sm:$0xff]  ;;  %v1625_v0 = vld [vmem:[#allocation5 + $0xf0] sm:$0xff]  ;;  %4694 = vst [vmem:[#allocation43_spill] sm:$0xff] %v1653_v13  ;;  %v1676_v13 = vand.u32 2147483647, %v4699_v34  ;;  %v4705_v34 = vsub.f32 %v1469_v9, %v1495_v24 }
  0x3f   :  { %4685 = vst [vmem:[#allocation34_spill] sm:$0xff] %v1619_v51  ;;  %v1621_v44 = vld [vmem:[#allocation5 + $0xe0] sm:$0xff]  ;;  %4687 = vst [vmem:[#allocation36_spill] sm:$0xff] %v1623_v17  ;;  %v1635_v8 = vld [vmem:[#allocation2 + $0x128] sm:$0xff] }
  0x40   :  { %4686 = vst [vmem:[#allocation35_spill] sm:$0xff] %v1621_v44  ;;  %4688 = vst [vmem:[#allocation37_spill] sm:$0xff] %v1625_v0  ;;  %v1637_v54 = vld [vmem:[#allocation2 + $0x130] sm:$0xff]  ;;  %v1639_v50 = vld [vmem:[#allocation2 + $0x138] sm:$0xff]  ;;  %v1699_v42 = vand.u32 2147483647, %v4705_v34  ;;  %v4711_v34 = vsub.f32 %v1471_v10, %v1497_v25 }
  0x41   :  { %4690 = vst [vmem:[#allocation39_spill] sm:$0xff] %v1639_v50  ;;  %v1641_v30 = vld [vmem:[#allocation5 + $0xf8] sm:$0xff]  ;;  %v1643_v49 = vld [vmem:[#allocation5 + $0x100] sm:$0xff]  ;;  %v1645_v29 = vld [vmem:[#allocation5 + $0x108] sm:$0xff] }
  0x42   :  { %4691 = vst [vmem:[#allocation40_spill] sm:$0xff] %v1641_v30  ;;  %4692 = vst [vmem:[#allocation41_spill] sm:$0xff] %v1643_v49  ;;  %v1655_v12 = vld [vmem:[#allocation2 + $0x140] sm:$0xff]  ;;  %v1657_v60 = vld [vmem:[#allocation2 + $0x148] sm:$0xff]  ;;  %v1722_v7 = vand.u32 2147483647, %v4711_v34  ;;  %v4717_v34 = vsub.f32 %v1473_v11, %v1499_v26 }
  0x43   :  { %4693 = vst [vmem:[#allocation42_spill] sm:$0xff] %v1645_v29  ;;  %v1659_v37 = vld [vmem:[#allocation2 + $0x150] sm:$0xff]  ;;  %v1663_v36 = vld [vmem:[#allocation5 + $0x118] sm:$0xff]  ;;  %v1665_v58 = vld [vmem:[#allocation5 + $0x120] sm:$0xff] }
  0x44   :  { %4695 = vst [vmem:[#allocation44_spill] sm:$0xff] %v1659_v37  ;;  %v1661_v59 = vld [vmem:[#allocation5 + $0x110] sm:$0xff]  ;;  %4697 = vst [vmem:[#allocation46_spill] sm:$0xff] %v1663_v36  ;;  %v1678_v6 = vld [vmem:[#allocation2 + $0x158] sm:$0xff]  ;;  %v1745_v9 = vand.u32 2147483647, %v4717_v34  ;;  %v4723_v34 = vsub.f32 %v1477_v14, %v1508_v31 }
  0x45   :  { %4696 = vst [vmem:[#allocation45_spill] sm:$0xff] %v1661_v59  ;;  %4698 = vst [vmem:[#allocation47_spill] sm:$0xff] %v1665_v58  ;;  %v1680_v47 = vld [vmem:[#allocation2 + $0x160] sm:$0xff]  ;;  %v1682_v5 = vld [vmem:[#allocation2 + $0x168] sm:$0xff] }
  0x46   :  { %4700 = vst [vmem:[#allocation48_spill] sm:$0xff] %v1676_v13  ;;  %4701 = vst [vmem:[#allocation49_spill] sm:$0xff] %v1682_v5  ;;  %v1684_v46 = vld [vmem:[#allocation5 + $0x128] sm:$0xff]  ;;  %v1686_v41 = vld [vmem:[#allocation5 + $0x130] sm:$0xff]  ;;  %v1768_v10 = vand.u32 2147483647, %v4723_v34  ;;  %v4731_v34 = vsub.f32 %v1479_v15, %v1510_v32 }
  0x47   :  { %4702 = vst [vmem:[#allocation50_spill] sm:$0xff] %v1684_v46  ;;  %4703 = vst [vmem:[#allocation51_spill] sm:$0xff] %v1686_v41  ;;  %v1688_v63 = vld [vmem:[#allocation5 + $0x138] sm:$0xff]  ;;  %v1701_v13 = vld [vmem:[#allocation2 + $0x170] sm:$0xff] }
  0x48   :  { %4704 = vst [vmem:[#allocation52_spill] sm:$0xff] %v1688_v63  ;;  %4706 = vst [vmem:[#allocation53_spill] sm:$0xff] %v1699_v42  ;;  %v1703_v61 = vld [vmem:[#allocation2 + $0x178] sm:$0xff]  ;;  %v1705_v57 = vld [vmem:[#allocation2 + $0x180] sm:$0xff]  ;;  %v1791_v11 = vand.u32 2147483647, %v4731_v34  ;;  %v4739_v34 = vsub.f32 %v1481_v16, %v1512_v33 }
  0x49   :  { %4707 = vst [vmem:[#allocation54_spill] sm:$0xff] %v1705_v57  ;;  %v1707_v62 = vld [vmem:[#allocation5 + $0x140] sm:$0xff]  ;;  %v1709_v43 = vld [vmem:[#allocation5 + $0x148] sm:$0xff]  ;;  %v1711_v44 = vld [vmem:[#allocation5 + $0x150] sm:$0xff] }
  0x4a   :  { %4708 = vst [vmem:[#allocation55_spill] sm:$0xff] %v1707_v62  ;;  %4709 = vst [vmem:[#allocation56_spill] sm:$0xff] %v1709_v43  ;;  %v1724_v42 = vld [vmem:[#allocation2 + $0x188] sm:$0xff]  ;;  %v1726_v0 = vld [vmem:[#allocation2 + $0x190] sm:$0xff]  ;;  %v1814_v14 = vand.u32 2147483647, %v4739_v34  ;;  %v4746_v34 = vsub.f32 %v1489_v21, %v1521_v38 }
  0x4b   :  { %4710 = vst [vmem:[#allocation57_spill] sm:$0xff] %v1711_v44  ;;  %4712 = vst [vmem:[#allocation58_spill] sm:$0xff] %v1722_v7  ;;  %v1728_v3 = vld [vmem:[#allocation2 + $0x198] sm:$0xff]  ;;  %v1732_v19 = vld [vmem:[#allocation5 + $0x160] sm:$0xff] }
  0x4c   :  { %4713 = vst [vmem:[#allocation59_spill] sm:$0xff] %v1728_v3  ;;  %v1730_v17 = vld [vmem:[#allocation5 + $0x158] sm:$0xff]  ;;  %4715 = vst [vmem:[#allocation61_spill] sm:$0xff] %v1732_v19  ;;  %v1734_v30 = vld [vmem:[#allocation5 + $0x168] sm:$0xff]  ;;  %v1837_v15 = vand.u32 2147483647, %v4746_v34  ;;  %v4754_v34 = vsub.f32 %v1491_v22, %v1523_v39 }
  0x4d   :  { %4714 = vst [vmem:[#allocation60_spill] sm:$0xff] %v1730_v17  ;;  %4716 = vst [vmem:[#allocation62_spill] sm:$0xff] %v1734_v30  ;;  %v1747_v7 = vld [vmem:[#allocation2 + $0x1a0] sm:$0xff]  ;;  %v1749_v29 = vld [vmem:[#allocation2 + $0x1a8] sm:$0xff] }
  0x4e   :  { %4718 = vst [vmem:[#allocation63_spill] sm:$0xff] %v1745_v9  ;;  %v1751_v27 = vld [vmem:[#allocation2 + $0x1b0] sm:$0xff]  ;;  %v1755_v24 = vld [vmem:[#allocation5 + $0x178] sm:$0xff]  ;;  %v1757_v59 = vld [vmem:[#allocation5 + $0x180] sm:$0xff]  ;;  %v1860_v16 = vand.u32 2147483647, %v4754_v34  ;;  %v4762_v34 = vsub.f32 %v1493_v23, %v1525_v40 }
  0x4f   :  { %4719 = vst [vmem:[#allocation64_spill] sm:$0xff] %v1751_v27  ;;  %v1753_v49 = vld [vmem:[#allocation5 + $0x170] sm:$0xff]  ;;  %4721 = vst [vmem:[#allocation66_spill] sm:$0xff] %v1755_v24  ;;  %v1770_v9 = vld [vmem:[#allocation2 + $0x1b8] sm:$0xff] }
  0x50   :  { %4720 = vst [vmem:[#allocation65_spill] sm:$0xff] %v1753_v49  ;;  %4722 = vst [vmem:[#allocation67_spill] sm:$0xff] %v1757_v59  ;;  %v1772_v58 = vld [vmem:[#allocation2 + $0x1c0] sm:$0xff]  ;;  %v1774_v51 = vld [vmem:[#allocation2 + $0x1c8] sm:$0xff]  ;;  %v1883_v21 = vand.u32 2147483647, %v4762_v34  ;;  %v4768_v34 = vsub.f32 %v1502_v28, %v1541_v48 }
  0x51   :  { %4724 = vst [vmem:[#allocation68_spill] sm:$0xff] %v1768_v10  ;;  %4725 = vst [vmem:[#allocation69_spill] sm:$0xff] %v1770_v9  ;;  %v1776_v36 = vld [vmem:[#allocation5 + $0x188] sm:$0xff]  ;;  %v1778_v25 = vld [vmem:[#allocation5 + $0x190] sm:$0xff] }
  0x52   :  { %4726 = vst [vmem:[#allocation70_spill] sm:$0xff] %v1772_v58  ;;  %4727 = vst [vmem:[#allocation71_spill] sm:$0xff] %v1774_v51  ;;  %v1780_v46 = vld [vmem:[#allocation5 + $0x198] sm:$0xff]  ;;  %v1793_v10 = vld [vmem:[#allocation2 + $0x1d0] sm:$0xff]  ;;  %v1906_v22 = vand.u32 2147483647, %v4768_v34 }
  0x53   :  { %4728 = vst [vmem:[#allocation72_spill] sm:$0xff] %v1776_v36  ;;  %4729 = vst [vmem:[#allocation73_spill] sm:$0xff] %v1778_v25  ;;  %v1795_v63 = vld [vmem:[#allocation2 + $0x1d8] sm:$0xff]  ;;  %v1797_v50 = vld [vmem:[#allocation2 + $0x1e0] sm:$0xff] }
  0x54   :  { %4730 = vst [vmem:[#allocation74_spill] sm:$0xff] %v1780_v46  ;;  %4732 = vst [vmem:[#allocation75_spill] sm:$0xff] %v1791_v11  ;;  %v1799_v41 = vld [vmem:[#allocation5 + $0x1a0] sm:$0xff]  ;;  %v1801_v26 = vld [vmem:[#allocation5 + $0x1a8] sm:$0xff] }
  0x55   :  { %4733 = vst [vmem:[#allocation76_spill] sm:$0xff] %v1793_v10  ;;  %4734 = vst [vmem:[#allocation77_spill] sm:$0xff] %v1795_v63  ;;  %v1803_v62 = vld [vmem:[#allocation5 + $0x1b0] sm:$0xff]  ;;  %v1816_v11 = vld [vmem:[#allocation2 + $0x1e8] sm:$0xff] }
  0x56   :  { %4735 = vst [vmem:[#allocation78_spill] sm:$0xff] %v1797_v50  ;;  %4736 = vst [vmem:[#allocation79_spill] sm:$0xff] %v1799_v41  ;;  %v1818_v44 = vld [vmem:[#allocation2 + $0x1f0] sm:$0xff]  ;;  %v1820_v37 = vld [vmem:[#allocation2 + $0x1f8] sm:$0xff] }
  0x57   :  { %4737 = vst [vmem:[#allocation80_spill] sm:$0xff] %v1801_v26  ;;  %4738 = vst [vmem:[#allocation81_spill] sm:$0xff] %v1803_v62  ;;  %v1822_v43 = vld [vmem:[#allocation5 + $0x1b8] sm:$0xff]  ;;  %v1824_v31 = vld [vmem:[#allocation5 + $0x1c0] sm:$0xff] }
  0x58   :  { %4740 = vst [vmem:[#allocation82_spill] sm:$0xff] %v1814_v14  ;;  %4741 = vst [vmem:[#allocation83_spill] sm:$0xff] %v1818_v44  ;;  %v1826_v17 = vld [vmem:[#allocation5 + $0x1c8] sm:$0xff]  ;;  %v1839_v14 = vld [vmem:[#allocation2 + $0x200] sm:$0xff] }
  0x59   :  { %4742 = vst [vmem:[#allocation84_spill] sm:$0xff] %v1820_v37  ;;  %4743 = vst [vmem:[#allocation85_spill] sm:$0xff] %v1822_v43  ;;  %v1841_v30 = vld [vmem:[#allocation2 + $0x208] sm:$0xff]  ;;  %v1843_v5 = vld [vmem:[#allocation2 + $0x210] sm:$0xff] }
  0x5a   :  { %4744 = vst [vmem:[#allocation86_spill] sm:$0xff] %v1824_v31  ;;  %4745 = vst [vmem:[#allocation87_spill] sm:$0xff] %v1826_v17  ;;  %v1845_v19 = vld [vmem:[#allocation5 + $0x1d0] sm:$0xff]  ;;  %v1847_v32 = vld [vmem:[#allocation5 + $0x1d8] sm:$0xff] }
  0x5b   :  { %4747 = vst [vmem:[#allocation88_spill] sm:$0xff] %v1837_v15  ;;  %4748 = vst [vmem:[#allocation89_spill] sm:$0xff] %v1839_v14  ;;  %v1849_v49 = vld [vmem:[#allocation5 + $0x1e0] sm:$0xff]  ;;  %v1862_v15 = vld [vmem:[#allocation2 + $0x218] sm:$0xff] }
  0x5c   :  { %4749 = vst [vmem:[#allocation90_spill] sm:$0xff] %v1841_v30  ;;  %4750 = vst [vmem:[#allocation91_spill] sm:$0xff] %v1843_v5  ;;  %v1864_v59 = vld [vmem:[#allocation2 + $0x220] sm:$0xff]  ;;  %v1866_v57 = vld [vmem:[#allocation2 + $0x228] sm:$0xff] }
  0x5d   :  { %4751 = vst [vmem:[#allocation92_spill] sm:$0xff] %v1845_v19  ;;  %4752 = vst [vmem:[#allocation93_spill] sm:$0xff] %v1847_v32  ;;  %v1868_v24 = vld [vmem:[#allocation5 + $0x1e8] sm:$0xff]  ;;  %v1870_v33 = vld [vmem:[#allocation5 + $0x1f0] sm:$0xff] }
  0x5e   :  { %4753 = vst [vmem:[#allocation94_spill] sm:$0xff] %v1849_v49  ;;  %4755 = vst [vmem:[#allocation95_spill] sm:$0xff] %v1860_v16  ;;  %v1872_v36 = vld [vmem:[#allocation5 + $0x1f8] sm:$0xff]  ;;  %v1885_v16 = vld [vmem:[#allocation2 + $0x230] sm:$0xff] }
  0x5f   :  { %4756 = vst [vmem:[#allocation96_spill] sm:$0xff] %v1862_v15  ;;  %4757 = vst [vmem:[#allocation97_spill] sm:$0xff] %v1864_v59  ;;  %v1887_v46 = vld [vmem:[#allocation2 + $0x238] sm:$0xff]  ;;  %v1889_v3 = vld [vmem:[#allocation2 + $0x240] sm:$0xff] }
  0x60   :  { %4758 = vst [vmem:[#allocation98_spill] sm:$0xff] %v1866_v57  ;;  %4759 = vst [vmem:[#allocation99_spill] sm:$0xff] %v1868_v24  ;;  %v1891_v25 = vld [vmem:[#allocation5 + $0x200] sm:$0xff]  ;;  %v1893_v38 = vld [vmem:[#allocation5 + $0x208] sm:$0xff] }
  0x61   :  { %4760 = vst [vmem:[#allocation100_spill] sm:$0xff] %v1870_v33  ;;  %4761 = vst [vmem:[#allocation101_spill] sm:$0xff] %v1872_v36  ;;  %v1895_v41 = vld [vmem:[#allocation5 + $0x210] sm:$0xff]  ;;  %v1912_v27 = vld [vmem:[#allocation2 + $0x258] sm:$0xff] }
  0x62   :  { %4763 = vst [vmem:[#allocation102_spill] sm:$0xff] %v1883_v21  ;;  %4764 = vst [vmem:[#allocation103_spill] sm:$0xff] %v1889_v3  ;;  %v1908_v21 = vld [vmem:[#allocation2 + $0x248] sm:$0xff]  ;;  %v1910_v62 = vld [vmem:[#allocation2 + $0x250] sm:$0xff] }
  0x63   :  { %4765 = vst [vmem:[#allocation104_spill] sm:$0xff] %v1891_v25  ;;  %4766 = vst [vmem:[#allocation105_spill] sm:$0xff] %v1893_v38  ;;  %v1914_v26 = vld [vmem:[#allocation5 + $0x218] sm:$0xff]  ;;  %v1916_v39 = vld [vmem:[#allocation5 + $0x220] sm:$0xff] }
  0x64   :  { %4767 = vst [vmem:[#allocation106_spill] sm:$0xff] %v1895_v41  ;;  %4769 = vst [vmem:[#allocation107_spill] sm:$0xff] %v1906_v22  ;;  %v1918_v43 = vld [vmem:[#allocation5 + $0x228] sm:$0xff]  ;;  %v4776_v34 = vld [vmem:[#allocation11_spill] sm:$0xff] }
  0x65   :  { %4770 = vst [vmem:[#allocation108_spill] sm:$0xff] %v1908_v21  ;;  %4771 = vst [vmem:[#allocation109_spill] sm:$0xff] %v1910_v62  ;;  %v4777_v23 = vld [vmem:[#allocation17_spill] sm:$0xff]  ;;  %v1931_v51 = vld [vmem:[#allocation2 + $0x260] sm:$0xff] }
  0x66   :  { %4772 = vst [vmem:[#allocation110_spill] sm:$0xff] %v1912_v27  ;;  %4773 = vst [vmem:[#allocation111_spill] sm:$0xff] %v1914_v26  ;;  %v4778_v22 = vsub.f32 %v4776_v34, %v4777_v23  ;;  %v1933_v31 = vld [vmem:[#allocation2 + $0x268] sm:$0xff]  ;;  %v1935_v58 = vld [vmem:[#allocation2 + $0x270] sm:$0xff] }
  0x67   :  { %4774 = vst [vmem:[#allocation112_spill] sm:$0xff] %v1916_v39  ;;  %4775 = vst [vmem:[#allocation113_spill] sm:$0xff] %v1918_v43  ;;  %v1937_v9 = vld [vmem:[#allocation5 + $0x230] sm:$0xff]  ;;  %v1939_v40 = vld [vmem:[#allocation5 + $0x238] sm:$0xff] }
  0x68   :  { %v1929_v17 = vand.u32 2147483647, %v4778_v22  ;;  %4780 = vst [vmem:[#allocation17_spill] sm:$0xff] %v1931_v51  ;;  %4781 = vst [vmem:[#allocation114_spill] sm:$0xff] %v1933_v31  ;;  %v1941_v19 = vld [vmem:[#allocation5 + $0x240] sm:$0xff]  ;;  %v4786_v34 = vld [vmem:[#allocation12_spill] sm:$0xff] }
  0x69   :  { %4782 = vst [vmem:[#allocation115_spill] sm:$0xff] %v1935_v58  ;;  %4783 = vst [vmem:[#allocation116_spill] sm:$0xff] %v1937_v9  ;;  %v4787_v28 = vld [vmem:[#allocation18_spill] sm:$0xff]  ;;  %v1956_v32 = vld [vmem:[#allocation2 + $0x280] sm:$0xff] }
  0x6a   :  { %4779 = vst [vmem:[#allocation11_spill] sm:$0xff] %v1929_v17  ;;  %4784 = vst [vmem:[#allocation117_spill] sm:$0xff] %v1939_v40  ;;  %v4788_v17 = vsub.f32 %v4786_v34, %v4787_v28  ;;  %v1954_v50 = vld [vmem:[#allocation2 + $0x278] sm:$0xff]  ;;  %v1958_v63 = vld [vmem:[#allocation2 + $0x288] sm:$0xff] }
  0x6b   :  { %4785 = vst [vmem:[#allocation118_spill] sm:$0xff] %v1941_v19  ;;  %4790 = vst [vmem:[#allocation18_spill] sm:$0xff] %v1956_v32  ;;  %v1960_v10 = vld [vmem:[#allocation5 + $0x248] sm:$0xff]  ;;  %v1962_v48 = vld [vmem:[#allocation5 + $0x250] sm:$0xff] }
  0x6c   :  { %v1952_v49 = vand.u32 2147483647, %v4788_v17  ;;  %4791 = vst [vmem:[#allocation119_spill] sm:$0xff] %v1958_v63  ;;  %4792 = vst [vmem:[#allocation120_spill] sm:$0xff] %v1960_v10  ;;  %v1964_v24 = vld [vmem:[#allocation5 + $0x258] sm:$0xff]  ;;  %v4795_v34 = vld [vmem:[#allocation21_spill] sm:$0xff] }
  0x6d   :  { %4793 = vst [vmem:[#allocation121_spill] sm:$0xff] %v1962_v48  ;;  %4794 = vst [vmem:[#allocation122_spill] sm:$0xff] %v1964_v24  ;;  %v4796_v23 = vsub.f32 %v1515_v35, %v4795_v34  ;;  %v1977_v36 = vld [vmem:[#allocation2 + $0x290] sm:$0xff]  ;;  %v1979_v37 = vld [vmem:[#allocation2 + $0x298] sm:$0xff] }
  0x6e   :  { %4789 = vst [vmem:[#allocation12_spill] sm:$0xff] %v1952_v49  ;;  %4798 = vst [vmem:[#allocation123_spill] sm:$0xff] %v1979_v37  ;;  %v1981_v33 = vld [vmem:[#allocation2 + $0x2a0] sm:$0xff]  ;;  %v1985_v22 = vld [vmem:[#allocation5 + $0x268] sm:$0xff] }
  0x6f   :  { %v1975_v49 = vand.u32 2147483647, %v4796_v23  ;;  %4799 = vst [vmem:[#allocation124_spill] sm:$0xff] %v1981_v33  ;;  %v1983_v44 = vld [vmem:[#allocation5 + $0x260] sm:$0xff]  ;;  %4801 = vst [vmem:[#allocation126_spill] sm:$0xff] %v1985_v22  ;;  %v1987_v25 = vld [vmem:[#allocation5 + $0x270] sm:$0xff] }
  0x70   :  { %4800 = vst [vmem:[#allocation125_spill] sm:$0xff] %v1983_v44  ;;  %4802 = vst [vmem:[#allocation127_spill] sm:$0xff] %v1987_v25  ;;  %v4803_v34 = vld [vmem:[#allocation13_spill] sm:$0xff]  ;;  %v4804_v28 = vld [vmem:[#allocation22_spill] sm:$0xff] }
  0x71   :  { %4797 = vst [vmem:[#allocation21_spill] sm:$0xff] %v1975_v49  ;;  %v4805_v49 = vsub.f32 %v4803_v34, %v4804_v28  ;;  %v2000_v5 = vld [vmem:[#allocation2 + $0x2a8] sm:$0xff]  ;;  %v2002_v38 = vld [vmem:[#allocation2 + $0x2b0] sm:$0xff]  ;;  %v2004_v30 = vld [vmem:[#allocation2 + $0x2b8] sm:$0xff] }
  0x72   :  { %4807 = vst [vmem:[#allocation22_spill] sm:$0xff] %v2000_v5  ;;  %4808 = vst [vmem:[#allocation128_spill] sm:$0xff] %v2002_v38  ;;  %v2006_v14 = vld [vmem:[#allocation5 + $0x278] sm:$0xff]  ;;  %v2008_v17 = vld [vmem:[#allocation5 + $0x280] sm:$0xff] }
  0x73   :  { %v1998_v41 = vand.u32 2147483647, %v4805_v49  ;;  %4809 = vst [vmem:[#allocation129_spill] sm:$0xff] %v2004_v30  ;;  %4810 = vst [vmem:[#allocation130_spill] sm:$0xff] %v2006_v14  ;;  %v2010_v26 = vld [vmem:[#allocation5 + $0x288] sm:$0xff]  ;;  %v4813_v34 = vld [vmem:[#allocation14_spill] sm:$0xff] }
  0x74   :  { %4811 = vst [vmem:[#allocation131_spill] sm:$0xff] %v2008_v17  ;;  %4812 = vst [vmem:[#allocation132_spill] sm:$0xff] %v2010_v26  ;;  %v4814_v35 = vld [vmem:[#allocation23_spill] sm:$0xff]  ;;  %v2025_v39 = vld [vmem:[#allocation2 + $0x2c8] sm:$0xff] }
  0x75   :  { %4806 = vst [vmem:[#allocation13_spill] sm:$0xff] %v1998_v41  ;;  %v4815_v41 = vsub.f32 %v4813_v34, %v4814_v35  ;;  %v2023_v57 = vld [vmem:[#allocation2 + $0x2c0] sm:$0xff]  ;;  %4817 = vst [vmem:[#allocation23_spill] sm:$0xff] %v2025_v39  ;;  %v2027_v59 = vld [vmem:[#allocation2 + $0x2d0] sm:$0xff]  ;;  %v4822_v34 = vsub.f32 %v1535_v45, %v1581_v4 }
  0x76   :  { %4818 = vst [vmem:[#allocation133_spill] sm:$0xff] %v2027_v59  ;;  %v2029_v15 = vld [vmem:[#allocation5 + $0x290] sm:$0xff]  ;;  %v2031_v23 = vld [vmem:[#allocation5 + $0x298] sm:$0xff]  ;;  %v2033_v9 = vld [vmem:[#allocation5 + $0x2a0] sm:$0xff] }
  0x77   :  { %v2021_v43 = vand.u32 2147483647, %v4815_v41  ;;  %4819 = vst [vmem:[#allocation134_spill] sm:$0xff] %v2029_v15  ;;  %4820 = vst [vmem:[#allocation135_spill] sm:$0xff] %v2031_v23  ;;  %v2044_v28 = vand.u32 2147483647, %v4822_v34 }
  0x78   :  { %4821 = vst [vmem:[#allocation136_spill] sm:$0xff] %v2033_v9  ;;  %v2048_v19 = vld [vmem:[#allocation2 + $0x2e0] sm:$0xff]  ;;  %v2050_v3 = vld [vmem:[#allocation2 + $0x2e8] sm:$0xff]  ;;  %v2054_v49 = vld [vmem:[#allocation5 + $0x2b0] sm:$0xff] }
  0x79   :  { %4816 = vst [vmem:[#allocation14_spill] sm:$0xff] %v2021_v43  ;;  %4823 = vst [vmem:[#allocation137_spill] sm:$0xff] %v2044_v28  ;;  %v2046_v43 = vld [vmem:[#allocation2 + $0x2d8] sm:$0xff]  ;;  %v2052_v40 = vld [vmem:[#allocation5 + $0x2a8] sm:$0xff] }
  0x7a   :  { %4824 = vst [vmem:[#allocation138_spill] sm:$0xff] %v2048_v19  ;;  %4825 = vst [vmem:[#allocation139_spill] sm:$0xff] %v2050_v3  ;;  %v2056_v10 = vld [vmem:[#allocation5 + $0x2b8] sm:$0xff]  ;;  %v4829_v34 = vld [vmem:[#allocation15_spill] sm:$0xff] }
  0x7b   :  { %4826 = vst [vmem:[#allocation140_spill] sm:$0xff] %v2052_v40  ;;  %4827 = vst [vmem:[#allocation141_spill] sm:$0xff] %v2054_v49  ;;  %v4830_v35 = vld [vmem:[#allocation26_spill] sm:$0xff]  ;;  %v2069_v27 = vld [vmem:[#allocation2 + $0x2f0] sm:$0xff] }
  0x7c   :  { %4828 = vst [vmem:[#allocation142_spill] sm:$0xff] %v2056_v10  ;;  %v4831_v28 = vsub.f32 %v4829_v34, %v4830_v35  ;;  %4833 = vst [vmem:[#allocation26_spill] sm:$0xff] %v2069_v27  ;;  %v2071_v48 = vld [vmem:[#allocation2 + $0x2f8] sm:$0xff]  ;;  %v2073_v62 = vld [vmem:[#allocation2 + $0x300] sm:$0xff] }
  0x7d   :  { %4834 = vst [vmem:[#allocation143_spill] sm:$0xff] %v2071_v48  ;;  %4835 = vst [vmem:[#allocation144_spill] sm:$0xff] %v2073_v62  ;;  %v2075_v21 = vld [vmem:[#allocation5 + $0x2c0] sm:$0xff]  ;;  %v2077_v41 = vld [vmem:[#allocation5 + $0x2c8] sm:$0xff] }
  0x7e   :  { %v2067_v24 = vand.u32 2147483647, %v4831_v28  ;;  %4836 = vst [vmem:[#allocation145_spill] sm:$0xff] %v2075_v21  ;;  %4837 = vst [vmem:[#allocation146_spill] sm:$0xff] %v2077_v41  ;;  %v2079_v44 = vld [vmem:[#allocation5 + $0x2d0] sm:$0xff]  ;;  %v4839_v34 = vld [vmem:[#allocation16_spill] sm:$0xff] }
  0x7f   :  { %4838 = vst [vmem:[#allocation147_spill] sm:$0xff] %v2079_v44  ;;  %v4840_v45 = vld [vmem:[#allocation27_spill] sm:$0xff]  ;;  %v2092_v58 = vld [vmem:[#allocation2 + $0x308] sm:$0xff]  ;;  %v2094_v22 = vld [vmem:[#allocation2 + $0x310] sm:$0xff] }
  0x80   :  { %4832 = vst [vmem:[#allocation15_spill] sm:$0xff] %v2067_v24  ;;  %v4841_v24 = vsub.f32 %v4839_v34, %v4840_v45  ;;  %4843 = vst [vmem:[#allocation27_spill] sm:$0xff] %v2094_v22  ;;  %v2096_v31 = vld [vmem:[#allocation2 + $0x318] sm:$0xff]  ;;  %v2100_v4 = vld [vmem:[#allocation5 + $0x2e0] sm:$0xff] }
  0x81   :  { %4844 = vst [vmem:[#allocation148_spill] sm:$0xff] %v2096_v31  ;;  %v2098_v51 = vld [vmem:[#allocation5 + $0x2d8] sm:$0xff]  ;;  %4846 = vst [vmem:[#allocation150_spill] sm:$0xff] %v2100_v4  ;;  %v2102_v14 = vld [vmem:[#allocation5 + $0x2e8] sm:$0xff] }
  0x82   :  { %v2090_v25 = vand.u32 2147483647, %v4841_v24  ;;  %4845 = vst [vmem:[#allocation149_spill] sm:$0xff] %v2098_v51  ;;  %4847 = vst [vmem:[#allocation151_spill] sm:$0xff] %v2102_v14  ;;  %v4848_v34 = vld [vmem:[#allocation30_spill] sm:$0xff]  ;;  %v2115_v26 = vld [vmem:[#allocation2 + $0x320] sm:$0xff] }
  0x83   :  { %v4849_v35 = vsub.f32 %v1555_v55, %v4848_v34  ;;  %4851 = vst [vmem:[#allocation152_spill] sm:$0xff] %v2115_v26  ;;  %v2117_v63 = vld [vmem:[#allocation2 + $0x328] sm:$0xff]  ;;  %v2119_v17 = vld [vmem:[#allocation2 + $0x330] sm:$0xff]  ;;  %v2123_v28 = vld [vmem:[#allocation5 + $0x2f8] sm:$0xff] }
  0x84   :  { %4842 = vst [vmem:[#allocation16_spill] sm:$0xff] %v2090_v25  ;;  %4852 = vst [vmem:[#allocation153_spill] sm:$0xff] %v2117_v63  ;;  %v2121_v32 = vld [vmem:[#allocation5 + $0x2f0] sm:$0xff]  ;;  %v2125_v15 = vld [vmem:[#allocation5 + $0x300] sm:$0xff] }
  0x85   :  { %v2113_v25 = vand.u32 2147483647, %v4849_v35  ;;  %4853 = vst [vmem:[#allocation154_spill] sm:$0xff] %v2119_v17  ;;  %4854 = vst [vmem:[#allocation155_spill] sm:$0xff] %v2121_v32  ;;  %v4857_v34 = vld [vmem:[#allocation31_spill] sm:$0xff]  ;;  %v2138_v9 = vld [vmem:[#allocation2 + $0x338] sm:$0xff] }
  0x86   :  { %4855 = vst [vmem:[#allocation156_spill] sm:$0xff] %v2123_v28  ;;  %4856 = vst [vmem:[#allocation157_spill] sm:$0xff] %v2125_v15  ;;  %v4858_v45 = vsub.f32 %v1557_v56, %v4857_v34  ;;  %v2140_v33 = vld [vmem:[#allocation2 + $0x340] sm:$0xff]  ;;  %v2142_v23 = vld [vmem:[#allocation2 + $0x348] sm:$0xff] }
  0x87   :  { %4850 = vst [vmem:[#allocation30_spill] sm:$0xff] %v2113_v25  ;;  %4860 = vst [vmem:[#allocation158_spill] sm:$0xff] %v2138_v9  ;;  %v2144_v37 = vld [vmem:[#allocation5 + $0x308] sm:$0xff]  ;;  %v2146_v24 = vld [vmem:[#allocation5 + $0x310] sm:$0xff] }
  0x88   :  { %v2136_v25 = vand.u32 2147483647, %v4858_v45  ;;  %4861 = vst [vmem:[#allocation159_spill] sm:$0xff] %v2140_v33  ;;  %4862 = vst [vmem:[#allocation160_spill] sm:$0xff] %v2142_v23  ;;  %v2148_v40 = vld [vmem:[#allocation5 + $0x318] sm:$0xff]  ;;  %v4866_v34 = vld [vmem:[#allocation20_spill] sm:$0xff] }
  0x89   :  { %4863 = vst [vmem:[#allocation161_spill] sm:$0xff] %v2144_v37  ;;  %4864 = vst [vmem:[#allocation162_spill] sm:$0xff] %v2146_v24  ;;  %v4867_v55 = vld [vmem:[#allocation32_spill] sm:$0xff]  ;;  %v2161_v30 = vld [vmem:[#allocation2 + $0x350] sm:$0xff] }
  0x8a   :  { %4859 = vst [vmem:[#allocation31_spill] sm:$0xff] %v2136_v25  ;;  %4865 = vst [vmem:[#allocation163_spill] sm:$0xff] %v2148_v40  ;;  %v4868_v25 = vsub.f32 %v4866_v34, %v4867_v55  ;;  %v2163_v49 = vld [vmem:[#allocation2 + $0x358] sm:$0xff]  ;;  %v2165_v38 = vld [vmem:[#allocation2 + $0x360] sm:$0xff] }
  0x8b   :  { %4870 = vst [vmem:[#allocation32_spill] sm:$0xff] %v2161_v30  ;;  %4871 = vst [vmem:[#allocation164_spill] sm:$0xff] %v2163_v49  ;;  %v2167_v5 = vld [vmem:[#allocation5 + $0x320] sm:$0xff]  ;;  %v2169_v35 = vld [vmem:[#allocation5 + $0x328] sm:$0xff] }
  0x8c   :  { %v2159_v10 = vand.u32 2147483647, %v4868_v25  ;;  %4872 = vst [vmem:[#allocation165_spill] sm:$0xff] %v2165_v38  ;;  %4873 = vst [vmem:[#allocation166_spill] sm:$0xff] %v2167_v5  ;;  %v2171_v21 = vld [vmem:[#allocation5 + $0x330] sm:$0xff]  ;;  %v4876_v34 = vld [vmem:[#allocation35_spill] sm:$0xff] }
  0x8d   :  { %4874 = vst [vmem:[#allocation167_spill] sm:$0xff] %v2169_v35  ;;  %4875 = vst [vmem:[#allocation168_spill] sm:$0xff] %v2171_v21  ;;  %v4877_v56 = vsub.f32 %v1575_v1, %v4876_v34  ;;  %v2184_v44 = vld [vmem:[#allocation2 + $0x368] sm:$0xff]  ;;  %v2186_v59 = vld [vmem:[#allocation2 + $0x370] sm:$0xff] }
  0x8e   :  { %4869 = vst [vmem:[#allocation20_spill] sm:$0xff] %v2159_v10  ;;  %4879 = vst [vmem:[#allocation169_spill] sm:$0xff] %v2186_v59  ;;  %v2188_v41 = vld [vmem:[#allocation2 + $0x378] sm:$0xff]  ;;  %v2192_v45 = vld [vmem:[#allocation5 + $0x340] sm:$0xff] }
  0x8f   :  { %v2182_v10 = vand.u32 2147483647, %v4877_v56  ;;  %4880 = vst [vmem:[#allocation170_spill] sm:$0xff] %v2188_v41  ;;  %v2190_v39 = vld [vmem:[#allocation5 + $0x338] sm:$0xff]  ;;  %4882 = vst [vmem:[#allocation172_spill] sm:$0xff] %v2192_v45  ;;  %v2194_v51 = vld [vmem:[#allocation5 + $0x348] sm:$0xff] }
  0x90   :  { %4881 = vst [vmem:[#allocation171_spill] sm:$0xff] %v2190_v39  ;;  %4883 = vst [vmem:[#allocation173_spill] sm:$0xff] %v2194_v51  ;;  %v4884_v34 = vld [vmem:[#allocation36_spill] sm:$0xff]  ;;  %v2207_v14 = vld [vmem:[#allocation2 + $0x380] sm:$0xff] }
  0x91   :  { %4878 = vst [vmem:[#allocation35_spill] sm:$0xff] %v2182_v10  ;;  %v4885_v55 = vsub.f32 %v1577_v2, %v4884_v34  ;;  %4887 = vst [vmem:[#allocation174_spill] sm:$0xff] %v2207_v14  ;;  %v2209_v3 = vld [vmem:[#allocation2 + $0x388] sm:$0xff]  ;;  %v2211_v4 = vld [vmem:[#allocation2 + $0x390] sm:$0xff] }
  0x92   :  { %4888 = vst [vmem:[#allocation175_spill] sm:$0xff] %v2209_v3  ;;  %4889 = vst [vmem:[#allocation176_spill] sm:$0xff] %v2211_v4  ;;  %v2213_v19 = vld [vmem:[#allocation5 + $0x350] sm:$0xff]  ;;  %v2215_v25 = vld [vmem:[#allocation5 + $0x358] sm:$0xff] }
  0x93   :  { %v2205_v10 = vand.u32 2147483647, %v4885_v55  ;;  %4890 = vst [vmem:[#allocation177_spill] sm:$0xff] %v2213_v19  ;;  %4891 = vst [vmem:[#allocation178_spill] sm:$0xff] %v2215_v25  ;;  %v2217_v32 = vld [vmem:[#allocation5 + $0x360] sm:$0xff]  ;;  %v4893_v34 = vld [vmem:[#allocation25_spill] sm:$0xff] }
  0x94   :  { %4892 = vst [vmem:[#allocation179_spill] sm:$0xff] %v2217_v32  ;;  %v4894_v1 = vld [vmem:[#allocation37_spill] sm:$0xff]  ;;  %v2230_v62 = vld [vmem:[#allocation2 + $0x398] sm:$0xff]  ;;  %v2232_v28 = vld [vmem:[#allocation2 + $0x3a0] sm:$0xff] }
  0x95   :  { %4886 = vst [vmem:[#allocation36_spill] sm:$0xff] %v2205_v10  ;;  %v4895_v10 = vsub.f32 %v4893_v34, %v4894_v1  ;;  %4897 = vst [vmem:[#allocation37_spill] sm:$0xff] %v2232_v28  ;;  %v2234_v48 = vld [vmem:[#allocation2 + $0x3a8] sm:$0xff]  ;;  %v2238_v56 = vld [vmem:[#allocation5 + $0x370] sm:$0xff] }
  0x96   :  { %4898 = vst [vmem:[#allocation180_spill] sm:$0xff] %v2234_v48  ;;  %v2236_v27 = vld [vmem:[#allocation5 + $0x368] sm:$0xff]  ;;  %4900 = vst [vmem:[#allocation182_spill] sm:$0xff] %v2238_v56  ;;  %v2240_v37 = vld [vmem:[#allocation5 + $0x378] sm:$0xff] }
  0x97   :  { %v2228_v15 = vand.u32 2147483647, %v4895_v10  ;;  %4899 = vst [vmem:[#allocation181_spill] sm:$0xff] %v2236_v27  ;;  %4901 = vst [vmem:[#allocation183_spill] sm:$0xff] %v2240_v37  ;;  %v4902_v34 = vld [vmem:[#allocation40_spill] sm:$0xff]  ;;  %v2253_v40 = vld [vmem:[#allocation2 + $0x3b0] sm:$0xff] }
  0x98   :  { %v4903_v2 = vsub.f32 %v1595_v18, %v4902_v34  ;;  %v2255_v31 = vld [vmem:[#allocation2 + $0x3b8] sm:$0xff]  ;;  %v2257_v24 = vld [vmem:[#allocation2 + $0x3c0] sm:$0xff]  ;;  %v2261_v55 = vld [vmem:[#allocation5 + $0x388] sm:$0xff] }
  0x99   :  { %4896 = vst [vmem:[#allocation25_spill] sm:$0xff] %v2228_v15  ;;  %4905 = vst [vmem:[#allocation184_spill] sm:$0xff] %v2255_v31  ;;  %v2259_v22 = vld [vmem:[#allocation5 + $0x380] sm:$0xff]  ;;  %v2263_v5 = vld [vmem:[#allocation5 + $0x390] sm:$0xff] }
  0x9a   :  { %v2251_v15 = vand.u32 2147483647, %v4903_v2  ;;  %4906 = vst [vmem:[#allocation185_spill] sm:$0xff] %v2257_v24  ;;  %4907 = vst [vmem:[#allocation186_spill] sm:$0xff] %v2259_v22  ;;  %v4910_v34 = vld [vmem:[#allocation41_spill] sm:$0xff]  ;;  %v2276_v21 = vld [vmem:[#allocation2 + $0x3c8] sm:$0xff] }
  0x9b   :  { %4908 = vst [vmem:[#allocation187_spill] sm:$0xff] %v2261_v55  ;;  %4909 = vst [vmem:[#allocation188_spill] sm:$0xff] %v2263_v5  ;;  %v4911_v1 = vsub.f32 %v1597_v20, %v4910_v34  ;;  %v2278_v17 = vld [vmem:[#allocation2 + $0x3d0] sm:$0xff]  ;;  %v2280_v35 = vld [vmem:[#allocation2 + $0x3d8] sm:$0xff] }
  0x9c   :  { %4904 = vst [vmem:[#allocation40_spill] sm:$0xff] %v2251_v15  ;;  %4912 = vst [vmem:[#allocation41_spill] sm:$0xff] %v2276_v21  ;;  %v2282_v63 = vld [vmem:[#allocation5 + $0x398] sm:$0xff]  ;;  %v2284_v10 = vld [vmem:[#allocation5 + $0x3a0] sm:$0xff] }
  0x9d   :  { %v2274_v15 = vand.u32 2147483647, %v4911_v1  ;;  %4913 = vst [vmem:[#allocation189_spill] sm:$0xff] %v2278_v17  ;;  %4914 = vst [vmem:[#allocation190_spill] sm:$0xff] %v2280_v35  ;;  %v2286_v39 = vld [vmem:[#allocation5 + $0x3a8] sm:$0xff]  ;;  %v4918_v34 = vld [vmem:[#allocation29_spill] sm:$0xff] }
  0x9e   :  { %4915 = vst [vmem:[#allocation191_spill] sm:$0xff] %v2282_v63  ;;  %4916 = vst [vmem:[#allocation192_spill] sm:$0xff] %v2284_v10  ;;  %v4919_v18 = vld [vmem:[#allocation42_spill] sm:$0xff]  ;;  %v2299_v45 = vld [vmem:[#allocation2 + $0x3e0] sm:$0xff] }
  0x9f   :  { %4917 = vst [vmem:[#allocation193_spill] sm:$0xff] %v2286_v39  ;;  %v4920_v51 = vsub.f32 %v4918_v34, %v4919_v18  ;;  %4921 = vst [vmem:[#allocation29_spill] sm:$0xff] %v2299_v45  ;;  %v2301_v33 = vld [vmem:[#allocation2 + $0x3e8] sm:$0xff]  ;;  %v2303_v9 = vld [vmem:[#allocation2 + $0x3f0] sm:$0xff] }
  0xa0   :  { %4922 = vst [vmem:[#allocation42_spill] sm:$0xff] %v2301_v33  ;;  %4923 = vst [vmem:[#allocation194_spill] sm:$0xff] %v2303_v9  ;;  %v2305_v26 = vld [vmem:[#allocation5 + $0x3b0] sm:$0xff]  ;;  %v2307_v2 = vld [vmem:[#allocation5 + $0x3b8] sm:$0xff] }
  0xa1   :  { %v2297_v23 = vand.u32 2147483647, %v4920_v51  ;;  %4924 = vst [vmem:[#allocation195_spill] sm:$0xff] %v2305_v26  ;;  %4925 = vst [vmem:[#allocation196_spill] sm:$0xff] %v2307_v2  ;;  %v2309_v19 = vld [vmem:[#allocation5 + $0x3c0] sm:$0xff]  ;;  %v4927_v34 = vld [vmem:[#allocation45_spill] sm:$0xff] }
  0xa2   :  { %4926 = vst [vmem:[#allocation197_spill] sm:$0xff] %v2309_v19  ;;  %v4928_v20 = vsub.f32 %v1615_v53, %v4927_v34  ;;  %v2322_v38 = vld [vmem:[#allocation2 + $0x3f8] sm:$0xff]  ;;  %v2324_v25 = vld [vmem:[#allocation2 + $0x400] sm:$0xff]  ;;  %v2326_v49 = vld [vmem:[#allocation2 + $0x408] sm:$0xff] }
  0xa3   :  { %4930 = vst [vmem:[#allocation198_spill] sm:$0xff] %v2322_v38  ;;  %4931 = vst [vmem:[#allocation199_spill] sm:$0xff] %v2326_v49  ;;  %v2328_v30 = vld [vmem:[#allocation5 + $0x3c8] sm:$0xff]  ;;  %v2330_v1 = vld [vmem:[#allocation5 + $0x3d0] sm:$0xff] }
  0xa4   :  { %v2320_v32 = vand.u32 2147483647, %v4928_v20  ;;  %4932 = vst [vmem:[#allocation200_spill] sm:$0xff] %v2328_v30  ;;  %4933 = vst [vmem:[#allocation201_spill] sm:$0xff] %v2330_v1  ;;  %v2332_v27 = vld [vmem:[#allocation5 + $0x3d8] sm:$0xff]  ;;  %v2345_v37 = vld [vmem:[#allocation2 + $0x410] sm:$0xff] }
  0xa5   :  { %4934 = vst [vmem:[#allocation202_spill] sm:$0xff] %v2332_v27  ;;  %v4935_v34 = vld [vmem:[#allocation46_spill] sm:$0xff]  ;;  %4938 = vst [vmem:[#allocation203_spill] sm:$0xff] %v2345_v37  ;;  %v2349_v56 = vld [vmem:[#allocation2 + $0x420] sm:$0xff] }
  0xa6   :  { %4929 = vst [vmem:[#allocation45_spill] sm:$0xff] %v2320_v32  ;;  %v4936_v18 = vsub.f32 %v1617_v52, %v4935_v34  ;;  %v2347_v41 = vld [vmem:[#allocation2 + $0x418] sm:$0xff]  ;;  %4940 = vst [vmem:[#allocation205_spill] sm:$0xff] %v2349_v56  ;;  %v2351_v59 = vld [vmem:[#allocation5 + $0x3e0] sm:$0xff] }
  0xa7   :  { %4939 = vst [vmem:[#allocation204_spill] sm:$0xff] %v2347_v41  ;;  %4941 = vst [vmem:[#allocation206_spill] sm:$0xff] %v2351_v59  ;;  %v2353_v51 = vld [vmem:[#allocation5 + $0x3e8] sm:$0xff]  ;;  %v2355_v22 = vld [vmem:[#allocation5 + $0x3f0] sm:$0xff] }
  0xa8   :  { %v2343_v32 = vand.u32 2147483647, %v4936_v18  ;;  %4942 = vst [vmem:[#allocation207_spill] sm:$0xff] %v2353_v51  ;;  %4943 = vst [vmem:[#allocation208_spill] sm:$0xff] %v2355_v22  ;;  %v4944_v34 = vld [vmem:[#allocation34_spill] sm:$0xff]  ;;  %v4945_v53 = vld [vmem:[#allocation47_spill] sm:$0xff] }
  0xa9   :  { %v2368_v4 = vld [vmem:[#allocation2 + $0x428] sm:$0xff]  ;;  %v2370_v55 = vld [vmem:[#allocation2 + $0x430] sm:$0xff]  ;;  %v2372_v3 = vld [vmem:[#allocation2 + $0x438] sm:$0xff] }
  0xaa   :  { %4937 = vst [vmem:[#allocation46_spill] sm:$0xff] %v2343_v32  ;;  %v4946_v32 = vsub.f32 %v4944_v34, %v4945_v53  ;;  %4948 = vst [vmem:[#allocation47_spill] sm:$0xff] %v2370_v55  ;;  %v2374_v14 = vld [vmem:[#allocation5 + $0x3f8] sm:$0xff]  ;;  %v2376_v20 = vld [vmem:[#allocation5 + $0x400] sm:$0xff] }
  0xab   :  { %4949 = vst [vmem:[#allocation209_spill] sm:$0xff] %v2372_v3  ;;  %4950 = vst [vmem:[#allocation210_spill] sm:$0xff] %v2374_v14  ;;  %v2378_v63 = vld [vmem:[#allocation5 + $0x408] sm:$0xff]  ;;  %v4952_v34 = vld [vmem:[#allocation50_spill] sm:$0xff] }
  0xac   :  { %v2366_v5 = vand.u32 2147483647, %v4946_v32  ;;  %4951 = vst [vmem:[#allocation211_spill] sm:$0xff] %v2378_v63  ;;  %v4953_v52 = vsub.f32 %v1635_v8, %v4952_v34  ;;  %v2391_v39 = vld [vmem:[#allocation2 + $0x440] sm:$0xff]  ;;  %v2393_v48 = vld [vmem:[#allocation2 + $0x448] sm:$0xff]  ;;  %v2395_v10 = vld [vmem:[#allocation2 + $0x450] sm:$0xff] }
  0xad   :  { %4955 = vst [vmem:[#allocation212_spill] sm:$0xff] %v2391_v39  ;;  %4956 = vst [vmem:[#allocation213_spill] sm:$0xff] %v2393_v48  ;;  %v2397_v28 = vld [vmem:[#allocation5 + $0x410] sm:$0xff]  ;;  %v2399_v18 = vld [vmem:[#allocation5 + $0x418] sm:$0xff] }
  0xae   :  { %4947 = vst [vmem:[#allocation34_spill] sm:$0xff] %v2366_v5  ;;  %v2389_v5 = vand.u32 2147483647, %v4953_v52  ;;  %4957 = vst [vmem:[#allocation214_spill] sm:$0xff] %v2395_v10  ;;  %v2401_v26 = vld [vmem:[#allocation5 + $0x420] sm:$0xff]  ;;  %v2414_v19 = vld [vmem:[#allocation2 + $0x458] sm:$0xff] }
  0xaf   :  { %4958 = vst [vmem:[#allocation215_spill] sm:$0xff] %v2397_v28  ;;  %4959 = vst [vmem:[#allocation216_spill] sm:$0xff] %v2399_v18  ;;  %v4961_v34 = vld [vmem:[#allocation51_spill] sm:$0xff]  ;;  %v2418_v2 = vld [vmem:[#allocation2 + $0x468] sm:$0xff] }
  0xb0   :  { %4954 = vst [vmem:[#allocation50_spill] sm:$0xff] %v2389_v5  ;;  %4960 = vst [vmem:[#allocation217_spill] sm:$0xff] %v2401_v26  ;;  %v4962_v53 = vsub.f32 %v1637_v54, %v4961_v34  ;;  %v2416_v24 = vld [vmem:[#allocation2 + $0x460] sm:$0xff]  ;;  %v2420_v31 = vld [vmem:[#allocation5 + $0x428] sm:$0xff] }
  0xb1   :  { %4964 = vst [vmem:[#allocation218_spill] sm:$0xff] %v2414_v19  ;;  %4965 = vst [vmem:[#allocation219_spill] sm:$0xff] %v2416_v24  ;;  %v2422_v32 = vld [vmem:[#allocation5 + $0x430] sm:$0xff]  ;;  %v2424_v30 = vld [vmem:[#allocation5 + $0x438] sm:$0xff] }
  0xb2   :  { %v2412_v5 = vand.u32 2147483647, %v4962_v53  ;;  %4966 = vst [vmem:[#allocation220_spill] sm:$0xff] %v2418_v2  ;;  %4967 = vst [vmem:[#allocation221_spill] sm:$0xff] %v2420_v31  ;;  %v4970_v34 = vld [vmem:[#allocation39_spill] sm:$0xff]  ;;  %v4971_v8 = vld [vmem:[#allocation52_spill] sm:$0xff] }
  0xb3   :  { %4968 = vst [vmem:[#allocation222_spill] sm:$0xff] %v2422_v32  ;;  %4969 = vst [vmem:[#allocation223_spill] sm:$0xff] %v2424_v30  ;;  %v2437_v35 = vld [vmem:[#allocation2 + $0x470] sm:$0xff]  ;;  %v2439_v1 = vld [vmem:[#allocation2 + $0x478] sm:$0xff] }
  0xb4   :  { %4963 = vst [vmem:[#allocation51_spill] sm:$0xff] %v2412_v5  ;;  %v4972_v5 = vsub.f32 %v4970_v34, %v4971_v8  ;;  %4974 = vst [vmem:[#allocation52_spill] sm:$0xff] %v2437_v35  ;;  %v2441_v17 = vld [vmem:[#allocation2 + $0x480] sm:$0xff]  ;;  %v2445_v52 = vld [vmem:[#allocation5 + $0x448] sm:$0xff] }
  0xb5   :  { %4975 = vst [vmem:[#allocation224_spill] sm:$0xff] %v2439_v1  ;;  %v2443_v21 = vld [vmem:[#allocation5 + $0x440] sm:$0xff]  ;;  %4977 = vst [vmem:[#allocation226_spill] sm:$0xff] %v2445_v52  ;;  %v2447_v59 = vld [vmem:[#allocation5 + $0x450] sm:$0xff] }
  0xb6   :  { %v2435_v27 = vand.u32 2147483647, %v4972_v5  ;;  %4976 = vst [vmem:[#allocation225_spill] sm:$0xff] %v2443_v21  ;;  %4978 = vst [vmem:[#allocation227_spill] sm:$0xff] %v2447_v59  ;;  %v4979_v34 = vld [vmem:[#allocation55_spill] sm:$0xff]  ;;  %v2460_v9 = vld [vmem:[#allocation2 + $0x488] sm:$0xff] }
  0xb7   :  { %v4980_v54 = vsub.f32 %v1655_v12, %v4979_v34  ;;  %4982 = vst [vmem:[#allocation228_spill] sm:$0xff] %v2460_v9  ;;  %v2464_v51 = vld [vmem:[#allocation2 + $0x498] sm:$0xff]  ;;  %v2468_v53 = vld [vmem:[#allocation5 + $0x460] sm:$0xff]  ;;  %v2470_v14 = vld [vmem:[#allocation5 + $0x468] sm:$0xff] }
  0xb8   :  { %4973 = vst [vmem:[#allocation39_spill] sm:$0xff] %v2435_v27  ;;  %v2462_v27 = vld [vmem:[#allocation2 + $0x490] sm:$0xff]  ;;  %4984 = vst [vmem:[#allocation230_spill] sm:$0xff] %v2464_v51  ;;  %v2466_v33 = vld [vmem:[#allocation5 + $0x458] sm:$0xff] }
  0xb9   :  { %v2458_v22 = vand.u32 2147483647, %v4980_v54  ;;  %4983 = vst [vmem:[#allocation229_spill] sm:$0xff] %v2462_v27  ;;  %4985 = vst [vmem:[#allocation231_spill] sm:$0xff] %v2466_v33  ;;  %v4988_v34 = vld [vmem:[#allocation56_spill] sm:$0xff]  ;;  %v2487_v63 = vld [vmem:[#allocation2 + $0x4b0] sm:$0xff] }
  0xba   :  { %4986 = vst [vmem:[#allocation232_spill] sm:$0xff] %v2468_v53  ;;  %4987 = vst [vmem:[#allocation233_spill] sm:$0xff] %v2470_v14  ;;  %v4989_v8 = vsub.f32 %v1657_v60, %v4988_v34  ;;  %v2485_v45 = vld [vmem:[#allocation2 + $0x4a8] sm:$0xff]  ;;  %v2489_v49 = vld [vmem:[#allocation5 + $0x470] sm:$0xff] }
  0xbb   :  { %4981 = vst [vmem:[#allocation55_spill] sm:$0xff] %v2458_v22  ;;  %v2483_v22 = vld [vmem:[#allocation2 + $0x4a0] sm:$0xff]  ;;  %4992 = vst [vmem:[#allocation235_spill] sm:$0xff] %v2485_v45  ;;  %v2491_v5 = vld [vmem:[#allocation5 + $0x478] sm:$0xff] }
  0xbc   :  { %v2481_v38 = vand.u32 2147483647, %v4989_v8  ;;  %4991 = vst [vmem:[#allocation234_spill] sm:$0xff] %v2483_v22  ;;  %4993 = vst [vmem:[#allocation236_spill] sm:$0xff] %v2487_v63  ;;  %v2493_v28 = vld [vmem:[#allocation5 + $0x480] sm:$0xff]  ;;  %v4997_v34 = vld [vmem:[#allocation44_spill] sm:$0xff] }
  0xbd   :  { %4994 = vst [vmem:[#allocation237_spill] sm:$0xff] %v2489_v49  ;;  %4995 = vst [vmem:[#allocation238_spill] sm:$0xff] %v2491_v5  ;;  %v4998_v12 = vld [vmem:[#allocation57_spill] sm:$0xff]  ;;  %v2506_v56 = vld [vmem:[#allocation2 + $0x4b8] sm:$0xff] }
  0xbe   :  { %4990 = vst [vmem:[#allocation56_spill] sm:$0xff] %v2481_v38  ;;  %4996 = vst [vmem:[#allocation239_spill] sm:$0xff] %v2493_v28  ;;  %v4999_v38 = vsub.f32 %v4997_v34, %v4998_v12  ;;  %v2508_v18 = vld [vmem:[#allocation2 + $0x4c0] sm:$0xff]  ;;  %v2510_v41 = vld [vmem:[#allocation2 + $0x4c8] sm:$0xff] }
  0xbf   :  { %5001 = vst [vmem:[#allocation57_spill] sm:$0xff] %v2506_v56  ;;  %5002 = vst [vmem:[#allocation240_spill] sm:$0xff] %v2508_v18  ;;  %v2512_v37 = vld [vmem:[#allocation5 + $0x488] sm:$0xff]  ;;  %v2514_v54 = vld [vmem:[#allocation5 + $0x490] sm:$0xff] }
  0xc0   :  { %v2504_v26 = vand.u32 2147483647, %v4999_v38  ;;  %5003 = vst [vmem:[#allocation241_spill] sm:$0xff] %v2510_v41  ;;  %5004 = vst [vmem:[#allocation242_spill] sm:$0xff] %v2512_v37  ;;  %v2516_v31 = vld [vmem:[#allocation5 + $0x498] sm:$0xff]  ;;  %v5007_v34 = vld [vmem:[#allocation60_spill] sm:$0xff] }
  0xc1   :  { %5005 = vst [vmem:[#allocation243_spill] sm:$0xff] %v2514_v54  ;;  %5006 = vst [vmem:[#allocation244_spill] sm:$0xff] %v2516_v31  ;;  %v5008_v60 = vsub.f32 %v1678_v6, %v5007_v34  ;;  %v2529_v30 = vld [vmem:[#allocation2 + $0x4d0] sm:$0xff]  ;;  %v2531_v3 = vld [vmem:[#allocation2 + $0x4d8] sm:$0xff] }
  0xc2   :  { %5000 = vst [vmem:[#allocation44_spill] sm:$0xff] %v2504_v26  ;;  %5010 = vst [vmem:[#allocation245_spill] sm:$0xff] %v2529_v30  ;;  %v2533_v32 = vld [vmem:[#allocation2 + $0x4e0] sm:$0xff]  ;;  %v2537_v8 = vld [vmem:[#allocation5 + $0x4a8] sm:$0xff] }
  0xc3   :  { %v2527_v26 = vand.u32 2147483647, %v5008_v60  ;;  %5011 = vst [vmem:[#allocation246_spill] sm:$0xff] %v2531_v3  ;;  %5012 = vst [vmem:[#allocation247_spill] sm:$0xff] %v2533_v32  ;;  %v2535_v55 = vld [vmem:[#allocation5 + $0x4a0] sm:$0xff]  ;;  %v2539_v21 = vld [vmem:[#allocation5 + $0x4b0] sm:$0xff] }
  0xc4   :  { %5013 = vst [vmem:[#allocation248_spill] sm:$0xff] %v2535_v55  ;;  %5014 = vst [vmem:[#allocation249_spill] sm:$0xff] %v2537_v8  ;;  %v5016_v34 = vld [vmem:[#allocation61_spill] sm:$0xff]  ;;  %v2552_v59 = vld [vmem:[#allocation2 + $0x4e8] sm:$0xff] }
  0xc5   :  { %5009 = vst [vmem:[#allocation60_spill] sm:$0xff] %v2527_v26  ;;  %5015 = vst [vmem:[#allocation250_spill] sm:$0xff] %v2539_v21  ;;  %v5017_v12 = vsub.f32 %v1680_v47, %v5016_v34  ;;  %v2554_v10 = vld [vmem:[#allocation2 + $0x4f0] sm:$0xff]  ;;  %v2556_v52 = vld [vmem:[#allocation2 + $0x4f8] sm:$0xff] }
  0xc6   :  { %5019 = vst [vmem:[#allocation251_spill] sm:$0xff] %v2552_v59  ;;  %5020 = vst [vmem:[#allocation252_spill] sm:$0xff] %v2554_v10  ;;  %v2558_v48 = vld [vmem:[#allocation5 + $0x4b8] sm:$0xff]  ;;  %v2560_v38 = vld [vmem:[#allocation5 + $0x4c0] sm:$0xff] }
  0xc7   :  { %v2550_v26 = vand.u32 2147483647, %v5017_v12  ;;  %5021 = vst [vmem:[#allocation253_spill] sm:$0xff] %v2556_v52  ;;  %5022 = vst [vmem:[#allocation254_spill] sm:$0xff] %v2558_v48  ;;  %v2562_v33 = vld [vmem:[#allocation5 + $0x4c8] sm:$0xff]  ;;  %v5025_v34 = vld [vmem:[#allocation49_spill] sm:$0xff] }
  0xc8   :  { %5023 = vst [vmem:[#allocation255_spill] sm:$0xff] %v2560_v38  ;;  %5024 = vst [vmem:[#allocation256_spill] sm:$0xff] %v2562_v33  ;;  %v5026_v6 = vld [vmem:[#allocation62_spill] sm:$0xff]  ;;  %v2575_v53 = vld [vmem:[#allocation2 + $0x500] sm:$0xff] }
  0xc9   :  { %5018 = vst [vmem:[#allocation61_spill] sm:$0xff] %v2550_v26  ;;  %v5027_v14 = vsub.f32 %v5025_v34, %v5026_v6  ;;  %5029 = vst [vmem:[#allocation62_spill] sm:$0xff] %v2575_v53  ;;  %v2577_v24 = vld [vmem:[#allocation2 + $0x508] sm:$0xff]  ;;  %v2579_v26 = vld [vmem:[#allocation2 + $0x510] sm:$0xff] }
  0xca   :  { %5030 = vst [vmem:[#allocation257_spill] sm:$0xff] %v2577_v24  ;;  %5031 = vst [vmem:[#allocation258_spill] sm:$0xff] %v2579_v26  ;;  %v2581_v19 = vld [vmem:[#allocation5 + $0x4d0] sm:$0xff]  ;;  %v2583_v60 = vld [vmem:[#allocation5 + $0x4d8] sm:$0xff] }
  0xcb   :  { %v2573_v2 = vand.u32 2147483647, %v5027_v14  ;;  %5032 = vst [vmem:[#allocation259_spill] sm:$0xff] %v2581_v19  ;;  %5033 = vst [vmem:[#allocation260_spill] sm:$0xff] %v2583_v60  ;;  %v2585_v49 = vld [vmem:[#allocation5 + $0x4e0] sm:$0xff]  ;;  %v5035_v34 = vld [vmem:[#allocation65_spill] sm:$0xff] }
  0xcc   :  { %5034 = vst [vmem:[#allocation261_spill] sm:$0xff] %v2585_v49  ;;  %v5036_v12 = vsub.f32 %v1701_v13, %v5035_v34  ;;  %v2598_v1 = vld [vmem:[#allocation2 + $0x518] sm:$0xff]  ;;  %v2600_v35 = vld [vmem:[#allocation2 + $0x520] sm:$0xff]  ;;  %v2604_v39 = vld [vmem:[#allocation5 + $0x4e8] sm:$0xff] }
  0xcd   :  { %5028 = vst [vmem:[#allocation49_spill] sm:$0xff] %v2573_v2  ;;  %5038 = vst [vmem:[#allocation262_spill] sm:$0xff] %v2598_v1  ;;  %v2602_v2 = vld [vmem:[#allocation2 + $0x528] sm:$0xff]  ;;  %v2606_v47 = vld [vmem:[#allocation5 + $0x4f0] sm:$0xff] }
  0xce   :  { %v2596_v5 = vand.u32 2147483647, %v5036_v12  ;;  %5039 = vst [vmem:[#allocation263_spill] sm:$0xff] %v2600_v35  ;;  %5040 = vst [vmem:[#allocation264_spill] sm:$0xff] %v2602_v2  ;;  %v2608_v37 = vld [vmem:[#allocation5 + $0x4f8] sm:$0xff]  ;;  %v2621_v31 = vld [vmem:[#allocation2 + $0x530] sm:$0xff] }
  0xcf   :  { %5041 = vst [vmem:[#allocation265_spill] sm:$0xff] %v2604_v39  ;;  %5042 = vst [vmem:[#allocation266_spill] sm:$0xff] %v2606_v47  ;;  %v5044_v34 = vld [vmem:[#allocation66_spill] sm:$0xff]  ;;  %v2625_v54 = vld [vmem:[#allocation2 + $0x540] sm:$0xff] }
  0xd0   :  { %5037 = vst [vmem:[#allocation65_spill] sm:$0xff] %v2596_v5  ;;  %5043 = vst [vmem:[#allocation267_spill] sm:$0xff] %v2608_v37  ;;  %v5045_v6 = vsub.f32 %v1703_v61, %v5044_v34  ;;  %v2623_v51 = vld [vmem:[#allocation2 + $0x538] sm:$0xff]  ;;  %v2627_v27 = vld [vmem:[#allocation5 + $0x500] sm:$0xff] }
  0xd1   :  { %5047 = vst [vmem:[#allocation268_spill] sm:$0xff] %v2621_v31  ;;  %5048 = vst [vmem:[#allocation269_spill] sm:$0xff] %v2623_v51  ;;  %v2629_v14 = vld [vmem:[#allocation5 + $0x508] sm:$0xff]  ;;  %v2631_v55 = vld [vmem:[#allocation5 + $0x510] sm:$0xff] }
  0xd2   :  { %v2619_v5 = vand.u32 2147483647, %v5045_v6  ;;  %5049 = vst [vmem:[#allocation270_spill] sm:$0xff] %v2625_v54  ;;  %5050 = vst [vmem:[#allocation271_spill] sm:$0xff] %v2627_v27  ;;  %v5053_v34 = vld [vmem:[#allocation54_spill] sm:$0xff]  ;;  %v5054_v13 = vld [vmem:[#allocation67_spill] sm:$0xff] }
  0xd3   :  { %5051 = vst [vmem:[#allocation272_spill] sm:$0xff] %v2629_v14  ;;  %5052 = vst [vmem:[#allocation273_spill] sm:$0xff] %v2631_v55  ;;  %v2644_v63 = vld [vmem:[#allocation2 + $0x548] sm:$0xff]  ;;  %v2646_v8 = vld [vmem:[#allocation2 + $0x550] sm:$0xff] }
  0xd4   :  { %5046 = vst [vmem:[#allocation66_spill] sm:$0xff] %v2619_v5  ;;  %v5055_v5 = vsub.f32 %v5053_v34, %v5054_v13  ;;  %5056 = vst [vmem:[#allocation54_spill] sm:$0xff] %v2644_v63  ;;  %v2648_v45 = vld [vmem:[#allocation2 + $0x558] sm:$0xff]  ;;  %v2652_v12 = vld [vmem:[#allocation5 + $0x520] sm:$0xff] }
  0xd5   :  { %5057 = vst [vmem:[#allocation67_spill] sm:$0xff] %v2646_v8  ;;  %5058 = vst [vmem:[#allocation274_spill] sm:$0xff] %v2648_v45  ;;  %v2650_v22 = vld [vmem:[#allocation5 + $0x518] sm:$0xff]  ;;  %v2654_v48 = vld [vmem:[#allocation5 + $0x528] sm:$0xff] }
  0xd6   :  { %v2642_v21 = vand.u32 2147483647, %v5055_v5  ;;  %5059 = vst [vmem:[#allocation275_spill] sm:$0xff] %v2650_v22  ;;  %5060 = vst [vmem:[#allocation276_spill] sm:$0xff] %v2652_v12  ;;  %v5062_v34 = vld [vmem:[#allocation72_spill] sm:$0xff]  ;;  %v2667_v41 = vld [vmem:[#allocation2 + $0x560] sm:$0xff] }
  0xd7   :  { %5061 = vst [vmem:[#allocation277_spill] sm:$0xff] %v2654_v48  ;;  %v5063_v61 = vsub.f32 %v1724_v42, %v5062_v34  ;;  %5064 = vst [vmem:[#allocation72_spill] sm:$0xff] %v2667_v41  ;;  %v2669_v38 = vld [vmem:[#allocation2 + $0x568] sm:$0xff]  ;;  %v2671_v18 = vld [vmem:[#allocation2 + $0x570] sm:$0xff] }
  0xd8   :  { %5065 = vst [vmem:[#allocation278_spill] sm:$0xff] %v2669_v38  ;;  %5066 = vst [vmem:[#allocation279_spill] sm:$0xff] %v2671_v18  ;;  %v2673_v56 = vld [vmem:[#allocation5 + $0x530] sm:$0xff]  ;;  %v2675_v6 = vld [vmem:[#allocation5 + $0x538] sm:$0xff] }
  0xd9   :  { %v2665_v33 = vand.u32 2147483647, %v5063_v61  ;;  %5067 = vst [vmem:[#allocation280_spill] sm:$0xff] %v2673_v56  ;;  %5068 = vst [vmem:[#allocation281_spill] sm:$0xff] %v2675_v6  ;;  %v2677_v19 = vld [vmem:[#allocation5 + $0x540] sm:$0xff]  ;;  %v5070_v34 = vld [vmem:[#allocation73_spill] sm:$0xff] }
  0xda   :  { %5069 = vst [vmem:[#allocation282_spill] sm:$0xff] %v2677_v19  ;;  %v5071_v13 = vsub.f32 %v1726_v0, %v5070_v34  ;;  %v2690_v32 = vld [vmem:[#allocation2 + $0x578] sm:$0xff]  ;;  %v2692_v60 = vld [vmem:[#allocation2 + $0x580] sm:$0xff]  ;;  %v2694_v3 = vld [vmem:[#allocation2 + $0x588] sm:$0xff] }
  0xdb   :  { %5072 = vst [vmem:[#allocation73_spill] sm:$0xff] %v2690_v32  ;;  %5073 = vst [vmem:[#allocation283_spill] sm:$0xff] %v2692_v60  ;;  %v2696_v30 = vld [vmem:[#allocation5 + $0x548] sm:$0xff]  ;;  %v2698_v5 = vld [vmem:[#allocation5 + $0x550] sm:$0xff] }
  0xdc   :  { %v2688_v49 = vand.u32 2147483647, %v5071_v13  ;;  %5074 = vst [vmem:[#allocation284_spill] sm:$0xff] %v2694_v3  ;;  %5075 = vst [vmem:[#allocation285_spill] sm:$0xff] %v2696_v30  ;;  %v2700_v39 = vld [vmem:[#allocation5 + $0x558] sm:$0xff]  ;;  %v5078_v34 = vld [vmem:[#allocation59_spill] sm:$0xff] }
  0xdd   :  { %5076 = vst [vmem:[#allocation286_spill] sm:$0xff] %v2698_v5  ;;  %5077 = vst [vmem:[#allocation287_spill] sm:$0xff] %v2700_v39  ;;  %v5079_v42 = vld [vmem:[#allocation74_spill] sm:$0xff]  ;;  %v2713_v47 = vld [vmem:[#allocation2 + $0x590] sm:$0xff] }
  0xde   :  { %v5080_v37 = vsub.f32 %v5078_v34, %v5079_v42  ;;  %5081 = vst [vmem:[#allocation59_spill] sm:$0xff] %v2713_v47  ;;  %v2715_v10 = vld [vmem:[#allocation2 + $0x598] sm:$0xff]  ;;  %v2717_v59 = vld [vmem:[#allocation2 + $0x5a0] sm:$0xff]  ;;  %v2721_v61 = vld [vmem:[#allocation5 + $0x568] sm:$0xff] }
  0xdf   :  { %5082 = vst [vmem:[#allocation74_spill] sm:$0xff] %v2715_v10  ;;  %5083 = vst [vmem:[#allocation288_spill] sm:$0xff] %v2717_v59  ;;  %v2719_v9 = vld [vmem:[#allocation5 + $0x560] sm:$0xff]  ;;  %v2723_v27 = vld [vmem:[#allocation5 + $0x570] sm:$0xff] }
  0xe0   :  { %v2711_v52 = vand.u32 2147483647, %v5080_v37  ;;  %5084 = vst [vmem:[#allocation289_spill] sm:$0xff] %v2719_v9  ;;  %5085 = vst [vmem:[#allocation290_spill] sm:$0xff] %v2721_v61  ;;  %v5087_v34 = vld [vmem:[#allocation79_spill] sm:$0xff]  ;;  %v2736_v26 = vld [vmem:[#allocation2 + $0x5a8] sm:$0xff] }
  0xe1   :  { %5086 = vst [vmem:[#allocation291_spill] sm:$0xff] %v2723_v27  ;;  %v5088_v0 = vsub.f32 %v1747_v7, %v5087_v34  ;;  %5090 = vst [vmem:[#allocation292_spill] sm:$0xff] %v2736_v26  ;;  %v2738_v14 = vld [vmem:[#allocation2 + $0x5b0] sm:$0xff]  ;;  %v2740_v24 = vld [vmem:[#allocation2 + $0x5b8] sm:$0xff] }
  0xe2   :  { %5091 = vst [vmem:[#allocation293_spill] sm:$0xff] %v2738_v14  ;;  %5092 = vst [vmem:[#allocation294_spill] sm:$0xff] %v2740_v24  ;;  %v2742_v53 = vld [vmem:[#allocation5 + $0x578] sm:$0xff]  ;;  %v2744_v13 = vld [vmem:[#allocation5 + $0x580] sm:$0xff] }
  0xe3   :  { %v2734_v55 = vand.u32 2147483647, %v5088_v0  ;;  %5093 = vst [vmem:[#allocation295_spill] sm:$0xff] %v2742_v53  ;;  %5094 = vst [vmem:[#allocation296_spill] sm:$0xff] %v2744_v13  ;;  %v2746_v22 = vld [vmem:[#allocation5 + $0x588] sm:$0xff]  ;;  %v2759_v48 = vld [vmem:[#allocation2 + $0x5c0] sm:$0xff] }
  0xe4   :  { %5095 = vst [vmem:[#allocation297_spill] sm:$0xff] %v2746_v22  ;;  %v5096_v34 = vld [vmem:[#allocation80_spill] sm:$0xff]  ;;  %5099 = vst [vmem:[#allocation298_spill] sm:$0xff] %v2759_v48  ;;  %v2763_v12 = vld [vmem:[#allocation2 + $0x5d0] sm:$0xff] }
  0xe5   :  { %5089 = vst [vmem:[#allocation79_spill] sm:$0xff] %v2734_v55  ;;  %v5097_v42 = vsub.f32 %v1749_v29, %v5096_v34  ;;  %v2761_v2 = vld [vmem:[#allocation2 + $0x5c8] sm:$0xff]  ;;  %5101 = vst [vmem:[#allocation300_spill] sm:$0xff] %v2763_v12  ;;  %v2765_v35 = vld [vmem:[#allocation5 + $0x590] sm:$0xff] }
  0xe6   :  { %5100 = vst [vmem:[#allocation299_spill] sm:$0xff] %v2761_v2  ;;  %5102 = vst [vmem:[#allocation301_spill] sm:$0xff] %v2765_v35  ;;  %v2767_v37 = vld [vmem:[#allocation5 + $0x598] sm:$0xff]  ;;  %v2769_v56 = vld [vmem:[#allocation5 + $0x5a0] sm:$0xff] }
  0xe7   :  { %v2757_v55 = vand.u32 2147483647, %v5097_v42  ;;  %5103 = vst [vmem:[#allocation302_spill] sm:$0xff] %v2767_v37  ;;  %5104 = vst [vmem:[#allocation303_spill] sm:$0xff] %v2769_v56  ;;  %v5105_v34 = vld [vmem:[#allocation64_spill] sm:$0xff]  ;;  %v5106_v7 = vld [vmem:[#allocation81_spill] sm:$0xff] }
  0xe8   :  { %v2782_v54 = vld [vmem:[#allocation2 + $0x5d8] sm:$0xff]  ;;  %v2784_v6 = vld [vmem:[#allocation2 + $0x5e0] sm:$0xff]  ;;  %v2786_v51 = vld [vmem:[#allocation2 + $0x5e8] sm:$0xff] }
  0xe9   :  { %5098 = vst [vmem:[#allocation80_spill] sm:$0xff] %v2757_v55  ;;  %v5107_v55 = vsub.f32 %v5105_v34, %v5106_v7  ;;  %5109 = vst [vmem:[#allocation81_spill] sm:$0xff] %v2782_v54  ;;  %v2788_v31 = vld [vmem:[#allocation5 + $0x5a8] sm:$0xff]  ;;  %v2790_v0 = vld [vmem:[#allocation5 + $0x5b0] sm:$0xff] }
  0xea   :  { %5110 = vst [vmem:[#allocation304_spill] sm:$0xff] %v2784_v6  ;;  %5111 = vst [vmem:[#allocation305_spill] sm:$0xff] %v2786_v51  ;;  %v2792_v30 = vld [vmem:[#allocation5 + $0x5b8] sm:$0xff]  ;;  %v5115_v34 = vld [vmem:[#allocation69_spill] sm:$0xff] }
  0xeb   :  { %v2780_v19 = vand.u32 2147483647, %v5107_v55  ;;  %5112 = vst [vmem:[#allocation306_spill] sm:$0xff] %v2788_v31  ;;  %5113 = vst [vmem:[#allocation307_spill] sm:$0xff] %v2790_v0  ;;  %v5116_v29 = vld [vmem:[#allocation85_spill] sm:$0xff]  ;;  %v2807_v5 = vld [vmem:[#allocation2 + $0x5f8] sm:$0xff] }
  0xec   :  { %5114 = vst [vmem:[#allocation308_spill] sm:$0xff] %v2792_v30  ;;  %v2805_v45 = vld [vmem:[#allocation2 + $0x5f0] sm:$0xff]  ;;  %5120 = vst [vmem:[#allocation309_spill] sm:$0xff] %v2807_v5  ;;  %v2809_v8 = vld [vmem:[#allocation2 + $0x600] sm:$0xff] }
  0xed   :  { %5108 = vst [vmem:[#allocation64_spill] sm:$0xff] %v2780_v19  ;;  %v5117_v19 = vsub.f32 %v5115_v34, %v5116_v29  ;;  %5119 = vst [vmem:[#allocation85_spill] sm:$0xff] %v2805_v45  ;;  %v2811_v63 = vld [vmem:[#allocation5 + $0x5c0] sm:$0xff]  ;;  %v2813_v42 = vld [vmem:[#allocation5 + $0x5c8] sm:$0xff] }
  0xee   :  { %5121 = vst [vmem:[#allocation310_spill] sm:$0xff] %v2809_v8  ;;  %5122 = vst [vmem:[#allocation311_spill] sm:$0xff] %v2811_v63  ;;  %v2815_v9 = vld [vmem:[#allocation5 + $0x5d0] sm:$0xff]  ;;  %v5125_v34 = vld [vmem:[#allocation70_spill] sm:$0xff] }
  0xef   :  { %v2803_v39 = vand.u32 2147483647, %v5117_v19  ;;  %5123 = vst [vmem:[#allocation312_spill] sm:$0xff] %v2813_v42  ;;  %5124 = vst [vmem:[#allocation313_spill] sm:$0xff] %v2815_v9  ;;  %v5126_v7 = vld [vmem:[#allocation86_spill] sm:$0xff]  ;;  %v2828_v61 = vld [vmem:[#allocation2 + $0x608] sm:$0xff] }
  0xf0   :  { %v5127_v27 = vsub.f32 %v5125_v34, %v5126_v7  ;;  %5129 = vst [vmem:[#allocation86_spill] sm:$0xff] %v2828_v61  ;;  %v2830_v38 = vld [vmem:[#allocation2 + $0x610] sm:$0xff]  ;;  %v2832_v41 = vld [vmem:[#allocation2 + $0x618] sm:$0xff]  ;;  %v2836_v55 = vld [vmem:[#allocation5 + $0x5e0] sm:$0xff] }
  0xf1   :  { %5118 = vst [vmem:[#allocation69_spill] sm:$0xff] %v2803_v39  ;;  %5130 = vst [vmem:[#allocation314_spill] sm:$0xff] %v2830_v38  ;;  %v2834_v39 = vld [vmem:[#allocation5 + $0x5d8] sm:$0xff]  ;;  %v2838_v53 = vld [vmem:[#allocation5 + $0x5e8] sm:$0xff] }
  0xf2   :  { %v2826_v18 = vand.u32 2147483647, %v5127_v27  ;;  %5131 = vst [vmem:[#allocation315_spill] sm:$0xff] %v2832_v41  ;;  %5132 = vst [vmem:[#allocation316_spill] sm:$0xff] %v2834_v39  ;;  %v5135_v34 = vld [vmem:[#allocation71_spill] sm:$0xff]  ;;  %v2853_v3 = vld [vmem:[#allocation2 + $0x628] sm:$0xff] }
  0xf3   :  { %5133 = vst [vmem:[#allocation317_spill] sm:$0xff] %v2836_v55  ;;  %5134 = vst [vmem:[#allocation318_spill] sm:$0xff] %v2838_v53  ;;  %v5136_v29 = vld [vmem:[#allocation87_spill] sm:$0xff]  ;;  %v2855_v13 = vld [vmem:[#allocation2 + $0x630] sm:$0xff] }
  0xf4   :  { %5128 = vst [vmem:[#allocation70_spill] sm:$0xff] %v2826_v18  ;;  %v5137_v32 = vsub.f32 %v5135_v34, %v5136_v29  ;;  %v2851_v22 = vld [vmem:[#allocation2 + $0x620] sm:$0xff]  ;;  %5140 = vst [vmem:[#allocation319_spill] sm:$0xff] %v2853_v3  ;;  %v2857_v60 = vld [vmem:[#allocation5 + $0x5f0] sm:$0xff] }
  0xf5   :  { %5139 = vst [vmem:[#allocation87_spill] sm:$0xff] %v2851_v22  ;;  %5141 = vst [vmem:[#allocation320_spill] sm:$0xff] %v2855_v13  ;;  %v2859_v19 = vld [vmem:[#allocation5 + $0x5f8] sm:$0xff]  ;;  %v2861_v35 = vld [vmem:[#allocation5 + $0x600] sm:$0xff] }
  0xf6   :  { %v2849_v18 = vand.u32 2147483647, %v5137_v32  ;;  %5142 = vst [vmem:[#allocation321_spill] sm:$0xff] %v2857_v60  ;;  %5143 = vst [vmem:[#allocation322_spill] sm:$0xff] %v2859_v19  ;;  %v5145_v34 = vld [vmem:[#allocation76_spill] sm:$0xff]  ;;  %v2874_v59 = vld [vmem:[#allocation2 + $0x638] sm:$0xff] }
  0xf7   :  { %5144 = vst [vmem:[#allocation323_spill] sm:$0xff] %v2861_v35  ;;  %v5146_v7 = vld [vmem:[#allocation92_spill] sm:$0xff]  ;;  %v2876_v37 = vld [vmem:[#allocation2 + $0x640] sm:$0xff]  ;;  %v2882_v27 = vld [vmem:[#allocation5 + $0x610] sm:$0xff] }
  0xf8   :  { %5138 = vst [vmem:[#allocation71_spill] sm:$0xff] %v2849_v18  ;;  %v5147_v18 = vsub.f32 %v5145_v34, %v5146_v7  ;;  %5149 = vst [vmem:[#allocation92_spill] sm:$0xff] %v2874_v59  ;;  %v2878_v10 = vld [vmem:[#allocation2 + $0x648] sm:$0xff]  ;;  %v2884_v31 = vld [vmem:[#allocation5 + $0x618] sm:$0xff] }
  0xf9   :  { %5150 = vst [vmem:[#allocation324_spill] sm:$0xff] %v2876_v37  ;;  %5151 = vst [vmem:[#allocation325_spill] sm:$0xff] %v2878_v10  ;;  %v2880_v47 = vld [vmem:[#allocation5 + $0x608] sm:$0xff]  ;;  %v5155_v34 = vld [vmem:[#allocation77_spill] sm:$0xff] }
  0xfa   :  { %v2872_v56 = vand.u32 2147483647, %v5147_v18  ;;  %5152 = vst [vmem:[#allocation326_spill] sm:$0xff] %v2880_v47  ;;  %5153 = vst [vmem:[#allocation327_spill] sm:$0xff] %v2882_v27  ;;  %v5156_v29 = vld [vmem:[#allocation93_spill] sm:$0xff]  ;;  %v2899_v0 = vld [vmem:[#allocation2 + $0x658] sm:$0xff] }
  0xfb   :  { %5154 = vst [vmem:[#allocation328_spill] sm:$0xff] %v2884_v31  ;;  %v2897_v24 = vld [vmem:[#allocation2 + $0x650] sm:$0xff]  ;;  %5160 = vst [vmem:[#allocation329_spill] sm:$0xff] %v2899_v0  ;;  %v2901_v14 = vld [vmem:[#allocation2 + $0x660] sm:$0xff] }
  0xfc   :  { %5148 = vst [vmem:[#allocation76_spill] sm:$0xff] %v2872_v56  ;;  %v5157_v56 = vsub.f32 %v5155_v34, %v5156_v29  ;;  %5159 = vst [vmem:[#allocation93_spill] sm:$0xff] %v2897_v24  ;;  %v2903_v26 = vld [vmem:[#allocation5 + $0x620] sm:$0xff]  ;;  %v2905_v32 = vld [vmem:[#allocation5 + $0x628] sm:$0xff] }
  0xfd   :  { %5161 = vst [vmem:[#allocation330_spill] sm:$0xff] %v2901_v14  ;;  %5162 = vst [vmem:[#allocation331_spill] sm:$0xff] %v2903_v26  ;;  %v2907_v63 = vld [vmem:[#allocation5 + $0x630] sm:$0xff]  ;;  %v5165_v34 = vld [vmem:[#allocation78_spill] sm:$0xff] }
  0xfe   :  { %v2895_v30 = vand.u32 2147483647, %v5157_v56  ;;  %5163 = vst [vmem:[#allocation332_spill] sm:$0xff] %v2905_v32  ;;  %5164 = vst [vmem:[#allocation333_spill] sm:$0xff] %v2907_v63  ;;  %v5166_v7 = vld [vmem:[#allocation94_spill] sm:$0xff]  ;;  %v2920_v12 = vld [vmem:[#allocation2 + $0x668] sm:$0xff] }
  0xff   :  { %5169 = vst [vmem:[#allocation94_spill] sm:$0xff] %v2920_v12  ;;  %v2922_v42 = vld [vmem:[#allocation2 + $0x670] sm:$0xff]  ;;  %v2924_v2 = vld [vmem:[#allocation2 + $0x678] sm:$0xff]  ;;  %v2928_v18 = vld [vmem:[#allocation5 + $0x640] sm:$0xff] }
 0x100   :  { %5158 = vst [vmem:[#allocation77_spill] sm:$0xff] %v2895_v30  ;;  %v5167_v30 = vsub.f32 %v5165_v34, %v5166_v7  ;;  %5170 = vst [vmem:[#allocation334_spill] sm:$0xff] %v2922_v42  ;;  %v2926_v48 = vld [vmem:[#allocation5 + $0x638] sm:$0xff]  ;;  %v2930_v39 = vld [vmem:[#allocation5 + $0x648] sm:$0xff] }
 0x101   :  { %5171 = vst [vmem:[#allocation335_spill] sm:$0xff] %v2924_v2  ;;  %5172 = vst [vmem:[#allocation336_spill] sm:$0xff] %v2926_v48  ;;  %v5175_v34 = vld [vmem:[#allocation99_spill] sm:$0xff]  ;;  %v2945_v55 = vld [vmem:[#allocation2 + $0x688] sm:$0xff] }
 0x102   :  { %v2918_v9 = vand.u32 2147483647, %v5167_v30  ;;  %5173 = vst [vmem:[#allocation337_spill] sm:$0xff] %v2928_v18  ;;  %5174 = vst [vmem:[#allocation338_spill] sm:$0xff] %v2930_v39  ;;  %v5176_v29 = vsub.f32 %v1816_v11, %v5175_v34  ;;  %v2943_v51 = vld [vmem:[#allocation2 + $0x680] sm:$0xff]  ;;  %v2947_v6 = vld [vmem:[#allocation2 + $0x690] sm:$0xff] }
 0x103   :  { %5178 = vst [vmem:[#allocation339_spill] sm:$0xff] %v2943_v51  ;;  %5179 = vst [vmem:[#allocation340_spill] sm:$0xff] %v2945_v55  ;;  %v2951_v56 = vld [vmem:[#allocation5 + $0x658] sm:$0xff]  ;;  %v2953_v60 = vld [vmem:[#allocation5 + $0x660] sm:$0xff] }
 0x104   :  { %5168 = vst [vmem:[#allocation78_spill] sm:$0xff] %v2918_v9  ;;  %v2941_v53 = vand.u32 2147483647, %v5176_v29  ;;  %5180 = vst [vmem:[#allocation341_spill] sm:$0xff] %v2947_v6  ;;  %v2949_v9 = vld [vmem:[#allocation5 + $0x650] sm:$0xff]  ;;  %v5184_v34 = vld [vmem:[#allocation83_spill] sm:$0xff] }
 0x105   :  { %5181 = vst [vmem:[#allocation342_spill] sm:$0xff] %v2949_v9  ;;  %5182 = vst [vmem:[#allocation343_spill] sm:$0xff] %v2951_v56  ;;  %v5185_v30 = vld [vmem:[#allocation100_spill] sm:$0xff]  ;;  %v2966_v45 = vld [vmem:[#allocation2 + $0x698] sm:$0xff] }
 0x106   :  { %5177 = vst [vmem:[#allocation99_spill] sm:$0xff] %v2941_v53  ;;  %5183 = vst [vmem:[#allocation344_spill] sm:$0xff] %v2953_v60  ;;  %v5186_v19 = vsub.f32 %v5184_v34, %v5185_v30  ;;  %v2968_v53 = vld [vmem:[#allocation2 + $0x6a0] sm:$0xff]  ;;  %v2970_v54 = vld [vmem:[#allocation2 + $0x6a8] sm:$0xff] }
 0x107   :  { %5188 = vst [vmem:[#allocation100_spill] sm:$0xff] %v2968_v53  ;;  %5189 = vst [vmem:[#allocation345_spill] sm:$0xff] %v2970_v54  ;;  %v2972_v35 = vld [vmem:[#allocation5 + $0x668] sm:$0xff]  ;;  %v2974_v7 = vld [vmem:[#allocation5 + $0x670] sm:$0xff] }
 0x108   :  { %v2964_v5 = vand.u32 2147483647, %v5186_v19  ;;  %5190 = vst [vmem:[#allocation346_spill] sm:$0xff] %v2972_v35  ;;  %5191 = vst [vmem:[#allocation347_spill] sm:$0xff] %v2974_v7  ;;  %v2976_v47 = vld [vmem:[#allocation5 + $0x678] sm:$0xff]  ;;  %v5193_v34 = vld [vmem:[#allocation84_spill] sm:$0xff] }
 0x109   :  { %5192 = vst [vmem:[#allocation348_spill] sm:$0xff] %v2976_v47  ;;  %v5194_v11 = vld [vmem:[#allocation101_spill] sm:$0xff]  ;;  %v2991_v27 = vld [vmem:[#allocation2 + $0x6b8] sm:$0xff]  ;;  %v2993_v38 = vld [vmem:[#allocation2 + $0x6c0] sm:$0xff] }
 0x10a   :  { %5187 = vst [vmem:[#allocation83_spill] sm:$0xff] %v2964_v5  ;;  %v5195_v5 = vsub.f32 %v5193_v34, %v5194_v11  ;;  %v2989_v41 = vld [vmem:[#allocation2 + $0x6b0] sm:$0xff]  ;;  %5197 = vst [vmem:[#allocation101_spill] sm:$0xff] %v2991_v27  ;;  %v2995_v61 = vld [vmem:[#allocation5 + $0x680] sm:$0xff] }
 0x10b   :  { %5198 = vst [vmem:[#allocation349_spill] sm:$0xff] %v2993_v38  ;;  %5199 = vst [vmem:[#allocation350_spill] sm:$0xff] %v2995_v61  ;;  %v2997_v29 = vld [vmem:[#allocation5 + $0x688] sm:$0xff]  ;;  %v2999_v26 = vld [vmem:[#allocation5 + $0x690] sm:$0xff] }
 0x10c   :  { %v2987_v31 = vand.u32 2147483647, %v5195_v5  ;;  %5200 = vst [vmem:[#allocation351_spill] sm:$0xff] %v2997_v29  ;;  %5201 = vst [vmem:[#allocation352_spill] sm:$0xff] %v2999_v26  ;;  %v5202_v34 = vld [vmem:[#allocation89_spill] sm:$0xff]  ;;  %v5203_v30 = vld [vmem:[#allocation104_spill] sm:$0xff] }
 0x10d   :  { %v3012_v13 = vld [vmem:[#allocation2 + $0x6c8] sm:$0xff]  ;;  %v3014_v32 = vld [vmem:[#allocation2 + $0x6d0] sm:$0xff]  ;;  %v3016_v3 = vld [vmem:[#allocation2 + $0x6d8] sm:$0xff] }
 0x10e   :  { %5196 = vst [vmem:[#allocation84_spill] sm:$0xff] %v2987_v31  ;;  %v5204_v31 = vsub.f32 %v5202_v34, %v5203_v30  ;;  %5205 = vst [vmem:[#allocation89_spill] sm:$0xff] %v3012_v13  ;;  %v3018_v22 = vld [vmem:[#allocation5 + $0x698] sm:$0xff]  ;;  %v3020_v19 = vld [vmem:[#allocation5 + $0x6a0] sm:$0xff] }
 0x10f   :  { %5206 = vst [vmem:[#allocation104_spill] sm:$0xff] %v3014_v32  ;;  %5207 = vst [vmem:[#allocation353_spill] sm:$0xff] %v3016_v3  ;;  %v3022_v48 = vld [vmem:[#allocation5 + $0x6a8] sm:$0xff]  ;;  %v5211_v34 = vld [vmem:[#allocation90_spill] sm:$0xff] }
 0x110   :  { %v3010_v63 = vand.u32 2147483647, %v5204_v31  ;;  %5208 = vst [vmem:[#allocation354_spill] sm:$0xff] %v3018_v22  ;;  %5209 = vst [vmem:[#allocation355_spill] sm:$0xff] %v3020_v19  ;;  %v5212_v11 = vld [vmem:[#allocation105_spill] sm:$0xff]  ;;  %v3035_v18 = vld [vmem:[#allocation2 + $0x6e0] sm:$0xff] }
 0x111   :  { %5210 = vst [vmem:[#allocation356_spill] sm:$0xff] %v3022_v48  ;;  %v5213_v39 = vsub.f32 %v5211_v34, %v5212_v11  ;;  %5214 = vst [vmem:[#allocation90_spill] sm:$0xff] %v3035_v18  ;;  %v3037_v37 = vld [vmem:[#allocation2 + $0x6e8] sm:$0xff]  ;;  %v3039_v59 = vld [vmem:[#allocation2 + $0x6f0] sm:$0xff] }
 0x112   :  { %5215 = vst [vmem:[#allocation105_spill] sm:$0xff] %v3037_v37  ;;  %5216 = vst [vmem:[#allocation357_spill] sm:$0xff] %v3039_v59  ;;  %v3041_v8 = vld [vmem:[#allocation5 + $0x6b0] sm:$0xff]  ;;  %v3043_v5 = vld [vmem:[#allocation5 + $0x6b8] sm:$0xff] }
 0x113   :  { %v3033_v10 = vand.u32 2147483647, %v5213_v39  ;;  %5217 = vst [vmem:[#allocation358_spill] sm:$0xff] %v3041_v8  ;;  %5218 = vst [vmem:[#allocation359_spill] sm:$0xff] %v3043_v5  ;;  %v3045_v9 = vld [vmem:[#allocation5 + $0x6c0] sm:$0xff]  ;;  %v5221_v30 = vld [vmem:[#allocation106_spill] sm:$0xff] }
 0x114   :  { %5219 = vst [vmem:[#allocation360_spill] sm:$0xff] %v3045_v9  ;;  %v5220_v34 = vld [vmem:[#allocation91_spill] sm:$0xff]  ;;  %v3058_v56 = vld [vmem:[#allocation2 + $0x6f8] sm:$0xff]  ;;  %v3062_v24 = vld [vmem:[#allocation2 + $0x708] sm:$0xff] }
 0x115   :  { %v5222_v60 = vsub.f32 %v5220_v34, %v5221_v30  ;;  %5223 = vst [vmem:[#allocation91_spill] sm:$0xff] %v3058_v56  ;;  %v3060_v0 = vld [vmem:[#allocation2 + $0x700] sm:$0xff]  ;;  %v3064_v1 = vld [vmem:[#allocation5 + $0x6c8] sm:$0xff]  ;;  %v3066_v31 = vld [vmem:[#allocation5 + $0x6d0] sm:$0xff] }
 0x116   :  { %5224 = vst [vmem:[#allocation106_spill] sm:$0xff] %v3064_v1  ;;  %5225 = vst [vmem:[#allocation361_spill] sm:$0xff] %v3066_v31  ;;  %v3068_v35 = vld [vmem:[#allocation5 + $0x6d8] sm:$0xff]  ;;  %v5227_v34 = vld [vmem:[#allocation96_spill] sm:$0xff] }
 0x117   :  { %v3056_v14 = vand.u32 2147483647, %v5222_v60  ;;  %5226 = vst [vmem:[#allocation362_spill] sm:$0xff] %v3068_v35  ;;  %v5228_v11 = vld [vmem:[#allocation111_spill] sm:$0xff]  ;;  %v3081_v7 = vld [vmem:[#allocation2 + $0x710] sm:$0xff]  ;;  %v3083_v42 = vld [vmem:[#allocation2 + $0x718] sm:$0xff] }
 0x118   :  { %v5229_v47 = vsub.f32 %v5227_v34, %v5228_v11  ;;  %5230 = vst [vmem:[#allocation96_spill] sm:$0xff] %v3083_v42  ;;  %v3085_v12 = vld [vmem:[#allocation5 + $0x6e0] sm:$0xff]  ;;  %v3087_v28 = vld [vmem:[#allocation5 + $0x6e8] sm:$0xff]  ;;  %v3089_v39 = vld [vmem:[#allocation5 + $0x6f0] sm:$0xff] }
 0x119   :  { %5231 = vst [vmem:[#allocation111_spill] sm:$0xff] %v3085_v12  ;;  %5232 = vst [vmem:[#allocation363_spill] sm:$0xff] %v3087_v28  ;;  %v5234_v11 = vld [vmem:[#allocation97_spill] sm:$0xff]  ;;  %v5235_v34 = vld [vmem:[#allocation112_spill] sm:$0xff] }
 0x11a   :  { %v3079_v2 = vand.u32 2147483647, %v5229_v47  ;;  %5233 = vst [vmem:[#allocation364_spill] sm:$0xff] %v3089_v39  ;;  %v5236_v26 = vsub.f32 %v5234_v11, %v5235_v34  ;;  %v3102_v29 = vld [vmem:[#allocation2 + $0x720] sm:$0xff]  ;;  %v3104_v55 = vld [vmem:[#allocation2 + $0x728] sm:$0xff]  ;;  %v3106_v61 = vld [vmem:[#allocation5 + $0x6f8] sm:$0xff] }
 0x11b   :  { %5238 = vst [vmem:[#allocation112_spill] sm:$0xff] %v3106_v61  ;;  %v3108_v51 = vld [vmem:[#allocation5 + $0x700] sm:$0xff]  ;;  %v3110_v30 = vld [vmem:[#allocation5 + $0x708] sm:$0xff]  ;;  %v5239_v11 = vld [vmem:[#allocation98_spill] sm:$0xff] }
 0x11c   :  { %v3100_v6 = vand.u32 2147483647, %v5236_v26  ;;  %v5240_v34 = vld [vmem:[#allocation113_spill] sm:$0xff]  ;;  %v3125_v19 = vld [vmem:[#allocation2 + $0x738] sm:$0xff]  ;;  %v3127_v53 = vld [vmem:[#allocation2 + $0x740] sm:$0xff] }
 0x11d   :  { %v3123_v54 = vld [vmem:[#allocation2 + $0x730] sm:$0xff]  ;;  %v3131_v60 = vld [vmem:[#allocation5 + $0x718] sm:$0xff]  ;;  %v3144_v9 = vld [vmem:[#allocation2 + $0x748] sm:$0xff] }
 0x11e   :  { %5237 = vst [vmem:[#allocation97_spill] sm:$0xff] %v3100_v6  ;;  %v5241_v6 = vsub.f32 %v5239_v11, %v5240_v34  ;;  %5243 = vst [vmem:[#allocation113_spill] sm:$0xff] %v3123_v54  ;;  %v3129_v22 = vld [vmem:[#allocation5 + $0x710] sm:$0xff]  ;;  %v5245_v11 = vld [vmem:[#allocation116_spill] sm:$0xff] }
 0x11f   :  { %5244 = vst [vmem:[#allocation365_spill] sm:$0xff] %v3131_v60  ;;  %v5246_v34 = vsub.f32 %v1885_v16, %v5245_v11  ;;  %5248 = vst [vmem:[#allocation366_spill] sm:$0xff] %v3144_v9  ;;  %v3146_v38 = vld [vmem:[#allocation2 + $0x750] sm:$0xff]  ;;  %v3148_v5 = vld [vmem:[#allocation5 + $0x720] sm:$0xff] }
 0x120   :  { %v3121_v48 = vand.u32 2147483647, %v5241_v6  ;;  %5249 = vst [vmem:[#allocation367_spill] sm:$0xff] %v3146_v38  ;;  %v3150_v27 = vld [vmem:[#allocation5 + $0x728] sm:$0xff]  ;;  %v5251_v16 = vld [vmem:[#allocation117_spill] sm:$0xff]  ;;  %v3165_v35 = vld [vmem:[#allocation2 + $0x760] sm:$0xff] }
 0x121   :  { %5250 = vst [vmem:[#allocation368_spill] sm:$0xff] %v3150_v27  ;;  %v5252_v11 = vsub.f32 %v1887_v46, %v5251_v16  ;;  %5255 = vst [vmem:[#allocation370_spill] sm:$0xff] %v3165_v35  ;;  %v3167_v3 = vld [vmem:[#allocation2 + $0x768] sm:$0xff]  ;;  %v3169_v31 = vld [vmem:[#allocation5 + $0x730] sm:$0xff] }
 0x122   :  { %5242 = vst [vmem:[#allocation98_spill] sm:$0xff] %v3121_v48  ;;  %v3142_v48 = vand.u32 2147483647, %v5246_v34  ;;  %5256 = vst [vmem:[#allocation371_spill] sm:$0xff] %v3167_v3  ;;  %v3171_v47 = vld [vmem:[#allocation5 + $0x738] sm:$0xff]  ;;  %v3173_v12 = vld [vmem:[#allocation5 + $0x740] sm:$0xff] }
 0x123   :  { %v3161_v34 = vand.u32 2147483647, %v5252_v11  ;;  %5257 = vst [vmem:[#allocation372_spill] sm:$0xff] %v3169_v31  ;;  %5258 = vst [vmem:[#allocation373_spill] sm:$0xff] %v3173_v12  ;;  %v5259_v11 = vld [vmem:[#allocation103_spill] sm:$0xff]  ;;  %v5260_v26 = vld [vmem:[#allocation118_spill] sm:$0xff] }
 0x124   :  { %5247 = vst [vmem:[#allocation116_spill] sm:$0xff] %v3142_v48  ;;  %v3163_v48 = vld [vmem:[#allocation2 + $0x758] sm:$0xff]  ;;  %v5261_v39 = vsub.f32 %v5259_v11, %v5260_v26  ;;  %v3186_v28 = vld [vmem:[#allocation2 + $0x780] sm:$0xff]  ;;  %v3188_v37 = vld [vmem:[#allocation5 + $0x748] sm:$0xff] }
 0x125   :  { %5253 = vst [vmem:[#allocation117_spill] sm:$0xff] %v3161_v34  ;;  %5254 = vst [vmem:[#allocation369_spill] sm:$0xff] %v3163_v48  ;;  %v3190_v18 = vld [vmem:[#allocation5 + $0x750] sm:$0xff]  ;;  %v5265_v61 = vld [vmem:[#allocation108_spill] sm:$0xff] }
 0x126   :  { %v3184_v59 = vand.u32 2147483647, %v5261_v39  ;;  %5263 = vst [vmem:[#allocation118_spill] sm:$0xff] %v3188_v37  ;;  %5264 = vst [vmem:[#allocation374_spill] sm:$0xff] %v3190_v18  ;;  %v5266_v56 = vld [vmem:[#allocation120_spill] sm:$0xff]  ;;  %v5269_v26 = vld [vmem:[#allocation19_spill] sm:$0xff] }
 0x127   :  { %v5267_v16 = vsub.f32 %v5265_v61, %v5266_v56  ;;  %v5270_v39 = vld [vmem:[#allocation107_spill] sm:$0xff]  ;;  %v3207_v1 = vld [vmem:[#allocation5 + $0x768] sm:$0xff]  ;;  %v5274_v60 = vld [vmem:[#allocation109_spill] sm:$0xff] }
 0x128   :  { %5262 = vst [vmem:[#allocation103_spill] sm:$0xff] %v3184_v59  ;;  %v1064_v11 = vadd.f32 %v5270_v39, %v5269_v26  ;;  %v3203_v59 = vld [vmem:[#allocation5 + $0x758] sm:$0xff]  ;;  %v3205_v32 = vld [vmem:[#allocation5 + $0x760] sm:$0xff]  ;;  %5273 = vst [vmem:[#allocation107_spill] sm:$0xff] %v3207_v1 }
 0x129   :  { %v3199_v34 = vand.u32 2147483647, %v5267_v16  ;;  %5271 = vst [vmem:[#allocation120_spill] sm:$0xff] %v3203_v59  ;;  %5272 = vst [vmem:[#allocation19_spill] sm:$0xff] %v3205_v32  ;;  %v5275_v42 = vld [vmem:[#allocation121_spill] sm:$0xff]  ;;  %v5278_v16 = vld [vmem:[#allocation24_spill] sm:$0xff] }
 0x12a   :  { %v5276_v61 = vsub.f32 %v5274_v60, %v5275_v42  ;;  %v3220_v39 = vld [vmem:[#allocation2 + $0x788] sm:$0xff]  ;;  %v3222_v13 = vld [vmem:[#allocation5 + $0x780] sm:$0xff]  ;;  %v1065_v60 = vadd.f32 %v1064_v11, %v2274_v15  ;;  %v5280_v27 = vld [vmem:[#allocation110_spill] sm:$0xff] }
 0x12b   :  { %5268 = vst [vmem:[#allocation108_spill] sm:$0xff] %v3199_v34  ;;  %v5279_v34 = vld [vmem:[#allocation11_spill] sm:$0xff]  ;;  %v3224_v8 = vld [vmem:[#allocation5 + $0x788] sm:$0xff]  ;;  %v5281_v6 = vld [vmem:[#allocation122_spill] sm:$0xff] }
 0x12c   :  { %v3216_v56 = vand.u32 2147483647, %v5276_v61  ;;  %v1079_v26 = vadd.f32 %v5279_v34, %v5278_v16  ;;  %v3233_v61 = vld [vmem:[#allocation2 + $0x790] sm:$0xff]  ;;  %v5282_v31 = vsub.f32 %v5280_v27, %v5281_v6  ;;  %v3247_v42 = vld [vmem:[#allocation2 + $0x798] sm:$0xff]  ;;  %v3262_v6 = vld [vmem:[#allocation2 + $0x7a0] sm:$0xff] }
 0x12d   :  { %v3235_v34 = vld [vmem:[#allocation5 + $0x790] sm:$0xff]  ;;  %5284 = vst [vmem:[#allocation24_spill] sm:$0xff] %v3247_v42  ;;  %v3249_v15 = vld [vmem:[#allocation5 + $0x798] sm:$0xff]  ;;  %v5296_v1 = vld [vmem:[#allocation115_spill] sm:$0xff] }
 0x12e   :  { %5277 = vst [vmem:[#allocation109_spill] sm:$0xff] %v3216_v56  ;;  %v3244_v54 = vand.u32 2147483647, %v5282_v31  ;;  %v1080_v46 = vadd.f32 %v1079_v26, %v2297_v23  ;;  %5285 = vst [vmem:[#allocation11_spill] sm:$0xff] %v3249_v15  ;;  %v5286_v18 = vld [vmem:[#allocation17_spill] sm:$0xff]  ;;  %v3264_v23 = vld [vmem:[#allocation5 + $0x7a0] sm:$0xff]  ;;  %v1066_v56 = vadd.f32 %v1065_v60, %v2642_v21 }
 0x12f   :  { %v5287_v38 = vld [vmem:[#allocation125_spill] sm:$0xff]  ;;  %5290 = vst [vmem:[#allocation122_spill] sm:$0xff] %v3264_v23  ;;  %v5291_v59 = vld [vmem:[#allocation114_spill] sm:$0xff]  ;;  %v5297_v3 = vld [vmem:[#allocation127_spill] sm:$0xff] }
 0x130   :  { %5283 = vst [vmem:[#allocation121_spill] sm:$0xff] %v3244_v54  ;;  %v5288_v27 = vsub.f32 %v5286_v18, %v5287_v38  ;;  %v5292_v16 = vld [vmem:[#allocation126_spill] sm:$0xff]  ;;  %v3276_v38 = vld [vmem:[#allocation2 + $0x7a8] sm:$0xff]  ;;  %v5298_v26 = vsub.f32 %v5296_v1, %v5297_v3  ;;  %v3293_v21 = vld [vmem:[#allocation2 + $0x7b0] sm:$0xff] }
 0x131   :  { %v5293_v32 = vsub.f32 %v5291_v59, %v5292_v16  ;;  %v3278_v18 = vld [vmem:[#allocation5 + $0x7a8] sm:$0xff]  ;;  %v5300_v11 = vld [vmem:[#allocation130_spill] sm:$0xff]  ;;  %5303 = vst [vmem:[#allocation115_spill] sm:$0xff] %v3293_v21  ;;  %v3295_v60 = vld [vmem:[#allocation5 + $0x7b0] sm:$0xff] }
 0x132   :  { %v3260_v31 = vand.u32 2147483647, %v5288_v27  ;;  %5295 = vst [vmem:[#allocation125_spill] sm:$0xff] %v3278_v18  ;;  %v5301_v48 = vsub.f32 %v1954_v50, %v5300_v11  ;;  %5304 = vst [vmem:[#allocation127_spill] sm:$0xff] %v3295_v60  ;;  %v5305_v27 = vld [vmem:[#allocation18_spill] sm:$0xff]  ;;  %v5308_v1 = vld [vmem:[#allocation119_spill] sm:$0xff] }
 0x133   :  { %v3273_v35 = vand.u32 2147483647, %v5293_v32  ;;  %v1081_v32 = vadd.f32 %v1080_v46, %v2665_v33  ;;  %v5311_v50 = vld [vmem:[#allocation134_spill] sm:$0xff]  ;;  %v5313_v46 = vld [vmem:[#allocation123_spill] sm:$0xff]  ;;  %v5316_v15 = vld [vmem:[#allocation124_spill] sm:$0xff] }
 0x134   :  { %5289 = vst [vmem:[#allocation110_spill] sm:$0xff] %v3260_v31  ;;  %v3285_v31 = vand.u32 2147483647, %v5298_v26  ;;  %v3290_v59 = vand.u32 2147483647, %v5301_v48  ;;  %v5309_v26 = vld [vmem:[#allocation132_spill] sm:$0xff]  ;;  %v5312_v48 = vsub.f32 %v1977_v36, %v5311_v50 }
 0x135   :  { %5294 = vst [vmem:[#allocation17_spill] sm:$0xff] %v3273_v35  ;;  %v5306_v35 = vld [vmem:[#allocation131_spill] sm:$0xff]  ;;  %v5324_v36 = vld [vmem:[#allocation128_spill] sm:$0xff]  ;;  %v5325_v50 = vld [vmem:[#allocation141_spill] sm:$0xff] }
 0x136   :  { %5299 = vst [vmem:[#allocation114_spill] sm:$0xff] %v3285_v31  ;;  %5302 = vst [vmem:[#allocation126_spill] sm:$0xff] %v3290_v59  ;;  %v5307_v54 = vsub.f32 %v5305_v27, %v5306_v35  ;;  %v5310_v31 = vsub.f32 %v5308_v1, %v5309_v26  ;;  %v3308_v11 = vand.u32 2147483647, %v5312_v48  ;;  %v5314_v59 = vld [vmem:[#allocation135_spill] sm:$0xff]  ;;  %v5317_v35 = vld [vmem:[#allocation136_spill] sm:$0xff]  ;;  %v5326_v48 = vsub.f32 %v5324_v36, %v5325_v50 }
 0x137   :  { %v5315_v9 = vsub.f32 %v5313_v46, %v5314_v59  ;;  %v5320_v1 = vld [vmem:[#allocation22_spill] sm:$0xff]  ;;  %v5328_v33 = vld [vmem:[#allocation129_spill] sm:$0xff]  ;;  %v5387_v60 = vld [vmem:[#allocation28_spill] sm:$0xff] }
 0x138   :  { %v888_v3 = vand.u32 2147483647, %v5307_v54  ;;  %v889_v37 = vand.u32 2147483647, %v5310_v31  ;;  %v5318_v54 = vsub.f32 %v5316_v15, %v5317_v35  ;;  %v5321_v31 = vld [vmem:[#allocation140_spill] sm:$0xff]  ;;  %v5329_v23 = vld [vmem:[#allocation142_spill] sm:$0xff] }
 0x139   :  { %v3315_v16 = vand.u32 2147483647, %v5315_v9  ;;  %v5322_v26 = vsub.f32 %v5320_v1, %v5321_v31  ;;  %v3330_v12 = vand.u32 2147483647, %v5326_v48  ;;  %v5330_v59 = vsub.f32 %v5328_v33, %v5329_v23  ;;  %v5332_v46 = vld [vmem:[#allocation145_spill] sm:$0xff]  ;;  %v3343_v1 = vld [vmem:[#allocation2 + $0x7b8] sm:$0xff] }
 0x13a   :  { %v3320_v27 = vand.u32 2147483647, %v5318_v54  ;;  %v5333_v15 = vsub.f32 %v2023_v57, %v5332_v46  ;;  %v1067_v54 = vadd.f32 %v1066_v56, %v3010_v63  ;;  %5335 = vst [vmem:[#allocation134_spill] sm:$0xff] %v3343_v1  ;;  %v3345_v31 = vld [vmem:[#allocation5 + $0x7b8] sm:$0xff]  ;;  %v5342_v23 = vld [vmem:[#allocation147_spill] sm:$0xff]  ;;  %v5345_v57 = vld [vmem:[#allocation149_spill] sm:$0xff]  ;;  %v1082_v63 = vadd.f32 %v1081_v32, %v3033_v10 }
 0x13b   :  { %v3325_v42 = vand.u32 2147483647, %v5322_v26  ;;  %5327 = vst [vmem:[#allocation131_spill] sm:$0xff] %v3330_v12  ;;  %v3335_v9 = vand.u32 2147483647, %v5330_v59  ;;  %5336 = vst [vmem:[#allocation123_spill] sm:$0xff] %v3345_v31  ;;  %v5346_v46 = vsub.f32 %v2046_v43, %v5345_v57 }
 0x13c   :  { %5319 = vst [vmem:[#allocation130_spill] sm:$0xff] %v3320_v27  ;;  %v3340_v35 = vand.u32 2147483647, %v5333_v15  ;;  %v5337_v26 = vld [vmem:[#allocation23_spill] sm:$0xff]  ;;  %v5338_v36 = vld [vmem:[#allocation146_spill] sm:$0xff]  ;;  %v5341_v12 = vld [vmem:[#allocation133_spill] sm:$0xff] }
 0x13d   :  { %5323 = vst [vmem:[#allocation18_spill] sm:$0xff] %v3325_v42  ;;  %5331 = vst [vmem:[#allocation119_spill] sm:$0xff] %v3335_v9  ;;  %v5339_v50 = vsub.f32 %v5337_v26, %v5338_v36  ;;  %v5343_v33 = vsub.f32 %v5341_v12, %v5342_v23  ;;  %v3360_v15 = vand.u32 2147483647, %v5346_v46  ;;  %v5349_v9 = vld [vmem:[#allocation150_spill] sm:$0xff]  ;;  %v5360_v32 = vld [vmem:[#allocation143_spill] sm:$0xff] }
 0x13e   :  { %5334 = vst [vmem:[#allocation132_spill] sm:$0xff] %v3340_v35  ;;  %v5348_v35 = vld [vmem:[#allocation138_spill] sm:$0xff]  ;;  %v5361_v46 = vld [vmem:[#allocation156_spill] sm:$0xff]  ;;  %v5373_v10 = vld [vmem:[#allocation163_spill] sm:$0xff] }
 0x13f   :  { %v3350_v48 = vand.u32 2147483647, %v5339_v50  ;;  %v3355_v59 = vand.u32 2147483647, %v5343_v33  ;;  %5347 = vst [vmem:[#allocation136_spill] sm:$0xff] %v3360_v15  ;;  %v5350_v26 = vsub.f32 %v5348_v35, %v5349_v9  ;;  %v5352_v50 = vld [vmem:[#allocation139_spill] sm:$0xff]  ;;  %v5362_v56 = vsub.f32 %v5360_v32, %v5361_v46 }
 0x140   :  { %v5356_v33 = vld [vmem:[#allocation26_spill] sm:$0xff]  ;;  %v5364_v9 = vld [vmem:[#allocation144_spill] sm:$0xff]  ;;  %v5365_v35 = vld [vmem:[#allocation157_spill] sm:$0xff] }
 0x141   :  { %5340 = vst [vmem:[#allocation135_spill] sm:$0xff] %v3350_v48  ;;  %5344 = vst [vmem:[#allocation124_spill] sm:$0xff] %v3355_v59  ;;  %v3368_v36 = vand.u32 2147483647, %v5350_v26  ;;  %v5353_v48 = vld [vmem:[#allocation151_spill] sm:$0xff]  ;;  %v5366_v26 = vsub.f32 %v5364_v9, %v5365_v35  ;;  %v5376_v32 = vld [vmem:[#allocation166_spill] sm:$0xff]  ;;  %v1068_v9 = vadd.f32 %v1067_v54, %v888_v3 }
 0x142   :  { %v5354_v12 = vsub.f32 %v5352_v50, %v5353_v48  ;;  %v5357_v59 = vld [vmem:[#allocation155_spill] sm:$0xff]  ;;  %v3385_v15 = vand.u32 2147483647, %v5362_v56  ;;  %v5367_v48 = vld [vmem:[#allocation161_spill] sm:$0xff]  ;;  %v5375_v56 = vld [vmem:[#allocation152_spill] sm:$0xff] }
 0x143   :  { %5351 = vst [vmem:[#allocation22_spill] sm:$0xff] %v3368_v36  ;;  %v5358_v43 = vsub.f32 %v5356_v33, %v5357_v59  ;;  %v904_v36 = vand.u32 2147483647, %v5366_v26  ;;  %v5368_v50 = vsub.f32 %v2092_v58, %v5367_v48  ;;  %v5370_v59 = vld [vmem:[#allocation162_spill] sm:$0xff]  ;;  %v5377_v46 = vsub.f32 %v5375_v56, %v5376_v32  ;;  %v3408_v35 = vld [vmem:[#allocation2 + $0x7c0] sm:$0xff]  ;;  %v5379_v26 = vld [vmem:[#allocation153_spill] sm:$0xff] }
 0x144   :  { %v3373_v23 = vand.u32 2147483647, %v5354_v12  ;;  %5363 = vst [vmem:[#allocation141_spill] sm:$0xff] %v3385_v15  ;;  %v3410_v58 = vld [vmem:[#allocation5 + $0x7c0] sm:$0xff]  ;;  %v5388_v56 = vld [vmem:[#allocation12_spill] sm:$0xff]  ;;  %v5389_v54 = vld [vmem:[#allocation158_spill] sm:$0xff] }
 0x145   :  { %v3378_v57 = vand.u32 2147483647, %v5358_v43  ;;  %v905_v12 = vand.u32 2147483647, %v5368_v50  ;;  %v3406_v15 = vand.u32 2147483647, %v5377_v46  ;;  %v1094_v32 = vadd.f32 %v5388_v56, %v5387_v60 }
 0x146   :  { %5355 = vst [vmem:[#allocation140_spill] sm:$0xff] %v3373_v23  ;;  %v5369_v23 = vld [vmem:[#allocation27_spill] sm:$0xff]  ;;  %v5402_v60 = vld [vmem:[#allocation177_spill] sm:$0xff]  ;;  %v5405_v3 = vld [vmem:[#allocation164_spill] sm:$0xff] }
 0x147   :  { %5359 = vst [vmem:[#allocation128_spill] sm:$0xff] %v3378_v57  ;;  %v5371_v33 = vsub.f32 %v5369_v23, %v5370_v59  ;;  %v5372_v57 = vld [vmem:[#allocation148_spill] sm:$0xff]  ;;  %5378 = vst [vmem:[#allocation129_spill] sm:$0xff] %v3406_v15  ;;  %v5380_v48 = vld [vmem:[#allocation167_spill] sm:$0xff] }
 0x148   :  { %v5374_v42 = vsub.f32 %v5372_v57, %v5373_v10  ;;  %v5381_v23 = vsub.f32 %v5379_v26, %v5380_v48  ;;  %v5383_v59 = vld [vmem:[#allocation154_spill] sm:$0xff]  ;;  %v1083_v10 = vadd.f32 %v1082_v63, %v889_v37  ;;  %v5390_v46 = vld [vmem:[#allocation171_spill] sm:$0xff]  ;;  %v5394_v48 = vld [vmem:[#allocation172_spill] sm:$0xff] }
 0x149   :  { %v3396_v43 = vand.u32 2147483647, %v5371_v33  ;;  %v5384_v33 = vld [vmem:[#allocation168_spill] sm:$0xff]  ;;  %v5391_v15 = vsub.f32 %v5389_v54, %v5390_v46  ;;  %v5393_v26 = vld [vmem:[#allocation159_spill] sm:$0xff]  ;;  %v5406_v31 = vld [vmem:[#allocation178_spill] sm:$0xff] }
 0x14a   :  { %v3401_v27 = vand.u32 2147483647, %v5374_v42  ;;  %v3415_v50 = vand.u32 2147483647, %v5381_v23  ;;  %v5385_v57 = vsub.f32 %v5383_v59, %v5384_v33  ;;  %v5395_v23 = vsub.f32 %v5393_v26, %v5394_v48  ;;  %v5397_v59 = vld [vmem:[#allocation160_spill] sm:$0xff]  ;;  %v5398_v33 = vld [vmem:[#allocation173_spill] sm:$0xff] }
 0x14b   :  { %v3429_v21 = vand.u32 2147483647, %v5391_v15  ;;  %v5401_v63 = vld [vmem:[#allocation32_spill] sm:$0xff]  ;;  %v5407_v54 = vsub.f32 %v5405_v3, %v5406_v31  ;;  %v5409_v46 = vld [vmem:[#allocation165_spill] sm:$0xff]  ;;  %v5422_v31 = vld [vmem:[#allocation174_spill] sm:$0xff] }
 0x14c   :  { %5382 = vst [vmem:[#allocation142_spill] sm:$0xff] %v3415_v50  ;;  %v3420_v42 = vand.u32 2147483647, %v5385_v57  ;;  %v3434_v50 = vand.u32 2147483647, %v5395_v23  ;;  %v5399_v57 = vsub.f32 %v5397_v59, %v5398_v33  ;;  %v5403_v56 = vsub.f32 %v5401_v63, %v5402_v60  ;;  %v5413_v23 = vld [vmem:[#allocation33_spill] sm:$0xff] }
 0x14d   :  { %5392 = vst [vmem:[#allocation23_spill] sm:$0xff] %v3429_v21  ;;  %v3449_v15 = vand.u32 2147483647, %v5407_v54  ;;  %v5410_v21 = vld [vmem:[#allocation179_spill] sm:$0xff]  ;;  %v5415_v33 = vld [vmem:[#allocation181_spill] sm:$0xff]  ;;  %v5419_v60 = vld [vmem:[#allocation182_spill] sm:$0xff] }
 0x14e   :  { %5386 = vst [vmem:[#allocation145_spill] sm:$0xff] %v3420_v42  ;;  %5396 = vst [vmem:[#allocation146_spill] sm:$0xff] %v3434_v50  ;;  %v3439_v37 = vand.u32 2147483647, %v5399_v57  ;;  %v3444_v42 = vand.u32 2147483647, %v5403_v56  ;;  %v5411_v26 = vsub.f32 %v5409_v46, %v5410_v21  ;;  %v5416_v57 = vsub.f32 %v2184_v44, %v5415_v33 }
 0x14f   :  { %5408 = vst [vmem:[#allocation149_spill] sm:$0xff] %v3449_v15  ;;  %v5414_v50 = vld [vmem:[#allocation21_spill] sm:$0xff]  ;;  %v5423_v3 = vld [vmem:[#allocation186_spill] sm:$0xff]  ;;  %v1069_v21 = vadd.f32 %v1068_v9, %v904_v36  ;;  %v5436_v36 = vld [vmem:[#allocation191_spill] sm:$0xff] }
 0x150   :  { %5400 = vst [vmem:[#allocation133_spill] sm:$0xff] %v3439_v37  ;;  %5404 = vst [vmem:[#allocation147_spill] sm:$0xff] %v3444_v42  ;;  %v3454_v48 = vand.u32 2147483647, %v5411_v26  ;;  %v1109_v59 = vadd.f32 %v5414_v50, %v5413_v23  ;;  %v3461_v37 = vand.u32 2147483647, %v5416_v57  ;;  %v5424_v54 = vsub.f32 %v5422_v31, %v5423_v3 }
 0x151   :  { %v5418_v63 = vld [vmem:[#allocation169_spill] sm:$0xff]  ;;  %v5425_v46 = vld [vmem:[#allocation170_spill] sm:$0xff]  ;;  %v5426_v26 = vld [vmem:[#allocation183_spill] sm:$0xff]  ;;  %v1084_v57 = vadd.f32 %v1083_v10, %v905_v12  ;;  %v5437_v9 = vsub.f32 %v2230_v62, %v5436_v36 }
 0x152   :  { %5412 = vst [vmem:[#allocation138_spill] sm:$0xff] %v3454_v48  ;;  %5417 = vst [vmem:[#allocation150_spill] sm:$0xff] %v3461_v37  ;;  %v5420_v56 = vsub.f32 %v5418_v63, %v5419_v60  ;;  %v920_v15 = vand.u32 2147483647, %v5424_v54  ;;  %v5427_v48 = vsub.f32 %v5425_v46, %v5426_v26  ;;  %v5429_v50 = vld [vmem:[#allocation175_spill] sm:$0xff]  ;;  %v5432_v37 = vld [vmem:[#allocation45_spill] sm:$0xff] }
 0x153   :  { %v5430_v23 = vld [vmem:[#allocation187_spill] sm:$0xff]  ;;  %v1095_v18 = vadd.f32 %v1094_v32, %v5432_v37  ;;  %v5433_v60 = vld [vmem:[#allocation176_spill] sm:$0xff]  ;;  %v3488_v54 = vand.u32 2147483647, %v5437_v9  ;;  %v5442_v10 = vld [vmem:[#allocation193_spill] sm:$0xff] }
 0x154   :  { %v3466_v42 = vand.u32 2147483647, %v5420_v56  ;;  %v3474_v1 = vand.u32 2147483647, %v5427_v48  ;;  %v5431_v44 = vsub.f32 %v5429_v50, %v5430_v23  ;;  %v5434_v56 = vld [vmem:[#allocation188_spill] sm:$0xff]  ;;  %v5438_v48 = vld [vmem:[#allocation37_spill] sm:$0xff] }
 0x155   :  { %v5435_v31 = vsub.f32 %v5433_v60, %v5434_v56  ;;  %v5439_v46 = vld [vmem:[#allocation192_spill] sm:$0xff]  ;;  %v5445_v23 = vld [vmem:[#allocation195_spill] sm:$0xff]  ;;  %v1096_v56 = vadd.f32 %v1095_v18, %v2688_v49  ;;  %v5448_v62 = vld [vmem:[#allocation46_spill] sm:$0xff] }
 0x156   :  { %5421 = vst [vmem:[#allocation139_spill] sm:$0xff] %v3466_v42  ;;  %5428 = vst [vmem:[#allocation151_spill] sm:$0xff] %v3474_v1  ;;  %v921_v33 = vand.u32 2147483647, %v5431_v44  ;;  %v5440_v26 = vsub.f32 %v5438_v48, %v5439_v46  ;;  %v5441_v12 = vld [vmem:[#allocation180_spill] sm:$0xff]  ;;  %v5446_v44 = vsub.f32 %v2253_v40, %v5445_v23  ;;  %v5453_v46 = vld [vmem:[#allocation185_spill] sm:$0xff] }
 0x157   :  { %v922_v3 = vand.u32 2147483647, %v5435_v31  ;;  %v5443_v32 = vsub.f32 %v5441_v12, %v5442_v10  ;;  %v1110_v31 = vadd.f32 %v1109_v59, %v5448_v62  ;;  %v5449_v36 = vld [vmem:[#allocation184_spill] sm:$0xff]  ;;  %v5457_v10 = vsub.f32 %v2324_v25, %v2376_v20  ;;  %v5458_v18 = vld [vmem:[#allocation41_spill] sm:$0xff] }
 0x158   :  { %v3493_v50 = vand.u32 2147483647, %v5440_v26  ;;  %v3503_v60 = vand.u32 2147483647, %v5446_v44  ;;  %v5450_v9 = vld [vmem:[#allocation196_spill] sm:$0xff]  ;;  %v5454_v26 = vld [vmem:[#allocation197_spill] sm:$0xff]  ;;  %v1085_v20 = vadd.f32 %v1084_v57, %v921_v33 }
 0x159   :  { %v3498_v37 = vand.u32 2147483647, %v5443_v32  ;;  %v5451_v63 = vsub.f32 %v5449_v36, %v5450_v9  ;;  %v5455_v1 = vsub.f32 %v5453_v46, %v5454_v26  ;;  %v936_v40 = vand.u32 2147483647, %v5457_v10  ;;  %v3520_v23 = vld [vmem:[#allocation2 + $0x7c8] sm:$0xff]  ;;  %v5463_v36 = vld [vmem:[#allocation201_spill] sm:$0xff] }
 0x15a   :  { %5447 = vst [vmem:[#allocation155_spill] sm:$0xff] %v3503_v60  ;;  %v1070_v32 = vadd.f32 %v1069_v21, %v920_v15  ;;  %v3522_v49 = vld [vmem:[#allocation5 + $0x7c8] sm:$0xff]  ;;  %v5467_v26 = vld [vmem:[#allocation211_spill] sm:$0xff]  ;;  %v5469_v15 = vld [vmem:[#allocation190_spill] sm:$0xff] }
 0x15b   :  { %5444 = vst [vmem:[#allocation26_spill] sm:$0xff] %v3498_v37  ;;  %v3510_v48 = vand.u32 2147483647, %v5451_v63  ;;  %v3515_v12 = vand.u32 2147483647, %v5455_v1  ;;  %v5459_v59 = vld [vmem:[#allocation200_spill] sm:$0xff] }
 0x15c   :  { %v5460_v44 = vsub.f32 %v5458_v18, %v5459_v59  ;;  %v5462_v63 = vld [vmem:[#allocation189_spill] sm:$0xff]  ;;  %v5466_v1 = vld [vmem:[#allocation199_spill] sm:$0xff]  ;;  %v5470_v21 = vld [vmem:[#allocation202_spill] sm:$0xff] }
 0x15d   :  { %5452 = vst [vmem:[#allocation143_spill] sm:$0xff] %v3510_v48  ;;  %5456 = vst [vmem:[#allocation156_spill] sm:$0xff] %v3515_v12  ;;  %v5464_v9 = vsub.f32 %v5462_v63, %v5463_v36  ;;  %v5468_v42 = vsub.f32 %v5466_v1, %v5467_v26  ;;  %v5471_v10 = vsub.f32 %v5469_v15, %v5470_v21  ;;  %v5473_v48 = vld [vmem:[#allocation29_spill] sm:$0xff]  ;;  %v5474_v60 = vld [vmem:[#allocation206_spill] sm:$0xff] }
 0x15e   :  { %v3527_v62 = vand.u32 2147483647, %v5460_v44  ;;  %v5475_v18 = vsub.f32 %v5473_v48, %v5474_v60  ;;  %v5477_v44 = vld [vmem:[#allocation42_spill] sm:$0xff]  ;;  %v5481_v1 = vld [vmem:[#allocation203_spill] sm:$0xff]  ;;  %v5484_v26 = vld [vmem:[#allocation204_spill] sm:$0xff] }
 0x15f   :  { %v3532_v46 = vand.u32 2147483647, %v5464_v9  ;;  %v937_v25 = vand.u32 2147483647, %v5468_v42  ;;  %v3540_v12 = vand.u32 2147483647, %v5471_v10  ;;  %v1097_v9 = vadd.f32 %v1096_v56, %v3056_v14 }
 0x160   :  { %5461 = vst [vmem:[#allocation144_spill] sm:$0xff] %v3527_v62  ;;  %v3545_v59 = vand.u32 2147483647, %v5475_v18  ;;  %v5478_v62 = vld [vmem:[#allocation207_spill] sm:$0xff]  ;;  %v5485_v15 = vld [vmem:[#allocation216_spill] sm:$0xff]  ;;  %v5488_v60 = vld [vmem:[#allocation217_spill] sm:$0xff] }
 0x161   :  { %5465 = vst [vmem:[#allocation157_spill] sm:$0xff] %v3532_v46  ;;  %5472 = vst [vmem:[#allocation161_spill] sm:$0xff] %v3540_v12  ;;  %v5479_v63 = vsub.f32 %v5477_v44, %v5478_v62  ;;  %v5482_v42 = vld [vmem:[#allocation215_spill] sm:$0xff]  ;;  %v5486_v21 = vsub.f32 %v5484_v26, %v5485_v15  ;;  %v5487_v12 = vld [vmem:[#allocation205_spill] sm:$0xff]  ;;  %v1111_v62 = vadd.f32 %v1110_v31, %v2711_v52 }
 0x162   :  { %5476 = vst [vmem:[#allocation27_spill] sm:$0xff] %v3545_v59  ;;  %v5483_v33 = vsub.f32 %v5481_v1, %v5482_v42  ;;  %v5489_v48 = vsub.f32 %v5487_v12, %v5488_v60  ;;  %v5490_v44 = vld [vmem:[#allocation221_spill] sm:$0xff]  ;;  %v5493_v56 = vld [vmem:[#allocation239_spill] sm:$0xff]  ;;  %v1098_v26 = vadd.f32 %v1097_v9, %v3308_v11  ;;  %v5636_v37 = vld [vmem:[#allocation308_spill] sm:$0xff] }
 0x163   :  { %v3550_v36 = vand.u32 2147483647, %v5479_v63  ;;  %v3559_v10 = vand.u32 2147483647, %v5486_v21  ;;  %v5491_v63 = vsub.f32 %v2368_v4, %v5490_v44  ;;  %v5494_v1 = vsub.f32 %v2441_v17, %v5493_v56  ;;  %v5495_v15 = vld [vmem:[#allocation47_spill] sm:$0xff]  ;;  %v5496_v21 = vld [vmem:[#allocation222_spill] sm:$0xff] }
 0x164   :  { %v938_v57 = vand.u32 2147483647, %v5483_v33  ;;  %v3564_v18 = vand.u32 2147483647, %v5489_v48  ;;  %v1071_v33 = vadd.f32 %v1070_v32, %v936_v40  ;;  %v5499_v60 = vld [vmem:[#allocation209_spill] sm:$0xff]  ;;  %v5500_v48 = vld [vmem:[#allocation223_spill] sm:$0xff] }
 0x165   :  { %5480 = vst [vmem:[#allocation162_spill] sm:$0xff] %v3550_v36  ;;  %v3570_v14 = vand.u32 2147483647, %v5491_v63  ;;  %v952_v42 = vand.u32 2147483647, %v5494_v1  ;;  %v5497_v36 = vsub.f32 %v5495_v15, %v5496_v21  ;;  %v5501_v52 = vsub.f32 %v5499_v60, %v5500_v48  ;;  %v5503_v4 = vld [vmem:[#allocation228_spill] sm:$0xff] }
 0x166   :  { %v5504_v44 = vld [vmem:[#allocation242_spill] sm:$0xff]  ;;  %v5506_v40 = vld [vmem:[#allocation212_spill] sm:$0xff]  ;;  %v5507_v11 = vld [vmem:[#allocation225_spill] sm:$0xff] }
 0x167   :  { %5492 = vst [vmem:[#allocation148_spill] sm:$0xff] %v3570_v14  ;;  %v3579_v12 = vand.u32 2147483647, %v5497_v36  ;;  %v3584_v31 = vand.u32 2147483647, %v5501_v52  ;;  %v5505_v63 = vsub.f32 %v5503_v4, %v5504_v44  ;;  %v1086_v14 = vadd.f32 %v1085_v20, %v937_v25  ;;  %v5510_v36 = vld [vmem:[#allocation213_spill] sm:$0xff] }
 0x168   :  { %v5508_v32 = vsub.f32 %v5506_v40, %v5507_v11  ;;  %v5511_v56 = vld [vmem:[#allocation226_spill] sm:$0xff]  ;;  %v5515_v60 = vld [vmem:[#allocation227_spill] sm:$0xff] }
 0x169   :  { %5498 = vst [vmem:[#allocation163_spill] sm:$0xff] %v3579_v12  ;;  %5502 = vst [vmem:[#allocation152_spill] sm:$0xff] %v3584_v31  ;;  %v953_v59 = vand.u32 2147483647, %v5505_v63  ;;  %v5512_v1 = vsub.f32 %v5510_v36, %v5511_v56  ;;  %v5514_v21 = vld [vmem:[#allocation214_spill] sm:$0xff]  ;;  %v5519_v25 = vld [vmem:[#allocation231_spill] sm:$0xff]  ;;  %v1112_v56 = vadd.f32 %v1111_v62, %v3079_v2 }
 0x16a   :  { %v3594_v9 = vand.u32 2147483647, %v5508_v32  ;;  %v5516_v48 = vsub.f32 %v5514_v21, %v5515_v60  ;;  %v5518_v4 = vld [vmem:[#allocation218_spill] sm:$0xff]  ;;  %v5522_v63 = vld [vmem:[#allocation229_spill] sm:$0xff]  ;;  %v5523_v17 = vld [vmem:[#allocation243_spill] sm:$0xff] }
 0x16b   :  { %v3599_v15 = vand.u32 2147483647, %v5512_v1  ;;  %v5520_v20 = vsub.f32 %v5518_v4, %v5519_v25  ;;  %v5524_v40 = vsub.f32 %v5522_v63, %v5523_v17  ;;  %v5525_v32 = vld [vmem:[#allocation230_spill] sm:$0xff]  ;;  %v5529_v21 = vld [vmem:[#allocation248_spill] sm:$0xff]  ;;  %v5533_v4 = vld [vmem:[#allocation271_spill] sm:$0xff]  ;;  %v1099_v17 = vadd.f32 %v1098_v26, %v3396_v43 }
 0x16c   :  { %5509 = vst [vmem:[#allocation166_spill] sm:$0xff] %v3594_v9  ;;  %v3604_v52 = vand.u32 2147483647, %v5516_v48  ;;  %v5526_v9 = vld [vmem:[#allocation244_spill] sm:$0xff]  ;;  %v5528_v1 = vld [vmem:[#allocation234_spill] sm:$0xff]  ;;  %v3629_v63 = vld [vmem:[#allocation2 + $0x7d0] sm:$0xff] }
 0x16d   :  { %5513 = vst [vmem:[#allocation153_spill] sm:$0xff] %v3599_v15  ;;  %v3609_v44 = vand.u32 2147483647, %v5520_v20  ;;  %v954_v11 = vand.u32 2147483647, %v5524_v40  ;;  %v5527_v31 = vsub.f32 %v5525_v32, %v5526_v9  ;;  %v5530_v60 = vsub.f32 %v5528_v1, %v5529_v21  ;;  %v3631_v40 = vld [vmem:[#allocation5 + $0x7d0] sm:$0xff] }
 0x16e   :  { %5517 = vst [vmem:[#allocation167_spill] sm:$0xff] %v3604_v52  ;;  %v5532_v52 = vld [vmem:[#allocation62_spill] sm:$0xff]  ;;  %v5536_v9 = vld [vmem:[#allocation249_spill] sm:$0xff]  ;;  %v5539_v62 = vld [vmem:[#allocation236_spill] sm:$0xff] }
 0x16f   :  { %5521 = vst [vmem:[#allocation154_spill] sm:$0xff] %v3609_v44  ;;  %v3617_v36 = vand.u32 2147483647, %v5527_v31  ;;  %v3623_v48 = vand.u32 2147483647, %v5530_v60  ;;  %v5534_v25 = vsub.f32 %v5532_v52, %v5533_v4  ;;  %v1072_v44 = vadd.f32 %v1071_v33, %v952_v42  ;;  %v5535_v31 = vld [vmem:[#allocation235_spill] sm:$0xff] }
 0x170   :  { %v5537_v32 = vsub.f32 %v5535_v31, %v5536_v9  ;;  %v5540_v1 = vld [vmem:[#allocation250_spill] sm:$0xff]  ;;  %v5543_v15 = vld [vmem:[#allocation257_spill] sm:$0xff]  ;;  %v5544_v52 = vld [vmem:[#allocation272_spill] sm:$0xff]  ;;  %v1087_v33 = vadd.f32 %v1086_v14, %v953_v59 }
 0x171   :  { %5531 = vst [vmem:[#allocation168_spill] sm:$0xff] %v3623_v48  ;;  %v968_v20 = vand.u32 2147483647, %v5534_v25  ;;  %v5541_v21 = vsub.f32 %v5539_v62, %v5540_v1  ;;  %v5545_v4 = vsub.f32 %v5543_v15, %v5544_v52  ;;  %v5546_v43 = vld [vmem:[#allocation57_spill] sm:$0xff]  ;;  %v5547_v26 = vld [vmem:[#allocation254_spill] sm:$0xff]  ;;  %v5550_v48 = vld [vmem:[#allocation240_spill] sm:$0xff] }
 0x172   :  { %v3636_v2 = vand.u32 2147483647, %v5537_v32  ;;  %v5548_v25 = vsub.f32 %v5546_v43, %v5547_v26  ;;  %v5551_v46 = vld [vmem:[#allocation255_spill] sm:$0xff]  ;;  %v5554_v32 = vld [vmem:[#allocation241_spill] sm:$0xff]  ;;  %v5562_v14 = vld [vmem:[#allocation246_spill] sm:$0xff] }
 0x173   :  { %v3641_v60 = vand.u32 2147483647, %v5541_v21  ;;  %v969_v42 = vand.u32 2147483647, %v5545_v4  ;;  %v5552_v31 = vsub.f32 %v5550_v48, %v5551_v46  ;;  %v1100_v21 = vadd.f32 %v1099_v17, %v922_v3  ;;  %v5559_v15 = vld [vmem:[#allocation259_spill] sm:$0xff]  ;;  %v5563_v4 = vld [vmem:[#allocation260_spill] sm:$0xff] }
 0x174   :  { %5538 = vst [vmem:[#allocation28_spill] sm:$0xff] %v3636_v2  ;;  %v3649_v12 = vand.u32 2147483647, %v5548_v25  ;;  %v5555_v2 = vld [vmem:[#allocation256_spill] sm:$0xff]  ;;  %v5564_v43 = vsub.f32 %v5562_v14, %v5563_v4  ;;  %v5566_v25 = vld [vmem:[#allocation258_spill] sm:$0xff]  ;;  %v5567_v46 = vld [vmem:[#allocation273_spill] sm:$0xff] }
 0x175   :  { %5542 = vst [vmem:[#allocation12_spill] sm:$0xff] %v3641_v60  ;;  %v3654_v9 = vand.u32 2147483647, %v5552_v31  ;;  %v5556_v62 = vsub.f32 %v5554_v32, %v5555_v2  ;;  %v5558_v60 = vld [vmem:[#allocation245_spill] sm:$0xff]  ;;  %v5568_v48 = vsub.f32 %v5566_v25, %v5567_v46  ;;  %v5569_v2 = vld [vmem:[#allocation262_spill] sm:$0xff]  ;;  %v5570_v32 = vld [vmem:[#allocation275_spill] sm:$0xff] }
 0x176   :  { %5549 = vst [vmem:[#allocation158_spill] sm:$0xff] %v3649_v12  ;;  %v5560_v52 = vsub.f32 %v5558_v60, %v5559_v15  ;;  %v3669_v26 = vand.u32 2147483647, %v5564_v43  ;;  %v5572_v17 = vld [vmem:[#allocation263_spill] sm:$0xff]  ;;  %v5573_v60 = vld [vmem:[#allocation276_spill] sm:$0xff]  ;;  %v5580_v25 = vld [vmem:[#allocation277_spill] sm:$0xff]  ;;  %v1101_v12 = vadd.f32 %v1100_v21, %v938_v57 }
 0x177   :  { %5553 = vst [vmem:[#allocation171_spill] sm:$0xff] %v3654_v9  ;;  %v3659_v1 = vand.u32 2147483647, %v5556_v62  ;;  %v970_v31 = vand.u32 2147483647, %v5568_v48  ;;  %v1113_v9 = vadd.f32 %v1112_v56, %v3315_v16  ;;  %v5571_v62 = vsub.f32 %v5569_v2, %v5570_v32  ;;  %v5577_v14 = vld [vmem:[#allocation296_spill] sm:$0xff] }
 0x178   :  { %v3664_v59 = vand.u32 2147483647, %v5560_v52  ;;  %5565 = vst [vmem:[#allocation160_spill] sm:$0xff] %v3669_v26  ;;  %v5574_v15 = vsub.f32 %v5572_v17, %v5573_v60  ;;  %v1073_v26 = vadd.f32 %v1072_v44, %v968_v20  ;;  %v5583_v16 = vld [vmem:[#allocation284_spill] sm:$0xff]  ;;  %v5584_v56 = vld [vmem:[#allocation297_spill] sm:$0xff] }
 0x179   :  { %5557 = vst [vmem:[#allocation159_spill] sm:$0xff] %v3659_v1  ;;  %v3678_v3 = vand.u32 2147483647, %v5571_v62  ;;  %v5579_v1 = vld [vmem:[#allocation264_spill] sm:$0xff]  ;;  %v5585_v2 = vsub.f32 %v5583_v16, %v5584_v56  ;;  %v1088_v62 = vadd.f32 %v1087_v33, %v969_v42  ;;  %v5590_v44 = vld [vmem:[#allocation269_spill] sm:$0xff]  ;;  %v5598_v42 = vld [vmem:[#allocation54_spill] sm:$0xff] }
 0x17a   :  { %5561 = vst [vmem:[#allocation172_spill] sm:$0xff] %v3664_v59  ;;  %v3683_v52 = vand.u32 2147483647, %v5574_v15  ;;  %v5576_v59 = vld [vmem:[#allocation283_spill] sm:$0xff]  ;;  %v5581_v46 = vsub.f32 %v5579_v1, %v5580_v25  ;;  %v5586_v60 = vld [vmem:[#allocation268_spill] sm:$0xff]  ;;  %v5591_v20 = vld [vmem:[#allocation281_spill] sm:$0xff] }
 0x17b   :  { %v5578_v4 = vsub.f32 %v5576_v59, %v5577_v14  ;;  %v985_v32 = vand.u32 2147483647, %v5585_v2  ;;  %v5587_v15 = vld [vmem:[#allocation280_spill] sm:$0xff]  ;;  %v5592_v14 = vsub.f32 %v5590_v44, %v5591_v20  ;;  %v5595_v25 = vld [vmem:[#allocation282_spill] sm:$0xff]  ;;  %v5599_v57 = vld [vmem:[#allocation285_spill] sm:$0xff]  ;;  %v1114_v44 = vadd.f32 %v1113_v9, %v3401_v27 }
 0x17c   :  { %5575 = vst [vmem:[#allocation173_spill] sm:$0xff] %v3683_v52  ;;  %v3691_v48 = vand.u32 2147483647, %v5581_v46  ;;  %v5588_v52 = vsub.f32 %v5586_v60, %v5587_v15  ;;  %v5600_v33 = vsub.f32 %v5598_v42, %v5599_v57  ;;  %v5602_v56 = vld [vmem:[#allocation67_spill] sm:$0xff]  ;;  %v5603_v2 = vld [vmem:[#allocation286_spill] sm:$0xff]  ;;  %v1102_v15 = vadd.f32 %v1101_v12, %v954_v11 }
 0x17d   :  { %v984_v43 = vand.u32 2147483647, %v5578_v4  ;;  %v3706_v1 = vand.u32 2147483647, %v5592_v14  ;;  %v5594_v4 = vld [vmem:[#allocation270_spill] sm:$0xff]  ;;  %v5604_v60 = vsub.f32 %v5602_v56, %v5603_v2  ;;  %v5607_v14 = vld [vmem:[#allocation287_spill] sm:$0xff] }
 0x17e   :  { %5582 = vst [vmem:[#allocation32_spill] sm:$0xff] %v3691_v48  ;;  %v3701_v59 = vand.u32 2147483647, %v5588_v52  ;;  %v5596_v46 = vsub.f32 %v5594_v4, %v5595_v25  ;;  %v3716_v21 = vand.u32 2147483647, %v5600_v33  ;;  %v5606_v20 = vld [vmem:[#allocation274_spill] sm:$0xff] }
 0x17f   :  { %5593 = vst [vmem:[#allocation164_spill] sm:$0xff] %v3706_v1  ;;  %v3721_v52 = vand.u32 2147483647, %v5604_v60  ;;  %v5608_v17 = vsub.f32 %v5606_v20, %v5607_v14  ;;  %v5610_v4 = vld [vmem:[#allocation59_spill] sm:$0xff]  ;;  %v5611_v25 = vld [vmem:[#allocation301_spill] sm:$0xff]  ;;  %v5613_v42 = vld [vmem:[#allocation310_spill] sm:$0xff] }
 0x180   :  { %5589 = vst [vmem:[#allocation177_spill] sm:$0xff] %v3701_v59  ;;  %v3711_v16 = vand.u32 2147483647, %v5596_v46  ;;  %5601 = vst [vmem:[#allocation165_spill] sm:$0xff] %v3716_v21  ;;  %v5612_v46 = vsub.f32 %v5610_v4, %v5611_v25  ;;  %v5614_v57 = vld [vmem:[#allocation323_spill] sm:$0xff]  ;;  %v1074_v59 = vadd.f32 %v1073_v26, %v984_v43  ;;  %v3735_v56 = vld [vmem:[#allocation2 + $0x7d8] sm:$0xff] }
 0x181   :  { %5605 = vst [vmem:[#allocation179_spill] sm:$0xff] %v3721_v52  ;;  %v3727_v1 = vand.u32 2147483647, %v5608_v17  ;;  %v5615_v33 = vsub.f32 %v5613_v42, %v5614_v57  ;;  %5616 = vst [vmem:[#allocation21_spill] sm:$0xff] %v3735_v56  ;;  %v3737_v2 = vld [vmem:[#allocation5 + $0x7d8] sm:$0xff]  ;;  %v5621_v17 = vld [vmem:[#allocation288_spill] sm:$0xff]  ;;  %v1089_v57 = vadd.f32 %v1088_v62, %v985_v32 }
 0x182   :  { %5597 = vst [vmem:[#allocation178_spill] sm:$0xff] %v3711_v16  ;;  %v986_v16 = vand.u32 2147483647, %v5612_v46  ;;  %5617 = vst [vmem:[#allocation181_spill] sm:$0xff] %v3737_v2  ;;  %v5618_v12 = vld [vmem:[#allocation74_spill] sm:$0xff]  ;;  %v5622_v60 = vld [vmem:[#allocation303_spill] sm:$0xff] }
 0x183   :  { %5609 = vst [vmem:[#allocation33_spill] sm:$0xff] %v3727_v1  ;;  %v1000_v21 = vand.u32 2147483647, %v5615_v33  ;;  %v5619_v27 = vld [vmem:[#allocation302_spill] sm:$0xff]  ;;  %v5623_v20 = vsub.f32 %v5621_v17, %v5622_v60  ;;  %v5628_v26 = vld [vmem:[#allocation292_spill] sm:$0xff]  ;;  %v5631_v52 = vld [vmem:[#allocation293_spill] sm:$0xff] }
 0x184   :  { %v5620_v11 = vsub.f32 %v5618_v12, %v5619_v27  ;;  %v5625_v4 = vld [vmem:[#allocation86_spill] sm:$0xff]  ;;  %v5632_v48 = vld [vmem:[#allocation307_spill] sm:$0xff] }
 0x185   :  { %v3747_v14 = vand.u32 2147483647, %v5623_v20  ;;  %v5626_v25 = vld [vmem:[#allocation326_spill] sm:$0xff]  ;;  %v5633_v12 = vsub.f32 %v5631_v52, %v5632_v48  ;;  %v1103_v20 = vadd.f32 %v1102_v15, %v970_v31  ;;  %v5643_v62 = vld [vmem:[#allocation299_spill] sm:$0xff]  ;;  %v5648_v48 = vld [vmem:[#allocation313_spill] sm:$0xff] }
 0x186   :  { %v3742_v9 = vand.u32 2147483647, %v5620_v11  ;;  %v5627_v46 = vsub.f32 %v5625_v4, %v5626_v25  ;;  %v5629_v43 = vld [vmem:[#allocation306_spill] sm:$0xff]  ;;  %v5640_v4 = vld [vmem:[#allocation311_spill] sm:$0xff] }
 0x187   :  { %5624 = vst [vmem:[#allocation169_spill] sm:$0xff] %v3747_v14  ;;  %v5630_v33 = vsub.f32 %v5628_v26, %v5629_v43  ;;  %v3760_v27 = vand.u32 2147483647, %v5633_v12  ;;  %v5635_v11 = vld [vmem:[#allocation294_spill] sm:$0xff] }
 0x188   :  { %v1001_v42 = vand.u32 2147483647, %v5627_v46  ;;  %v5637_v17 = vsub.f32 %v5635_v11, %v5636_v37  ;;  %v5639_v14 = vld [vmem:[#allocation298_spill] sm:$0xff]  ;;  %v5644_v46 = vld [vmem:[#allocation312_spill] sm:$0xff]  ;;  %v1115_v37 = vadd.f32 %v1114_v44, %v3488_v54  ;;  %v5665_v44 = vld [vmem:[#allocation351_spill] sm:$0xff] }
 0x189   :  { %v3755_v1 = vand.u32 2147483647, %v5630_v33  ;;  %5634 = vst [vmem:[#allocation182_spill] sm:$0xff] %v3760_v27  ;;  %v5641_v25 = vsub.f32 %v5639_v14, %v5640_v4  ;;  %v5645_v26 = vsub.f32 %v5643_v62, %v5644_v46  ;;  %v5647_v33 = vld [vmem:[#allocation300_spill] sm:$0xff]  ;;  %v5651_v11 = vld [vmem:[#allocation314_spill] sm:$0xff]  ;;  %v1104_v27 = vadd.f32 %v1103_v20, %v986_v16  ;;  %v5657_v62 = vld [vmem:[#allocation81_spill] sm:$0xff] }
 0x18a   :  { %v3765_v60 = vand.u32 2147483647, %v5637_v17  ;;  %v5649_v52 = vsub.f32 %v5647_v33, %v5648_v48  ;;  %v5652_v17 = vld [vmem:[#allocation327_spill] sm:$0xff]  ;;  %v5655_v14 = vld [vmem:[#allocation350_spill] sm:$0xff]  ;;  %v5658_v46 = vld [vmem:[#allocation316_spill] sm:$0xff] }
 0x18b   :  { %v3770_v32 = vand.u32 2147483647, %v5641_v25  ;;  %v3775_v43 = vand.u32 2147483647, %v5645_v26  ;;  %v5653_v31 = vsub.f32 %v5651_v11, %v5652_v17  ;;  %v5659_v26 = vsub.f32 %v5657_v62, %v5658_v46  ;;  %v5661_v33 = vld [vmem:[#allocation315_spill] sm:$0xff]  ;;  %v5662_v48 = vld [vmem:[#allocation328_spill] sm:$0xff] }
 0x18c   :  { %5638 = vst [vmem:[#allocation174_spill] sm:$0xff] %v3765_v60  ;;  %v3780_v12 = vand.u32 2147483647, %v5649_v52  ;;  %v5654_v60 = vld [vmem:[#allocation339_spill] sm:$0xff]  ;;  %v5663_v52 = vsub.f32 %v5661_v33, %v5662_v48  ;;  %v5664_v54 = vld [vmem:[#allocation340_spill] sm:$0xff] }
 0x18d   :  { %5642 = vst [vmem:[#allocation186_spill] sm:$0xff] %v3770_v32  ;;  %5646 = vst [vmem:[#allocation170_spill] sm:$0xff] %v3775_v43  ;;  %v1002_v15 = vand.u32 2147483647, %v5653_v31  ;;  %v5656_v4 = vsub.f32 %v5654_v60, %v5655_v14  ;;  %v1075_v32 = vadd.f32 %v1074_v59, %v1000_v21  ;;  %v3792_v43 = vand.u32 2147483647, %v5659_v26 }
 0x18e   :  { %5650 = vst [vmem:[#allocation183_spill] sm:$0xff] %v3780_v12  ;;  %v3797_v12 = vand.u32 2147483647, %v5663_v52  ;;  %v5666_v11 = vsub.f32 %v5664_v54, %v5665_v44  ;;  %v1090_v31 = vadd.f32 %v1089_v57, %v1001_v42  ;;  %v5667_v59 = vld [vmem:[#allocation87_spill] sm:$0xff]  ;;  %v5673_v26 = vld [vmem:[#allocation341_spill] sm:$0xff]  ;;  %v5674_v33 = vld [vmem:[#allocation352_spill] sm:$0xff] }
 0x18f   :  { %v1016_v25 = vand.u32 2147483647, %v5656_v4  ;;  %5660 = vst [vmem:[#allocation175_spill] sm:$0xff] %v3792_v43  ;;  %v5668_v16 = vld [vmem:[#allocation331_spill] sm:$0xff]  ;;  %v5671_v4 = vld [vmem:[#allocation332_spill] sm:$0xff]  ;;  %v5675_v48 = vsub.f32 %v5673_v26, %v5674_v33  ;;  %v5677_v44 = vld [vmem:[#allocation333_spill] sm:$0xff] }
 0x190   :  { %v1017_v17 = vand.u32 2147483647, %v5666_v11  ;;  %v5669_v21 = vsub.f32 %v5667_v59, %v5668_v16  ;;  %v5670_v14 = vld [vmem:[#allocation319_spill] sm:$0xff]  ;;  %v5676_v54 = vld [vmem:[#allocation320_spill] sm:$0xff]  ;;  %v5688_v26 = vld [vmem:[#allocation338_spill] sm:$0xff] }
 0x191   :  { %v5672_v62 = vsub.f32 %v5670_v14, %v5671_v4  ;;  %v1018_v52 = vand.u32 2147483647, %v5675_v48  ;;  %v5678_v42 = vsub.f32 %v5676_v54, %v5677_v44  ;;  %v5680_v11 = vld [vmem:[#allocation92_spill] sm:$0xff]  ;;  %v1116_v4 = vadd.f32 %v1115_v37, %v3559_v10  ;;  %v5690_v54 = vld [vmem:[#allocation93_spill] sm:$0xff]  ;;  %v5691_v44 = vld [vmem:[#allocation342_spill] sm:$0xff] }
 0x192   :  { %v3807_v20 = vand.u32 2147483647, %v5669_v21  ;;  %v5681_v60 = vld [vmem:[#allocation336_spill] sm:$0xff]  ;;  %v5685_v21 = vld [vmem:[#allocation337_spill] sm:$0xff]  ;;  %v5696_v10 = vsub.f32 %v3060_v0, %v3108_v51  ;;  %v5697_v37 = vsub.f32 %v3062_v24, %v3110_v30  ;;  %v5707_v30 = vld [vmem:[#allocation358_spill] sm:$0xff] }
 0x193   :  { %v3812_v46 = vand.u32 2147483647, %v5672_v62  ;;  %v3820_v57 = vand.u32 2147483647, %v5678_v42  ;;  %v5682_v2 = vsub.f32 %v5680_v11, %v5681_v60  ;;  %v5684_v16 = vld [vmem:[#allocation324_spill] sm:$0xff]  ;;  %v5687_v62 = vld [vmem:[#allocation325_spill] sm:$0xff]  ;;  %v5692_v42 = vsub.f32 %v5690_v54, %v5691_v44 }
 0x194   :  { %v5686_v56 = vsub.f32 %v5684_v16, %v5685_v21  ;;  %v5689_v33 = vsub.f32 %v5687_v62, %v5688_v26  ;;  %v1076_v60 = vadd.f32 %v1075_v32, %v1016_v25  ;;  %v5693_v11 = vld [vmem:[#allocation329_spill] sm:$0xff]  ;;  %v1033_v21 = vand.u32 2147483647, %v5697_v37  ;;  %v5698_v26 = vld [vmem:[#allocation354_spill] sm:$0xff]  ;;  %v5700_v32 = vld [vmem:[#allocation100_spill] sm:$0xff] }
 0x195   :  { %5679 = vst [vmem:[#allocation187_spill] sm:$0xff] %v3820_v57  ;;  %v3825_v59 = vand.u32 2147483647, %v5682_v2  ;;  %v3841_v43 = vand.u32 2147483647, %v5692_v42  ;;  %v1105_v2 = vadd.f32 %v1104_v27, %v1002_v15  ;;  %v1091_v62 = vadd.f32 %v1090_v31, %v1017_v17  ;;  %v5701_v27 = vld [vmem:[#allocation355_spill] sm:$0xff] }
 0x196   :  { %v3830_v14 = vand.u32 2147483647, %v5686_v56  ;;  %v3836_v48 = vand.u32 2147483647, %v5689_v33  ;;  %v1032_v56 = vand.u32 2147483647, %v5696_v10  ;;  %v5699_v33 = vsub.f32 %v2966_v45, %v5698_v26 }
 0x197   :  { %5683 = vst [vmem:[#allocation45_spill] sm:$0xff] %v3825_v59  ;;  %v5694_v59 = vld [vmem:[#allocation343_spill] sm:$0xff]  ;;  %v5702_v15 = vsub.f32 %v5700_v32, %v5701_v27  ;;  %v1106_v51 = vadd.f32 %v1105_v2, %v1018_v52  ;;  %v5704_v0 = vld [vmem:[#allocation345_spill] sm:$0xff]  ;;  %v5705_v44 = vld [vmem:[#allocation356_spill] sm:$0xff]  ;;  %v5708_v17 = vsub.f32 %v2989_v41, %v5707_v30  ;;  %v1117_v26 = vadd.f32 %v1116_v4, %v3617_v36 }
 0x198   :  { %v5695_v57 = vsub.f32 %v5693_v11, %v5694_v59  ;;  %v1019_v54 = vand.u32 2147483647, %v5699_v33  ;;  %v5706_v42 = vsub.f32 %v5704_v0, %v5705_v44  ;;  %v5709_v31 = vld [vmem:[#allocation101_spill] sm:$0xff]  ;;  %v5710_v11 = vld [vmem:[#allocation359_spill] sm:$0xff]  ;;  %v5716_v32 = vld [vmem:[#allocation106_spill] sm:$0xff] }
 0x199   :  { %v3860_v25 = vand.u32 2147483647, %v5702_v15  ;;  %v3873_v45 = vand.u32 2147483647, %v5708_v17  ;;  %v5711_v10 = vsub.f32 %v5709_v31, %v5710_v11  ;;  %v5715_v33 = vld [vmem:[#allocation89_spill] sm:$0xff]  ;;  %v5718_v41 = vld [vmem:[#allocation104_spill] sm:$0xff] }
 0x19a   :  { %v3846_v16 = vand.u32 2147483647, %v5695_v57  ;;  %v5703_v57 = vsub.f32 %v3081_v7, %v3129_v22  ;;  %v3868_v24 = vand.u32 2147483647, %v5706_v42  ;;  %v5712_v22 = vld [vmem:[#allocation349_spill] sm:$0xff]  ;;  %v5713_v7 = vld [vmem:[#allocation360_spill] sm:$0xff]  ;;  %v5717_v27 = vsub.f32 %v5715_v33, %v5716_v32 }
 0x19b   :  { %v3878_v37 = vand.u32 2147483647, %v5711_v10  ;;  %v5714_v52 = vsub.f32 %v5712_v22, %v5713_v7  ;;  %v1077_v42 = vadd.f32 %v1076_v60, %v1032_v56  ;;  %v5721_v30 = vld [vmem:[#allocation353_spill] sm:$0xff]  ;;  %v5722_v17 = vld [vmem:[#allocation362_spill] sm:$0xff]  ;;  %v5724_v4 = vld [vmem:[#allocation96_spill] sm:$0xff]  ;;  %v5727_v7 = vsub.f32 %v3102_v29, %v3148_v5 }
 0x19c   :  { %v1034_v59 = vand.u32 2147483647, %v5703_v57  ;;  %v3889_v15 = vand.u32 2147483647, %v5717_v27  ;;  %v5719_v57 = vld [vmem:[#allocation361_spill] sm:$0xff]  ;;  %v5723_v31 = vsub.f32 %v5721_v30, %v5722_v17  ;;  %v1092_v33 = vadd.f32 %v1091_v62, %v1033_v21  ;;  %v5728_v32 = vld [vmem:[#allocation368_spill] sm:$0xff] }
 0x19d   :  { %v3884_v2 = vand.u32 2147483647, %v5714_v52  ;;  %v5720_v0 = vsub.f32 %v5718_v41, %v5719_v57  ;;  %v5725_v11 = vld [vmem:[#allocation365_spill] sm:$0xff]  ;;  %v3907_v52 = vand.u32 2147483647, %v5727_v7  ;;  %v5729_v27 = vsub.f32 %v3104_v55, %v5728_v32  ;;  %v5731_v56 = vld [vmem:[#allocation372_spill] sm:$0xff] }
 0x19e   :  { %v3899_v36 = vand.u32 2147483647, %v5723_v31  ;;  %v5726_v10 = vsub.f32 %v5724_v4, %v5725_v11  ;;  %v5730_v60 = vld [vmem:[#allocation113_spill] sm:$0xff]  ;;  %v5733_v30 = vsub.f32 %v3186_v28, %v3222_v13  ;;  %v1107_v31 = vadd.f32 %v1106_v51, %v1034_v59  ;;  %v5739_v59 = vld [vmem:[#allocation366_spill] sm:$0xff] }
 0x19f   :  { %v3894_v44 = vand.u32 2147483647, %v5720_v0  ;;  %v3912_v41 = vand.u32 2147483647, %v5729_v27  ;;  %v5732_v57 = vsub.f32 %v5730_v60, %v5731_v56  ;;  %v5734_v29 = vsub.f32 %v3125_v19, %v3171_v47  ;;  %v5740_v51 = vld [vmem:[#allocation118_spill] sm:$0xff]  ;;  %v5744_v27 = vld [vmem:[#allocation367_spill] sm:$0xff] }
 0x1a0   :  { %v1035_v22 = vand.u32 2147483647, %v5726_v10  ;;  %v1048_v17 = vand.u32 2147483647, %v5733_v30  ;;  %v5735_v55 = vsub.f32 %v3220_v39, %v3224_v8  ;;  %v5736_v62 = vsub.f32 %v3233_v61, %v3235_v34  ;;  %v5737_v10 = vld [vmem:[#allocation373_spill] sm:$0xff]  ;;  %v5742_v32 = vld [vmem:[#allocation38_spill] sm:$0xff] }
 0x1a1   :  { %v3917_v0 = vand.u32 2147483647, %v5732_v57  ;;  %v3925_v5 = vand.u32 2147483647, %v5734_v29  ;;  %v1118_v11 = vadd.f32 %v1117_v26, %v3678_v3  ;;  %v5738_v28 = vsub.f32 %v3127_v53, %v5737_v10  ;;  %v5743_v8 = vld [vmem:[#allocation13_spill] sm:$0xff]  ;;  %v5745_v60 = vld [vmem:[#allocation374_spill] sm:$0xff] }
 0x1a2   :  { %v1049_v21 = vand.u32 2147483647, %v5735_v55  ;;  %v1050_v4 = vand.u32 2147483647, %v5736_v62  ;;  %v5741_v19 = vsub.f32 %v5739_v59, %v5740_v51  ;;  %v1078_v7 = vadd.f32 %v1077_v42, %v1048_v17  ;;  %v5747_v3 = vld [vmem:[#allocation24_spill] sm:$0xff]  ;;  %v5748_v26 = vld [vmem:[#allocation11_spill] sm:$0xff] }
 0x1a3   :  { %v3937_v13 = vand.u32 2147483647, %v5738_v28  ;;  %v1124_v39 = vadd.f32 %v5743_v8, %v5742_v32  ;;  %v5746_v61 = vsub.f32 %v5744_v27, %v5745_v60  ;;  %v5749_v56 = vsub.f32 %v5747_v3, %v5748_v26  ;;  %v5750_v57 = vld [vmem:[#allocation122_spill] sm:$0xff]  ;;  %v5752_v42 = vld [vmem:[#allocation125_spill] sm:$0xff]  ;;  %v5754_v10 = vld [vmem:[#allocation115_spill] sm:$0xff] }
 0x1a4   :  { %v3942_v47 = vand.u32 2147483647, %v5741_v19  ;;  %v5751_v30 = vsub.f32 %v3262_v6, %v5750_v57  ;;  %v1093_v55 = vadd.f32 %v1092_v33, %v1049_v21  ;;  %v5753_v17 = vsub.f32 %v3276_v38, %v5752_v42  ;;  %v5755_v28 = vld [vmem:[#allocation127_spill] sm:$0xff]  ;;  %v5757_v19 = vld [vmem:[#allocation134_spill] sm:$0xff]  ;;  %1304 = vst [vmem:[#allocation7] sm:$0xff] %v1078_v7  ;;  %v5767_v57 = vld [vmem:[#allocation137_spill] sm:$0xff] }
 0x1a5   :  { %v3949_v34 = vand.u32 2147483647, %v5746_v61  ;;  %v1051_v53 = vand.u32 2147483647, %v5749_v56  ;;  %v5756_v59 = vsub.f32 %v5754_v10, %v5755_v28  ;;  %v5758_v32 = vld [vmem:[#allocation123_spill] sm:$0xff]  ;;  %v1108_v60 = vadd.f32 %v1107_v31, %v1050_v4  ;;  %v5763_v31 = vld [vmem:[#allocation34_spill] sm:$0xff] }
 0x1a6   :  { %v3957_v29 = vand.u32 2147483647, %v5751_v30  ;;  %v3962_v62 = vand.u32 2147483647, %v5753_v17  ;;  %v5759_v8 = vsub.f32 %v5757_v19, %v5758_v32  ;;  %v5760_v6 = vsub.f32 %v3408_v35, %v3410_v58  ;;  %1305 = vst [vmem:[#allocation7 + $0x8] sm:$0xff] %v1093_v55  ;;  %v5764_v7 = vld [vmem:[#allocation43_spill] sm:$0xff] }
 0x1a7   :  { %v3967_v51 = vand.u32 2147483647, %v5756_v59  ;;  %v5761_v38 = vsub.f32 %v3520_v23, %v3522_v49  ;;  %v5762_v61 = vsub.f32 %v3629_v63, %v3631_v40  ;;  %v1119_v26 = vadd.f32 %v1118_v11, %v3742_v9  ;;  %v5765_v56 = vld [vmem:[#allocation14_spill] sm:$0xff]  ;;  %v5766_v58 = vld [vmem:[#allocation48_spill] sm:$0xff]  ;;  %v5768_v42 = vld [vmem:[#allocation53_spill] sm:$0xff]  ;;  %1306 = vst [vmem:[#allocation7 + $0x10] sm:$0xff] %v1108_v60 }
 0x1a8   :  { %v3972_v27 = vand.u32 2147483647, %v5759_v8  ;;  %v3977_v33 = vand.u32 2147483647, %v5760_v6  ;;  %v1125_v4 = vadd.f32 %v1124_v39, %v5763_v31  ;;  %v1139_v35 = vadd.f32 %v5765_v56, %v5764_v7  ;;  %v5769_v23 = vld [vmem:[#allocation15_spill] sm:$0xff]  ;;  %v5770_v63 = vld [vmem:[#allocation58_spill] sm:$0xff] }
 0x1a9   :  { %v3982_v21 = vand.u32 2147483647, %v5761_v38  ;;  %v3987_v3 = vand.u32 2147483647, %v5762_v61  ;;  %v1154_v30 = vadd.f32 %v5767_v57, %v5766_v58  ;;  %v1169_v49 = vadd.f32 %v5769_v23, %v5768_v42  ;;  %v5771_v40 = vld [vmem:[#allocation16_spill] sm:$0xff]  ;;  %v5772_v28 = vld [vmem:[#allocation63_spill] sm:$0xff] }
 0x1aa   :  { %v1120_v17 = vadd.f32 %v1119_v26, %v3797_v12  ;;  %v1184_v10 = vadd.f32 %v5771_v40, %v5770_v63  ;;  %v5773_v9 = vld [vmem:[#allocation30_spill] sm:$0xff]  ;;  %v5774_v55 = vld [vmem:[#allocation68_spill] sm:$0xff]  ;;  %v5775_v39 = vld [vmem:[#allocation31_spill] sm:$0xff] }
 0x1ab   :  { %v1199_v11 = vadd.f32 %v5773_v9, %v5772_v28  ;;  %v1214_v59 = vadd.f32 %v5775_v39, %v5774_v55  ;;  %v5776_v19 = vld [vmem:[#allocation79_spill] sm:$0xff]  ;;  %v5777_v8 = vld [vmem:[#allocation50_spill] sm:$0xff]  ;;  %v5781_v26 = vld [vmem:[#allocation56_spill] sm:$0xff] }
 0x1ac   :  { %v1126_v32 = vadd.f32 %v1125_v4, %v5776_v19  ;;  %v1140_v6 = vadd.f32 %v1139_v35, %v5777_v8  ;;  %v5778_v38 = vld [vmem:[#allocation51_spill] sm:$0xff]  ;;  %v1121_v60 = vadd.f32 %v1120_v17, %v1019_v54  ;;  %v5782_v57 = vld [vmem:[#allocation44_spill] sm:$0xff]  ;;  %v5783_v23 = vld [vmem:[#allocation97_spill] sm:$0xff] }
 0x1ad   :  { %v1155_v61 = vadd.f32 %v1154_v30, %v5778_v38  ;;  %v5779_v31 = vld [vmem:[#allocation39_spill] sm:$0xff]  ;;  %v1200_v58 = vadd.f32 %v1199_v11, %v5781_v26  ;;  %v1215_v42 = vadd.f32 %v1214_v59, %v5782_v57  ;;  %v5784_v40 = vld [vmem:[#allocation80_spill] sm:$0xff]  ;;  %v5786_v4 = vld [vmem:[#allocation69_spill] sm:$0xff] }
 0x1ae   :  { %v1170_v7 = vadd.f32 %v1169_v49, %v5779_v31  ;;  %v5780_v56 = vld [vmem:[#allocation55_spill] sm:$0xff]  ;;  %v1127_v63 = vadd.f32 %v1126_v32, %v5783_v23  ;;  %v1141_v28 = vadd.f32 %v1140_v6, %v5784_v40  ;;  %v5785_v9 = vld [vmem:[#allocation64_spill] sm:$0xff]  ;;  %v1122_v35 = vadd.f32 %v1121_v60, %v1035_v22  ;;  %v5787_v19 = vld [vmem:[#allocation70_spill] sm:$0xff] }
 0x1af   :  { %v1185_v12 = vadd.f32 %v1184_v10, %v5780_v56  ;;  %v1156_v55 = vadd.f32 %v1155_v61, %v5785_v9  ;;  %v5788_v8 = vld [vmem:[#allocation71_spill] sm:$0xff]  ;;  %v5789_v54 = vld [vmem:[#allocation76_spill] sm:$0xff]  ;;  %v5790_v10 = vld [vmem:[#allocation130_spill] sm:$0xff] }
 0x1b0   :  { %v1171_v39 = vadd.f32 %v1170_v7, %v5786_v4  ;;  %v1201_v49 = vadd.f32 %v1200_v58, %v5788_v8  ;;  %v1216_v17 = vadd.f32 %v1215_v42, %v5789_v54  ;;  %v1128_v38 = vadd.f32 %v1127_v63, %v5790_v10  ;;  %v5791_v11 = vld [vmem:[#allocation98_spill] sm:$0xff]  ;;  %v5792_v59 = vld [vmem:[#allocation116_spill] sm:$0xff]  ;;  %v5793_v32 = vld [vmem:[#allocation117_spill] sm:$0xff] }
 0x1b1   :  { %v1186_v30 = vadd.f32 %v1185_v12, %v5787_v19  ;;  %v1142_v31 = vadd.f32 %v1141_v28, %v5791_v11  ;;  %v1157_v56 = vadd.f32 %v1156_v55, %v5792_v59  ;;  %v1123_v6 = vadd.f32 %v1122_v35, %v1051_v53  ;;  %v5794_v57 = vld [vmem:[#allocation103_spill] sm:$0xff]  ;;  %v5795_v23 = vld [vmem:[#allocation108_spill] sm:$0xff]  ;;  %v5796_v22 = vld [vmem:[#allocation109_spill] sm:$0xff] }
 0x1b2   :  { %v1172_v26 = vadd.f32 %v1171_v39, %v5793_v32  ;;  %v1202_v7 = vadd.f32 %v1201_v49, %v5795_v23  ;;  %v1217_v60 = vadd.f32 %v1216_v17, %v5796_v22  ;;  %v5797_v12 = vld [vmem:[#allocation129_spill] sm:$0xff]  ;;  %v5798_v58 = vld [vmem:[#allocation18_spill] sm:$0xff]  ;;  %v5799_v42 = vld [vmem:[#allocation131_spill] sm:$0xff] }
 0x1b3   :  { %v1187_v61 = vadd.f32 %v1186_v30, %v5794_v57  ;;  %v1129_v40 = vadd.f32 %v1128_v38, %v5797_v12  ;;  %v1143_v9 = vadd.f32 %v1142_v31, %v5798_v58  ;;  %v1158_v4 = vadd.f32 %v1157_v56, %v5799_v42  ;;  %v5800_v63 = vld [vmem:[#allocation119_spill] sm:$0xff]  ;;  %v5801_v28 = vld [vmem:[#allocation132_spill] sm:$0xff]  ;;  %1307 = vst [vmem:[#allocation7 + $0x18] sm:$0xff] %v1123_v6  ;;  %v5806_v17 = vld [vmem:[#allocation142_spill] sm:$0xff] }
 0x1b4   :  { %v1173_v19 = vadd.f32 %v1172_v26, %v5800_v63  ;;  %v5802_v55 = vld [vmem:[#allocation135_spill] sm:$0xff]  ;;  %v5803_v39 = vld [vmem:[#allocation124_spill] sm:$0xff]  ;;  %v5807_v11 = vld [vmem:[#allocation145_spill] sm:$0xff] }
 0x1b5   :  { %v1188_v8 = vadd.f32 %v1187_v61, %v5801_v28  ;;  %v1203_v54 = vadd.f32 %v1202_v7, %v5802_v55  ;;  %v1218_v53 = vadd.f32 %v1217_v60, %v5803_v39  ;;  %v5804_v35 = vld [vmem:[#allocation75_spill] sm:$0xff]  ;;  %v5805_v30 = vld [vmem:[#allocation20_spill] sm:$0xff]  ;;  %v1130_v49 = vadd.f32 %v1129_v40, %v3493_v50  ;;  %v5809_v32 = vld [vmem:[#allocation146_spill] sm:$0xff] }
 0x1b6   :  { %v1229_v10 = vadd.f32 %v5805_v30, %v5804_v35  ;;  %v1144_v38 = vadd.f32 %v1143_v9, %v5806_v17  ;;  %v1159_v31 = vadd.f32 %v1158_v4, %v5807_v11  ;;  %v5808_v59 = vld [vmem:[#allocation23_spill] sm:$0xff]  ;;  %v5810_v57 = vld [vmem:[#allocation133_spill] sm:$0xff]  ;;  %v5812_v22 = vld [vmem:[#allocation60_spill] sm:$0xff] }
 0x1b7   :  { %v1174_v56 = vadd.f32 %v1173_v19, %v5808_v59  ;;  %v1189_v26 = vadd.f32 %v1188_v8, %v5809_v32  ;;  %v1204_v61 = vadd.f32 %v1203_v54, %v5810_v57  ;;  %v5811_v23 = vld [vmem:[#allocation147_spill] sm:$0xff]  ;;  %v1131_v12 = vadd.f32 %v1130_v49, %v3564_v18  ;;  %v5813_v58 = vld [vmem:[#allocation26_spill] sm:$0xff]  ;;  %v5816_v63 = vld [vmem:[#allocation156_spill] sm:$0xff] }
 0x1b8   :  { %v1219_v7 = vadd.f32 %v1218_v53, %v5811_v23  ;;  %v1230_v60 = vadd.f32 %v1229_v10, %v5812_v22  ;;  %v1145_v6 = vadd.f32 %v1144_v38, %v5813_v58  ;;  %v5814_v42 = vld [vmem:[#allocation155_spill] sm:$0xff]  ;;  %v5817_v28 = vld [vmem:[#allocation144_spill] sm:$0xff]  ;;  %v5818_v55 = vld [vmem:[#allocation157_spill] sm:$0xff] }
 0x1b9   :  { %v1160_v50 = vadd.f32 %v1159_v31, %v5814_v42  ;;  %v5815_v40 = vld [vmem:[#allocation143_spill] sm:$0xff]  ;;  %v1190_v4 = vadd.f32 %v1189_v26, %v5816_v63  ;;  %v1205_v19 = vadd.f32 %v1204_v61, %v5817_v28  ;;  %v5819_v39 = vld [vmem:[#allocation77_spill] sm:$0xff]  ;;  %v5820_v35 = vld [vmem:[#allocation168_spill] sm:$0xff] }
 0x1ba   :  { %v1175_v9 = vadd.f32 %v1174_v56, %v5815_v40  ;;  %v1220_v8 = vadd.f32 %v1219_v7, %v5818_v55  ;;  %v1231_v54 = vadd.f32 %v1230_v60, %v5819_v39  ;;  %v1132_v53 = vadd.f32 %v1131_v12, %v5820_v35  ;;  %v5821_v30 = vld [vmem:[#allocation148_spill] sm:$0xff]  ;;  %v5822_v17 = vld [vmem:[#allocation163_spill] sm:$0xff]  ;;  %v5824_v11 = vld [vmem:[#allocation166_spill] sm:$0xff] }
 0x1bb   :  { %v1146_v10 = vadd.f32 %v1145_v6, %v5821_v30  ;;  %v1161_v18 = vadd.f32 %v1160_v50, %v5822_v17  ;;  %v5823_v49 = vld [vmem:[#allocation152_spill] sm:$0xff]  ;;  %v1191_v31 = vadd.f32 %v1190_v4, %v5824_v11  ;;  %v5825_v59 = vld [vmem:[#allocation153_spill] sm:$0xff]  ;;  %v5826_v32 = vld [vmem:[#allocation167_spill] sm:$0xff] }
 0x1bc   :  { %v1176_v38 = vadd.f32 %v1175_v9, %v5823_v49  ;;  %v1206_v56 = vadd.f32 %v1205_v19, %v5825_v59  ;;  %v1221_v26 = vadd.f32 %v1220_v8, %v5826_v32  ;;  %v5827_v57 = vld [vmem:[#allocation121_spill] sm:$0xff]  ;;  %v5829_v22 = vld [vmem:[#allocation28_spill] sm:$0xff]  ;;  %v5831_v42 = vld [vmem:[#allocation158_spill] sm:$0xff] }
 0x1bd   :  { %v1232_v61 = vadd.f32 %v1231_v54, %v5827_v57  ;;  %v5828_v23 = vld [vmem:[#allocation173_spill] sm:$0xff]  ;;  %v1147_v60 = vadd.f32 %v1146_v10, %v5829_v22  ;;  %v5830_v58 = vld [vmem:[#allocation12_spill] sm:$0xff]  ;;  %v5832_v40 = vld [vmem:[#allocation171_spill] sm:$0xff] }
 0x1be   :  { %v1133_v7 = vadd.f32 %v1132_v53, %v5828_v23  ;;  %v1162_v12 = vadd.f32 %v1161_v18, %v5830_v58  ;;  %v1177_v6 = vadd.f32 %v1176_v38, %v5831_v42  ;;  %v1192_v50 = vadd.f32 %v1191_v31, %v5832_v40  ;;  %v5833_v63 = vld [vmem:[#allocation159_spill] sm:$0xff]  ;;  %v5834_v28 = vld [vmem:[#allocation172_spill] sm:$0xff]  ;;  %v5836_v39 = vld [vmem:[#allocation169_spill] sm:$0xff] }
 0x1bf   :  { %v1207_v9 = vadd.f32 %v1206_v56, %v5833_v63  ;;  %v1222_v4 = vadd.f32 %v1221_v26, %v5834_v28  ;;  %v5835_v55 = vld [vmem:[#allocation136_spill] sm:$0xff]  ;;  %v5838_v30 = vld [vmem:[#allocation177_spill] sm:$0xff]  ;;  %v5840_v49 = vld [vmem:[#allocation178_spill] sm:$0xff] }
 0x1c0   :  { %v1233_v19 = vadd.f32 %v1232_v61, %v5835_v55  ;;  %v1134_v8 = vadd.f32 %v1133_v7, %v5836_v39  ;;  %v5837_v35 = vld [vmem:[#allocation32_spill] sm:$0xff]  ;;  %v1163_v53 = vadd.f32 %v1162_v12, %v5838_v30  ;;  %v1193_v18 = vadd.f32 %v1192_v50, %v5840_v49  ;;  %v5841_v11 = vld [vmem:[#allocation165_spill] sm:$0xff]  ;;  %v5842_v59 = vld [vmem:[#allocation179_spill] sm:$0xff] }
 0x1c1   :  { %v1148_v54 = vadd.f32 %v1147_v60, %v5837_v35  ;;  %v5839_v17 = vld [vmem:[#allocation164_spill] sm:$0xff]  ;;  %v1208_v38 = vadd.f32 %v1207_v9, %v5841_v11  ;;  %v1223_v31 = vadd.f32 %v1222_v4, %v5842_v59  ;;  %v5843_v32 = vld [vmem:[#allocation149_spill] sm:$0xff]  ;;  %v5844_v61 = vld [vmem:[#allocation182_spill] sm:$0xff] }
 0x1c2   :  { %v1178_v10 = vadd.f32 %v1177_v6, %v5839_v17  ;;  %v1234_v56 = vadd.f32 %v1233_v19, %v5843_v32  ;;  %v1135_v26 = vadd.f32 %v1134_v8, %v3807_v20  ;;  %v1164_v23 = vadd.f32 %v1163_v53, %v5844_v61  ;;  %v5845_v7 = vld [vmem:[#allocation174_spill] sm:$0xff]  ;;  %v5848_v6 = vld [vmem:[#allocation183_spill] sm:$0xff]  ;;  %v5849_v50 = vld [vmem:[#allocation161_spill] sm:$0xff] }
 0x1c3   :  { %v1149_v57 = vadd.f32 %v1148_v54, %v3755_v1  ;;  %v5846_v60 = vld [vmem:[#allocation186_spill] sm:$0xff]  ;;  %v1224_v40 = vadd.f32 %v1223_v31, %v5848_v6  ;;  %v5850_v4 = vld [vmem:[#allocation187_spill] sm:$0xff]  ;;  %v5851_v55 = vld [vmem:[#allocation45_spill] sm:$0xff] }
 0x1c4   :  { %v1179_v22 = vadd.f32 %v1178_v10, %v5845_v7  ;;  %v1194_v58 = vadd.f32 %v1193_v18, %v5846_v60  ;;  %v5847_v12 = vld [vmem:[#allocation170_spill] sm:$0xff]  ;;  %v1235_v63 = vadd.f32 %v1234_v56, %v5849_v50  ;;  %v1136_v9 = vadd.f32 %v1135_v26, %v3860_v25  ;;  %v5853_v49 = vld [vmem:[#allocation160_spill] sm:$0xff]  ;;  %v5854_v11 = vld [vmem:[#allocation33_spill] sm:$0xff] }
 0x1c5   :  { %v1209_v42 = vadd.f32 %v1208_v38, %v5847_v12  ;;  %v1150_v28 = vadd.f32 %v1149_v57, %v3812_v46  ;;  %v1165_v20 = vadd.f32 %v1164_v23, %v5850_v4  ;;  %v1225_v8 = vadd.f32 %v1224_v40, %v3841_v43  ;;  %v5852_v35 = vld [vmem:[#allocation154_spill] sm:$0xff]  ;;  %v5858_v32 = vld [vmem:[#allocation61_spill] sm:$0xff]  ;;  %v5859_v26 = vld [vmem:[#allocation88_spill] sm:$0xff] }
 0x1c6   :  { %v1180_v1 = vadd.f32 %v1179_v22, %v5851_v55  ;;  %v1195_v19 = vadd.f32 %v1194_v58, %v3830_v14  ;;  %v1236_v54 = vadd.f32 %v1235_v63, %v5852_v35  ;;  %v1137_v30 = vadd.f32 %v1136_v9, %v3907_v52  ;;  %v5855_v59 = vld [vmem:[#allocation82_spill] sm:$0xff]  ;;  %v5862_v61 = vld [vmem:[#allocation25_spill] sm:$0xff]  ;;  %v5864_v7 = vld [vmem:[#allocation40_spill] sm:$0xff] }
 0x1c7   :  { %v1210_v39 = vadd.f32 %v1209_v42, %v3836_v48  ;;  %v1151_v53 = vadd.f32 %v1150_v28, %v3868_v24  ;;  %v1166_v25 = vadd.f32 %v1165_v20, %v3873_v45  ;;  %v1226_v14 = vadd.f32 %v1225_v8, %v3894_v44  ;;  %v5863_v23 = vld [vmem:[#allocation102_spill] sm:$0xff]  ;;  %v5871_v40 = vld [vmem:[#allocation369_spill] sm:$0xff]  ;;  %v5872_v50 = vld [vmem:[#allocation120_spill] sm:$0xff] }
 0x1c8   :  { %v1181_v46 = vadd.f32 %v1180_v1, %v3878_v37  ;;  %v1196_v17 = vadd.f32 %v1195_v19, %v3884_v2  ;;  %v1237_v48 = vadd.f32 %v1236_v54, %v5853_v49  ;;  %v1138_v43 = vadd.f32 %v1137_v30, %v3957_v29  ;;  %v5868_v58 = vld [vmem:[#allocation198_spill] sm:$0xff]  ;;  %v5875_v55 = vld [vmem:[#allocation49_spill] sm:$0xff]  ;;  %v5878_v54 = vld [vmem:[#allocation219_spill] sm:$0xff] }
 0x1c9   :  { %v1211_v10 = vadd.f32 %v1210_v39, %v3889_v15  ;;  %v1152_v18 = vadd.f32 %v1151_v53, %v3912_v41  ;;  %v1167_v52 = vadd.f32 %v1166_v25, %v3917_v0  ;;  %v1227_v2 = vadd.f32 %v1226_v14, %v3949_v34  ;;  %v5856_v41 = vld [vmem:[#allocation35_spill] sm:$0xff]  ;;  %v5869_v12 = vld [vmem:[#allocation210_spill] sm:$0xff]  ;;  %v5876_v19 = vld [vmem:[#allocation65_spill] sm:$0xff] }
 0x1ca   :  { %v1182_v24 = vadd.f32 %v1181_v46, %v3925_v5  ;;  %v1197_v45 = vadd.f32 %v1196_v17, %v3937_v13  ;;  %v1238_v15 = vadd.f32 %v1237_v48, %v5854_v11  ;;  %v1244_v31 = vadd.f32 %v5856_v41, %v5855_v59  ;;  %1308 = vst [vmem:[#allocation7 + $0x20] sm:$0xff] %v1138_v43  ;;  %v5874_v4 = vld [vmem:[#allocation78_spill] sm:$0xff]  ;;  %v5879_v30 = vld [vmem:[#allocation232_spill] sm:$0xff]  ;;  %v5882_v17 = vld [vmem:[#allocation233_spill] sm:$0xff] }
 0x1cb   :  { %v1212_v37 = vadd.f32 %v1211_v10, %v3942_v47  ;;  %v1153_v44 = vadd.f32 %v1152_v18, %v3962_v62  ;;  %v1168_v38 = vadd.f32 %v1167_v52, %v3967_v51  ;;  %v1228_v13 = vadd.f32 %v1227_v2, %v3987_v3  ;;  %v5857_v47 = vld [vmem:[#allocation175_spill] sm:$0xff]  ;;  %v5860_v62 = vld [vmem:[#allocation36_spill] sm:$0xff]  ;;  %v5877_v8 = vld [vmem:[#allocation66_spill] sm:$0xff] }
 0x1cc   :  { %v1183_v29 = vadd.f32 %v1182_v24, %v3972_v27  ;;  %v1198_v0 = vadd.f32 %v1197_v45, %v3977_v33  ;;  %v1239_v34 = vadd.f32 %v1238_v15, %v5857_v47  ;;  %v1245_v56 = vadd.f32 %v1244_v31, %v5858_v32  ;;  %v5861_v51 = vld [vmem:[#allocation95_spill] sm:$0xff]  ;;  %v5865_v33 = vld [vmem:[#allocation194_spill] sm:$0xff]  ;;  %v5881_v46 = vld [vmem:[#allocation220_spill] sm:$0xff] }
 0x1cd   :  { %v1213_v5 = vadd.f32 %v1212_v37, %v3982_v21  ;;  %v1259_v57 = vadd.f32 %v5860_v62, %v5859_v26  ;;  %v1274_v27 = vadd.f32 %v5862_v61, %v5861_v51  ;;  %v1289_v22 = vadd.f32 %v5864_v7, %v5863_v23  ;;  %1309 = vst [vmem:[#allocation7 + $0x28] sm:$0xff] %v1153_v44  ;;  %v5866_v21 = vld [vmem:[#allocation208_spill] sm:$0xff]  ;;  %v5885_v49 = vld [vmem:[#allocation181_spill] sm:$0xff]  ;;  %v5887_v52 = vld [vmem:[#allocation110_spill] sm:$0xff] }
 0x1ce   :  { %1310 = vst [vmem:[#allocation7 + $0x30] sm:$0xff] %v1168_v38  ;;  %1311 = vst [vmem:[#allocation7 + $0x38] sm:$0xff] %v1183_v29  ;;  %v5867_v60 = vsub.f32 %v5865_v33, %v5866_v21  ;;  %v5870_v42 = vsub.f32 %v5868_v58, %v5869_v12  ;;  %v5873_v63 = vsub.f32 %v5871_v40, %v5872_v50  ;;  %v5888_v45 = vld [vmem:[#allocation99_spill] sm:$0xff]  ;;  %v5890_v15 = vld [vmem:[#allocation84_spill] sm:$0xff] }
 0x1cf   :  { %v1240_v28 = vadd.f32 %v1239_v34, %v3846_v16  ;;  %1312 = vst [vmem:[#allocation7 + $0x40] sm:$0xff] %v1198_v0  ;;  %1313 = vst [vmem:[#allocation7 + $0x48] sm:$0xff] %v1213_v5  ;;  %v1246_v20 = vadd.f32 %v1245_v56, %v5874_v4  ;;  %v1260_v1 = vadd.f32 %v1259_v57, %v5875_v55  ;;  %v5884_v16 = vld [vmem:[#allocation21_spill] sm:$0xff]  ;;  %v5889_v2 = vld [vmem:[#allocation83_spill] sm:$0xff] }
 0x1d0   :  { %v934_v3 = vand.u32 2147483647, %v5867_v60  ;;  %v935_v6 = vand.u32 2147483647, %v5870_v42  ;;  %v1043_v9 = vand.u32 2147483647, %v5873_v63  ;;  %v1275_v39 = vadd.f32 %v1274_v27, %v5876_v19 }
 0x1d1   :  { %1314 = vst [vmem:[#allocation7 + $0x50] sm:$0xff] %v1228_v13  ;;  %v1290_v35 = vadd.f32 %v1289_v22, %v5877_v8  ;;  %v5880_v53 = vsub.f32 %v5878_v54, %v5879_v30  ;;  %v5883_v10 = vsub.f32 %v5881_v46, %v5882_v17  ;;  %v5886_v48 = vsub.f32 %v5884_v16, %v5885_v49  ;;  %v5891_v38 = vld [vmem:[#allocation52_spill] sm:$0xff]  ;;  %v5892_v29 = vld [vmem:[#allocation237_spill] sm:$0xff]  ;;  %v5895_v0 = vld [vmem:[#allocation238_spill] sm:$0xff] }
 0x1d2   :  { %v1241_v18 = vadd.f32 %v1240_v28, %v3899_v36  ;;  %v1247_v24 = vadd.f32 %v1246_v20, %v5887_v52  ;;  %v1261_v37 = vadd.f32 %v1260_v1, %v5888_v45  ;;  %v1276_v11 = vadd.f32 %v1275_v39, %v5889_v2  ;;  %v5894_v31 = vld [vmem:[#allocation224_spill] sm:$0xff]  ;;  %v5897_v47 = vld [vmem:[#allocation247_spill] sm:$0xff]  ;;  %v5898_v34 = vld [vmem:[#allocation261_spill] sm:$0xff] }
 0x1d3   :  { %v948_v25 = vand.u32 2147483647, %v5880_v53  ;;  %v949_v14 = vand.u32 2147483647, %v5883_v10  ;;  %v1059_v43 = vand.u32 2147483647, %v5886_v48  ;;  %v1291_v44 = vadd.f32 %v1290_v35, %v5890_v15 }
 0x1d4   :  { %v5893_v59 = vsub.f32 %v5891_v38, %v5892_v29  ;;  %v5896_v5 = vsub.f32 %v5894_v31, %v5895_v0  ;;  %v5899_v32 = vsub.f32 %v5897_v47, %v5898_v34  ;;  %v1242_v56 = vadd.f32 %v1241_v18, %v1043_v9  ;;  %v4159_v26 = vld [vmem:[#allocation2 + $0x770] sm:$0xff]  ;;  %v5900_v57 = vld [vmem:[#allocation22_spill] sm:$0xff]  ;;  %v5904_v21 = vld [vmem:[#allocation251_spill] sm:$0xff] }
 0x1d5   :  { %v4161_v62 = vld [vmem:[#allocation5 + $0x770] sm:$0xff]  ;;  %v1248_v51 = vadd.f32 %v1247_v24, %v5900_v57  ;;  %v5902_v23 = vld [vmem:[#allocation114_spill] sm:$0xff]  ;;  %v5907_v42 = vld [vmem:[#allocation252_spill] sm:$0xff] }
 0x1d6   :  { %v950_v41 = vand.u32 2147483647, %v5893_v59  ;;  %v951_v13 = vand.u32 2147483647, %v5896_v5  ;;  %v964_v36 = vand.u32 2147483647, %v5899_v32  ;;  %v1277_v7 = vadd.f32 %v1276_v11, %v5902_v23 }
 0x1d7   :  { %v5901_v61 = vld [vmem:[#allocation17_spill] sm:$0xff]  ;;  %v5903_v22 = vld [vmem:[#allocation126_spill] sm:$0xff]  ;;  %v5911_v28 = vld [vmem:[#allocation267_spill] sm:$0xff]  ;;  %v1243_v55 = vadd.f32 %v1242_v56, %v1059_v43  ;;  %v790_v10 = vsub.f32 %v4159_v26, %v4161_v62 }
 0x1d8   :  { %v1262_v27 = vadd.f32 %v1261_v37, %v5901_v61  ;;  %v1292_v33 = vadd.f32 %v1291_v44, %v5903_v22  ;;  %v5905_v60 = vld [vmem:[#allocation265_spill] sm:$0xff]  ;;  %v5908_v40 = vld [vmem:[#allocation266_spill] sm:$0xff]  ;;  %v5914_v35 = vld [vmem:[#allocation140_spill] sm:$0xff] }
 0x1d9   :  { %v5906_v58 = vsub.f32 %v5904_v21, %v5905_v60  ;;  %v5909_v50 = vsub.f32 %v5907_v42, %v5908_v40  ;;  %v5910_v9 = vld [vmem:[#allocation253_spill] sm:$0xff]  ;;  %v4176_v1 = vld [vmem:[#allocation2 + $0x778] sm:$0xff]  ;;  %v5915_v30 = vld [vmem:[#allocation128_spill] sm:$0xff]  ;;  %1315 = vst [vmem:[#allocation7 + $0x58] sm:$0xff] %v1243_v55 }
 0x1da   :  { %v5912_v4 = vsub.f32 %v5910_v9, %v5911_v28  ;;  %v4178_v19 = vld [vmem:[#allocation5 + $0x778] sm:$0xff]  ;;  %v1263_v54 = vadd.f32 %v1262_v27, %v5914_v35  ;;  %v1278_v53 = vadd.f32 %v1277_v7, %v5915_v30  ;;  %v5916_v46 = vld [vmem:[#allocation141_spill] sm:$0xff]  ;;  %v5917_v16 = vld [vmem:[#allocation72_spill] sm:$0xff] }
 0x1db   :  { %v965_v12 = vand.u32 2147483647, %v5906_v58  ;;  %v966_v63 = vand.u32 2147483647, %v5909_v50  ;;  %v5913_v39 = vld [vmem:[#allocation138_spill] sm:$0xff]  ;;  %v1293_v17 = vadd.f32 %v1292_v33, %v5916_v46  ;;  %v5918_v49 = vld [vmem:[#allocation289_spill] sm:$0xff]  ;;  %v791_v56 = vsub.f32 %v4176_v1, %v4178_v19 }
 0x1dc   :  { %v967_v20 = vand.u32 2147483647, %v5912_v4  ;;  %v1249_v8 = vadd.f32 %v1248_v51, %v5913_v39  ;;  %v5919_v48 = vsub.f32 %v5917_v16, %v5918_v49  ;;  %v5920_v43 = vld [vmem:[#allocation278_spill] sm:$0xff]  ;;  %v5923_v37 = vld [vmem:[#allocation279_spill] sm:$0xff]  ;;  %v5930_v26 = vld [vmem:[#allocation73_spill] sm:$0xff] }
 0x1dd   :  { %v5921_v52 = vld [vmem:[#allocation290_spill] sm:$0xff]  ;;  %v5924_v2 = vld [vmem:[#allocation291_spill] sm:$0xff]  ;;  %v5933_v61 = vld [vmem:[#allocation304_spill] sm:$0xff] }
 0x1de   :  { %v980_v18 = vand.u32 2147483647, %v5919_v48  ;;  %v5922_v24 = vsub.f32 %v5920_v43, %v5921_v52  ;;  %v5925_v11 = vsub.f32 %v5923_v37, %v5924_v2  ;;  %v292_v44 = vld [vmem:[#allocation2 + $0x7e0] sm:$0xff]  ;;  %v5927_v31 = vld [vmem:[#allocation150_spill] sm:$0xff]  ;;  %v5934_v27 = vld [vmem:[#allocation317_spill] sm:$0xff] }
 0x1df   :  { %v548_v38 = vld [vmem:[#allocation5 + $0x7e0] sm:$0xff]  ;;  %v1264_v0 = vadd.f32 %v1263_v54, %v5927_v31  ;;  %v5935_v23 = vsub.f32 %v5933_v61, %v5934_v27  ;;  %v5936_v22 = vld [vmem:[#allocation305_spill] sm:$0xff]  ;;  %v5937_v33 = vld [vmem:[#allocation318_spill] sm:$0xff] }
 0x1e0   :  { %v981_v45 = vand.u32 2147483647, %v5922_v24  ;;  %v982_v15 = vand.u32 2147483647, %v5925_v11  ;;  %v5926_v29 = vld [vmem:[#allocation27_spill] sm:$0xff]  ;;  %v5938_v21 = vsub.f32 %v5936_v22, %v5937_v33  ;;  %v293_v58 = vld [vmem:[#allocation2 + $0x7e8] sm:$0xff]  ;;  %v804_v55 = vsub.f32 %v292_v44, %v548_v38 }
 0x1e1   :  { %v1250_v59 = vadd.f32 %v1249_v8, %v5926_v29  ;;  %v5928_v5 = vld [vmem:[#allocation139_spill] sm:$0xff]  ;;  %v996_v7 = vand.u32 2147483647, %v5935_v23  ;;  %v549_v42 = vld [vmem:[#allocation5 + $0x7e8] sm:$0xff]  ;;  %v5939_v50 = vld [vmem:[#allocation162_spill] sm:$0xff] }
 0x1e2   :  { %v1279_v47 = vadd.f32 %v1278_v53, %v5928_v5  ;;  %v5929_v34 = vld [vmem:[#allocation151_spill] sm:$0xff]  ;;  %v997_v60 = vand.u32 2147483647, %v5938_v21  ;;  %v1265_v9 = vadd.f32 %v1264_v0, %v5939_v50  ;;  %v5940_v1 = vld [vmem:[#allocation85_spill] sm:$0xff]  ;;  %v5944_v54 = vld [vmem:[#allocation322_spill] sm:$0xff] }
 0x1e3   :  { %v1294_v32 = vadd.f32 %v1293_v17, %v5929_v34  ;;  %v5931_v62 = vld [vmem:[#allocation295_spill] sm:$0xff]  ;;  %v1251_v40 = vadd.f32 %v1250_v59, %v948_v25  ;;  %v5941_v19 = vld [vmem:[#allocation321_spill] sm:$0xff]  ;;  %v5946_v46 = vld [vmem:[#allocation330_spill] sm:$0xff] }
 0x1e4   :  { %v5932_v57 = vsub.f32 %v5930_v26, %v5931_v62  ;;  %v1280_v28 = vadd.f32 %v1279_v47, %v934_v3  ;;  %v5942_v39 = vsub.f32 %v5940_v1, %v5941_v19  ;;  %v5943_v35 = vld [vmem:[#allocation309_spill] sm:$0xff]  ;;  %v5947_v17 = vld [vmem:[#allocation344_spill] sm:$0xff]  ;;  %v1266_v52 = vadd.f32 %v1265_v9, %v949_v14  ;;  %v5949_v37 = vld [vmem:[#allocation94_spill] sm:$0xff] }
 0x1e5   :  { %v1295_v4 = vadd.f32 %v1294_v32, %v935_v6  ;;  %v5945_v30 = vsub.f32 %v5943_v35, %v5944_v54  ;;  %v5948_v16 = vsub.f32 %v5946_v46, %v5947_v17  ;;  %v294_v48 = vld [vmem:[#allocation2 + $0x7f0] sm:$0xff]  ;;  %v1252_v25 = vadd.f32 %v1251_v40, %v964_v36  ;;  %v5950_v2 = vld [vmem:[#allocation346_spill] sm:$0xff]  ;;  %v5953_v29 = vld [vmem:[#allocation347_spill] sm:$0xff] }
 0x1e6   :  { %v983_v51 = vand.u32 2147483647, %v5932_v57  ;;  %v998_v8 = vand.u32 2147483647, %v5942_v39  ;;  %v550_v43 = vld [vmem:[#allocation5 + $0x7f0] sm:$0xff]  ;;  %v1281_v24 = vadd.f32 %v1280_v28, %v950_v41  ;;  %v805_v6 = vsub.f32 %v293_v58, %v549_v42  ;;  %v5952_v38 = vld [vmem:[#allocation334_spill] sm:$0xff] }
 0x1e7   :  { %v999_v53 = vand.u32 2147483647, %v5945_v30  ;;  %v1012_v49 = vand.u32 2147483647, %v5948_v16  ;;  %v1296_v3 = vadd.f32 %v1295_v4, %v951_v13  ;;  %v5951_v11 = vsub.f32 %v5949_v37, %v5950_v2  ;;  %v5955_v0 = vld [vmem:[#allocation335_spill] sm:$0xff]  ;;  %v5956_v5 = vld [vmem:[#allocation348_spill] sm:$0xff] }
 0x1e8   :  { %v5954_v59 = vsub.f32 %v5952_v38, %v5953_v29  ;;  %v5957_v47 = vsub.f32 %v5955_v0, %v5956_v5  ;;  %v295_v32 = vld [vmem:[#allocation2 + $0x7f8] sm:$0xff]  ;;  %v1253_v62 = vadd.f32 %v1252_v25, %v980_v18  ;;  %v1267_v36 = vadd.f32 %v1266_v52, %v965_v12  ;;  %v5959_v61 = vld [vmem:[#allocation111_spill] sm:$0xff]  ;;  %v5961_v22 = vld [vmem:[#allocation105_spill] sm:$0xff] }
 0x1e9   :  { %v1013_v44 = vand.u32 2147483647, %v5951_v11  ;;  %v551_v26 = vld [vmem:[#allocation5 + $0x7f8] sm:$0xff]  ;;  %v1282_v14 = vadd.f32 %v1281_v24, %v966_v63  ;;  %v1297_v41 = vadd.f32 %v1296_v3, %v967_v20  ;;  %v806_v13 = vsub.f32 %v294_v48, %v550_v43  ;;  %v5962_v33 = vld [vmem:[#allocation363_spill] sm:$0xff]  ;;  %v5964_v42 = vld [vmem:[#allocation357_spill] sm:$0xff] }
 0x1ea   :  { %v1014_v31 = vand.u32 2147483647, %v5954_v59  ;;  %v1015_v34 = vand.u32 2147483647, %v5957_v47  ;;  %v5958_v57 = vld [vmem:[#allocation90_spill] sm:$0xff]  ;;  %v5963_v21 = vsub.f32 %v5961_v22, %v5962_v33  ;;  %v5965_v40 = vld [vmem:[#allocation364_spill] sm:$0xff]  ;;  %v1254_v28 = vadd.f32 %v1253_v62, %v996_v7 }
 0x1eb   :  { %v5960_v27 = vsub.f32 %v5958_v57, %v5959_v61  ;;  %v5966_v50 = vsub.f32 %v5964_v42, %v5965_v40  ;;  %v1268_v4 = vadd.f32 %v1267_v36, %v981_v45  ;;  %v1283_v1 = vadd.f32 %v1282_v14, %v982_v15  ;;  %v5967_v63 = vld [vmem:[#allocation91_spill] sm:$0xff]  ;;  %v5968_v20 = vld [vmem:[#allocation112_spill] sm:$0xff]  ;;  %v5970_v35 = vld [vmem:[#allocation370_spill] sm:$0xff] }
 0x1ec   :  { %v1029_v58 = vand.u32 2147483647, %v5963_v21  ;;  %v1298_v18 = vadd.f32 %v1297_v41, %v983_v51  ;;  %v807_v12 = vsub.f32 %v295_v32, %v551_v26  ;;  %v5969_v19 = vsub.f32 %v5967_v63, %v5968_v20  ;;  %v5971_v54 = vld [vmem:[#allocation19_spill] sm:$0xff] }
 0x1ed   :  { %v1028_v23 = vand.u32 2147483647, %v5960_v27  ;;  %v1030_v9 = vand.u32 2147483647, %v5966_v50  ;;  %v5972_v30 = vsub.f32 %v5970_v35, %v5971_v54  ;;  %v5973_v17 = vld [vmem:[#allocation371_spill] sm:$0xff]  ;;  %v1255_v25 = vadd.f32 %v1254_v28, %v1012_v49 }
 0x1ee   :  { %v1031_v39 = vand.u32 2147483647, %v5969_v19  ;;  %v5974_v16 = vld [vmem:[#allocation107_spill] sm:$0xff]  ;;  %v1269_v52 = vadd.f32 %v1268_v4, %v997_v60  ;;  %v1284_v24 = vadd.f32 %v1283_v1, %v998_v8  ;;  %v1299_v7 = vadd.f32 %v1298_v18, %v999_v53 }
 0x1ef   :  { %v1044_v46 = vand.u32 2147483647, %v5972_v30  ;;  %v5975_v48 = vsub.f32 %v5973_v17, %v5974_v16  ;;  %v1046_v45 = vand.u32 2147483647, %v790_v10  ;;  %v1047_v15 = vand.u32 2147483647, %v791_v56 }
 0x1f0   :  { %v1060_v51 = vand.u32 2147483647, %v804_v55  ;;  %v1256_v3 = vadd.f32 %v1255_v25, %v1028_v23  ;;  %v1270_v37 = vadd.f32 %v1269_v52, %v1013_v44  ;;  %v1285_v2 = vadd.f32 %v1284_v24, %v1014_v31 }
 0x1f1   :  { %v1045_v43 = vand.u32 2147483647, %v5975_v48  ;;  %v1300_v11 = vadd.f32 %v1299_v7, %v1015_v34  ;;  %v1061_v38 = vand.u32 2147483647, %v805_v6  ;;  %v1062_v29 = vand.u32 2147483647, %v806_v13 }
 0x1f2   :  { %v1063_v59 = vand.u32 2147483647, %v807_v12  ;;  %v1257_v0 = vadd.f32 %v1256_v3, %v1044_v46  ;;  %v1271_v5 = vadd.f32 %v1270_v37, %v1029_v58  ;;  %v1286_v47 = vadd.f32 %v1285_v2, %v1030_v9 }
 0x1f3   :  { %v1301_v32 = vadd.f32 %v1300_v11, %v1031_v39 }
 0x1f4   :  { %v1258_v49 = vadd.f32 %v1257_v0, %v1060_v51  ;;  %v1272_v60 = vadd.f32 %v1271_v5, %v1045_v43  ;;  %v1287_v8 = vadd.f32 %v1286_v47, %v1046_v45 }
 0x1f5   :  { %v1302_v53 = vadd.f32 %v1301_v32, %v1047_v15 }
 0x1f6   :  { %v1273_v10 = vadd.f32 %v1272_v60, %v1061_v38  ;;  %v1288_v56 = vadd.f32 %v1287_v8, %v1062_v29  ;;  %1316 = vst [vmem:[#allocation7 + $0x60] sm:$0xff] %v1258_v49 }
 0x1f7   :  { %v1303_v55 = vadd.f32 %v1302_v53, %v1063_v59 }
 0x1f8   :  { %1317 = vst [vmem:[#allocation7 + $0x68] sm:$0xff] %v1273_v10  ;;  %1318 = vst [vmem:[#allocation7 + $0x70] sm:$0xff] %v1288_v56 }
 0x1f9   :  { %1319 = vst [vmem:[#allocation7 + $0x78] sm:$0xff] %v1303_v55 }
 0x1fa   :  { %1396 = shalt.err (!%p1393_p6)
}
 0x1fb   :  { %s1397_s10 = scalar_lea.hbm %s4261_s2, 2048 }
 0x1fc   :  { %p1398_p7 = scmp.ne.s32.totalorder %s4261_s2, %s1397_s10  ;;  %p1401_p8 = scmp.lt.u32.totalorder %s1397_s10, %s4261_s2 }
 0x1fe   :  { %p1403_p9 = pnand %p1401_p8, %p1398_p7 }
 0x200   :  { %1406 = shalt.err (!%p1403_p9)
}
 0x201   :  { %1329 = dma.vmem_to_hbm [thread:$0]  %s1327_s6, 2048, %s4261_s2, [#allocation4]  }
 0x202   :  { %1411 = dma.done.wait [#allocation4], 2048  }
 0x203   :  { %1412 = vsyncadd [#allocation4], 4294965248 }
 0x204   :  { %1333 = vsyncpa [#allocation3], 1 }
 0x205   :  { %1334 = vsyncpa [#allocation6], 1 }
 0x206   :  { %1335 = vsyncpa [#allocation4], 1 }

</bundles_post_ra>
